<compile_context>
chip_gen: v7x
topology: tpu7x:2x2x1
jax: 0.10.0
libtpu: 0.0.40
codegen_flags: <defaults>
</compile_context>

<pallas_src>
import functools

import numpy as np
import jax
import jax.numpy as jnp
from jax.experimental import pallas as pl
from jax.experimental.pallas import tpu as pltpu


CFG = dict(
    x_dim=[1, 16, 16], k_size=3, c_dims=[8, 8, 16, 16], p_sizes=[2, 2],
    h_dims=[32], y_dim=10, k=5, sig_min=1e-4, sig_max=10.0,
    mu_min=-3.0, mu_max=3.0, bn_eps=1e-5,
)


# ----------------------------------------------------------------------------
# In-kernel building blocks
# ----------------------------------------------------------------------------
def _zero_pad_bounds(pad_ref, h, bt, k):
    """Zero the two padding boundary rows of a (h+2, bt, k) bf16 scratch.

    Done every grid iteration (cheap) so it is correct under megacore parallel
    sharding — do NOT gate on program_id(0)==0.
    """
    z = jnp.zeros((bt, k), jnp.bfloat16)
    pad_ref[0] = z
    pad_ref[h + 1] = z


def _conv_band_relu(pad_ref, w_ref, b_ref, h, bt):
    """3x3 stride-1 pad-1 conv (+ folded BatchNorm + ReLU) as ONE wide-K matmul.

    pad_ref : (h+2, bt, K) bf16 scratch — rows = image rows (rows 0 and h+1 are zeros),
              sublanes = batch tile, lanes = (image column, in-channel).
    w_ref   : (3*K, N) bf16 banded weight (vertical taps stacked along K; horizontal taps,
              horizontal zero padding and the BatchNorm scale folded in).
    b_ref   : (1, N) f32 folded bias, tiled per output column group.
    returns : (h, bt, N) f32 (bias+ReLU applied).
    """
    k = pad_ref.shape[2]
    n = w_ref.shape[1]
    # Lane-concatenate the three vertically shifted views -> (h*bt, 3*K) bf16 LHS,
    # so the tap reduction happens inside the MXU (no f32 accumulator round trips).
    lhs = jnp.concatenate(
        [pad_ref[dy:dy + h].reshape(h * bt, k) for dy in range(3)], axis=-1)
    acc = jnp.dot(lhs, w_ref[...], preferred_element_type=jnp.float32)
    y = jnp.maximum(acc + b_ref[...], 0.0)
    return y.reshape(h, bt, n)


def _pool2x2_phases(y3):
    """2x2 / stride-2 max-pool fused on the conv output.

    y3: (h, bt, 2*L) where lanes [0:L) hold the even output columns and [L:2L) the
    odd output columns of the preceding conv (both 128-lane aligned halves).
    """
    h, bt, l2 = y3.shape
    l = l2 // 2
    y4 = y3.reshape(h // 2, 2, bt, l2)
    v = jnp.maximum(y4[:, 0], y4[:, 1])            # vertical max (row pairs)
    return jnp.maximum(v[:, :, :l], v[:, :, l:])   # horizontal max (phase halves)


def _mln_fused_kernel(x_ref, w1, b1, w2, b2, w3, b3, w4, b4, wfc, bfc, wh, bh,
                      out_ref, pad1, pad2, pad3, pad4, *, bt, sig_min, sig_max):
    f32 = jnp.float32
    bf16 = jnp.bfloat16

    # Zero the row-padding boundary rows (per iteration — megacore-safe).
    _zero_pad_bounds(pad1, 16, bt, 16)
    _zero_pad_bounds(pad2, 16, bt, 128)
    _zero_pad_bounds(pad3, 8, bt, 128)
    _zero_pad_bounds(pad4, 8, bt, 128)

    # --- conv stack: everything stays in VMEM; each stage writes its bf16 output
    # --- directly into the next stage's pad scratch (single store per activation).
    pad1[1:17] = x_ref[...]                                       # bf16 input tile

    a1 = _conv_band_relu(pad1, w1, b1, 16, bt)                    # (16, bt, 128) f32
    pad2[1:17] = a1.astype(bf16)

    a2 = _conv_band_relu(pad2, w2, b2, 16, bt)                    # (16, bt, 256) even|odd
    p1 = _pool2x2_phases(a2)                                      # (8, bt, 128) f32
    pad3[1:9] = p1.astype(bf16)

    a3 = _conv_band_relu(pad3, w3, b3, 8, bt)                     # (8, bt, 128) f32
    pad4[1:9] = a3.astype(bf16)

    a4 = _conv_band_relu(pad4, w4, b4, 8, bt)                     # (8, bt, 256) even|odd
    p2 = _pool2x2_phases(a4).astype(bf16)                         # (4, bt, 128) bf16

    # --- hidden Linear (+ReLU): one dot with K=512 (nn.Flatten NCHW order folded in wfc).
    feat_in = jnp.concatenate([p2[0], p2[1], p2[2], p2[3]], axis=-1)   # (bt, 512) bf16
    feat = jnp.dot(feat_in, wfc[...], preferred_element_type=f32)
    feat = jnp.maximum(feat + bfc[...], 0.0)
    # TODO(synk): Dropout2d(p=0.1) is identity here (eval mode).

    # --- MixtureOfLogits heads: one fused matmul, cols = [pi(5) | mu(50) | sigma(5) | pad]
    z = jnp.dot(feat.astype(bf16), wh[...], preferred_element_type=f32) + bh[...]
    col = jax.lax.broadcasted_iota(jnp.int32, (bt, 128), 1)
    is_pi = col < 5
    is_mu = (col >= 5) & (col < 55)
    is_sig = (col >= 55) & (col < 60)

    # softmax over the pi columns only (masked)
    zp = jnp.where(is_pi, z, -1e30)
    m = jnp.max(zp, axis=1, keepdims=True)
    e = jnp.exp(zp - m)
    s = jnp.sum(e, axis=1, keepdims=True)
    r = pl.reciprocal(s, approx=True)
    r = r * (2.0 - s * r)                  # one Newton step: keeps sum(pi)==1 to ~1e-7
    pi = e * r

    if sig_max is None:
        sig = sig_min + jnp.exp(z)
    else:
        # sigmoid via tanh -> EUP-friendly, overflow-free
        sig = sig_min + (sig_max - sig_min) * (0.5 * (jnp.tanh(0.5 * z) + 1.0))

    out_ref[...] = jnp.where(is_pi, pi, jnp.where(is_sig, sig, jnp.where(is_mu, z, 0.0)))


# ----------------------------------------------------------------------------
# Wrapper: one pallas_call for the whole forward pass
# ----------------------------------------------------------------------------
def _round_up(x, m):
    return (x + m - 1) // m * m


def _choose_bt(b):
    """Batch tile: >=16 (bf16 sublane packing), multiple of 16, capped at 256.

    For b > 16 the batch is split into at least two tiles so both v7x TensorCores get
    work; the cap keeps per-tile VMEM small while amortizing per-grid-step overhead (v6e).
    """
    if b <= 16:
        return 16
    return int(min(256, _round_up((b + 1) // 2, 16)))


def mln_forward(kp, x_nchw):
    """Forward pass of MixtureLogitNetwork_cnn2 (eval mode) as one fused Pallas kernel."""
    cfg = CFG
    b = x_nchw.shape[0]
    bt = _choose_bt(b)
    bp = _round_up(b, bt)

    # (B,1,16,16) NCHW -> (H=16, B, W=16): image rows on the leading axis, batch on
    # sublanes, W on lanes.  Pad the batch up to whole tiles; cast to bf16 (halves DMA).
    xs = jnp.transpose(x_nchw[:, 0, :, :], (1, 0, 2))
    xs = jnp.pad(xs, ((0, 0), (0, bp - b), (0, 0))).astype(jnp.bfloat16)

    w_spec = lambda s: pl.BlockSpec(s, lambda i: (0, 0))   # whole weight/bias, resident

    grid_spec = pltpu.PrefetchScalarGridSpec(
        num_scalar_prefetch=0,
        grid=(bp // bt,),
        in_specs=[
            pl.BlockSpec((16, bt, 16), lambda i: (0, i, 0)),   # input batch tile
            w_spec(kp["w1"].shape), w_spec(kp["b1"].shape),
            w_spec(kp["w2"].shape), w_spec(kp["b2"].shape),
            w_spec(kp["w3"].shape), w_spec(kp["b3"].shape),
            w_spec(kp["w4"].shape), w_spec(kp["b4"].shape),
            w_spec(kp["wfc"].shape), w_spec(kp["bfc"].shape),
            w_spec(kp["wh"].shape), w_spec(kp["bh"].shape),
        ],
        out_specs=pl.BlockSpec((bt, 128), lambda i: (i, 0)),
        scratch_shapes=[
            pltpu.VMEM((18, bt, 16), jnp.bfloat16),    # conv1 row-padding buffer
            pltpu.VMEM((18, bt, 128), jnp.bfloat16),   # conv2
            pltpu.VMEM((10, bt, 128), jnp.bfloat16),   # conv3
            pltpu.VMEM((10, bt, 128), jnp.bfloat16),   # conv4
        ],
    )

    out = pl.pallas_call(
        functools.partial(_mln_fused_kernel, bt=bt,
                          sig_min=cfg["sig_min"], sig_max=cfg["sig_max"]),
        grid_spec=grid_spec,
        out_shape=jax.ShapeDtypeStruct((bp, 128), jnp.float32),
        compiler_params=pltpu.CompilerParams(
            dimension_semantics=("parallel",),          # batch tiles -> megacore / 2 TCs
            vmem_limit_bytes=32 * 1024 * 1024),         # safe budget on v5e / v6e / v7x
    )(xs, kp["w1"], kp["b1"], kp["w2"], kp["b2"], kp["w3"], kp["b3"],
      kp["w4"], kp["b4"], kp["wfc"], kp["bfc"], kp["wh"], kp["bh"])

    out = out[:b]
    k, y_dim = cfg["k"], cfg["y_dim"]
    pi = out[:, :k]
    mu = out[:, k:k + k * y_dim].reshape(b, k, y_dim)
    sigma = jnp.broadcast_to(out[:, k + k * y_dim:k + k * y_dim + k][:, :, None],
                             (b, k, y_dim))
    return {"pi": pi, "mu": mu, "sigma": sigma}


# ----------------------------------------------------------------------------
# Parameter init (PyTorch-equivalent) and packing into the kernel operand format
# ----------------------------------------------------------------------------
def _kaiming(key, shape, fan_in):
    return jax.random.normal(key, shape, jnp.float32) * np.sqrt(2.0 / fan_in)


def init_logical_params(key):
    """PyTorch-equivalent parameters: Conv2d HWIO weights, eval-mode BatchNorm folded
    into per-channel scale/bias, Linear weights in torch (out, in) layout."""
    cfg = CFG
    keys = iter(jax.random.split(key, 32))
    params = {"convs": [], "fcs": []}
    prev_c = cfg["x_dim"][0]
    for i, c_out in enumerate(cfg["c_dims"]):
        fan_in = prev_c * cfg["k_size"] ** 2
        w_hwio = _kaiming(next(keys), (3, 3, prev_c, c_out), fan_in)
        conv_b = jnp.zeros((c_out,), jnp.float32)
        gamma = jnp.ones((c_out,), jnp.float32)
        beta = jnp.zeros((c_out,), jnp.float32)
        r_mean = jnp.zeros((c_out,), jnp.float32)
        r_var = jnp.ones((c_out,), jnp.float32)
        scale = gamma / jnp.sqrt(r_var + cfg["bn_eps"])
        bias = (conv_b - r_mean) * scale + beta
        params["convs"].append(dict(w_hwio=w_hwio, scale=scale, bias=bias,
                                    cout=c_out, pool=(i % 2 == 1)))
        prev_c = c_out
    p_prod = int(np.prod(cfg["p_sizes"]))
    prev_h = prev_c * (cfg["x_dim"][1] // p_prod) * (cfg["x_dim"][2] // p_prod)
    for h_dim in cfg["h_dims"]:
        params["fcs"].append(dict(w=_kaiming(next(keys), (h_dim, prev_h), prev_h),
                                  b=jnp.zeros((h_dim,), jnp.float32)))
        prev_h = h_dim
    k, y_dim = cfg["k"], cfg["y_dim"]
    params["mol"] = dict(
        w_pi=_kaiming(next(keys), (k, prev_h), prev_h),
        b_pi=jnp.zeros((k,), jnp.float32),
        w_mu=_kaiming(next(keys), (k * y_dim, prev_h), prev_h),
        b_mu=jax.random.uniform(next(keys), (k * y_dim,), jnp.float32,
                                cfg["mu_min"], cfg["mu_max"]),
        w_sig=_kaiming(next(keys), (k, prev_h), prev_h),     # SHARE_SIG=True
        b_sig=jnp.zeros((k,), jnp.float32),
    )
    return params


def _band_weight(w_hwio, scale, in_lane, out_lane, k_dim, n_dim):
    """Build the (3*K, N) row-banded conv weight (horizontal taps, horizontal zero
    padding and the BatchNorm scale folded into the band structure). Vertical taps are
    stacked along K (dy-major) to match the kernel's lane concatenation order."""
    w = np.asarray(w_hwio, np.float32) * np.asarray(scale, np.float32)[None, None, None, :]
    _, _, cin, cout = w.shape
    band = np.zeros((3, k_dim, n_dim), np.float32)
    n_cols = len(out_lane)
    for dy in range(3):
        for wo in range(n_cols):
            for dx in range(3):
                wi = wo + dx - 1
                if 0 <= wi < n_cols:
                    band[dy, in_lane[wi]:in_lane[wi] + cin,
                         out_lane[wo]:out_lane[wo] + cout] = w[dy, dx]
    return band.reshape(3 * k_dim, n_dim)


def _bias_lanes(bias, out_lane, cout, n_dim):
    b = np.zeros((1, n_dim), np.float32)
    for lo in out_lane:
        b[0, lo:lo + cout] = np.asarray(bias, np.float32)
    return b


def pack_kernel_params(logical):
    """Pack the logical parameters into the lane-dense operands the fused kernel uses."""
    c = logical["convs"]
    lanes16 = lambda cw: [w * cw for w in range(16)]                 # compact 16-col row
    lanes8 = lambda cw: [w * cw for w in range(8)]                   # compact 8-col row
    eo16 = lambda cw: [(w % 2) * 128 + (w // 2) * cw for w in range(16)]  # even|odd halves
    eo8 = lambda cw: [(w % 2) * 128 + (w // 2) * cw for w in range(8)]

    w1 = _band_weight(c[0]["w_hwio"], c[0]["scale"], lanes16(1), lanes16(8), 16, 128)
    b1 = _bias_lanes(c[0]["bias"], lanes16(8), 8, 128)
    w2 = _band_weight(c[1]["w_hwio"], c[1]["scale"], lanes16(8), eo16(8), 128, 256)
    b2 = _bias_lanes(c[1]["bias"], eo16(8), 8, 256)
    w3 = _band_weight(c[2]["w_hwio"], c[2]["scale"], lanes8(8), lanes8(16), 128, 128)
    b3 = _bias_lanes(c[2]["bias"], lanes8(16), 16, 128)
    w4 = _band_weight(c[3]["w_hwio"], c[3]["scale"], lanes8(16), eo8(16), 128, 256)
    b4 = _bias_lanes(c[3]["bias"], eo8(16), 16, 256)

    # hidden Linear: fold nn.Flatten's NCHW ordering + pooled-lane layout into the weight.
    # LHS lanes are [row0 | row1 | row2 | row3] (128 each), within-row lane = col*16 + ch.
    fc = logical["fcs"][0]
    wt = np.asarray(fc["w"], np.float32)           # (32, 256); torch flat idx = c*16 + h*4 + w
    wfc = np.zeros((4, 128, 128), np.float32)
    for i in range(4):                             # pooled image row
        for j in range(4):                         # pooled image column -> lanes j*16 + c
            for ch in range(16):
                wfc[i, j * 16 + ch, :32] = wt[:, ch * 16 + i * 4 + j]
    wfc = wfc.reshape(512, 128)
    bfc = np.zeros((1, 128), np.float32)
    bfc[0, :32] = np.asarray(fc["b"], np.float32)

    # MixtureOfLogits heads fused into one matmul: cols = [pi(5) | mu(50) | sigma(5) | pad]
    mol = logical["mol"]
    wh = np.zeros((128, 128), np.float32)
    wh[:32, 0:5] = np.asarray(mol["w_pi"], np.float32).T
    wh[:32, 5:55] = np.asarray(mol["w_mu"], np.float32).T
    wh[:32, 55:60] = np.asarray(mol["w_sig"], np.float32).T
    bh = np.zeros((1, 128), np.float32)
    bh[0, 0:5] = np.asarray(mol["b_pi"], np.float32)
    bh[0, 5:55] = np.asarray(mol["b_mu"], np.float32)
    bh[0, 55:60] = np.asarray(mol["b_sig"], np.float32)

    bf = jnp.bfloat16
    return dict(
        w1=jnp.asarray(w1, bf), b1=jnp.asarray(b1),
        w2=jnp.asarray(w2, bf), b2=jnp.asarray(b2),
        w3=jnp.asarray(w3, bf), b3=jnp.asarray(b3),
        w4=jnp.asarray(w4, bf), b4=jnp.asarray(b4),
        wfc=jnp.asarray(wfc, bf), bfc=jnp.asarray(bfc),
        wh=jnp.asarray(wh, bf), bh=jnp.asarray(bh),
    )


# ----------------------------------------------------------------------------
# Pure-JAX reference (mirrors the PyTorch module in eval mode; rounds matmul inputs
# to bf16 the same way the kernel does so the comparison can be tight).
# ----------------------------------------------------------------------------
def reference_forward(logical, x_nchw):
    cfg = CFG
    rd = lambda a: a.astype(jnp.bfloat16).astype(jnp.float32)
    x = x_nchw
    for layer in logical["convs"]:
        w_eff = layer["w_hwio"] * layer["scale"][None, None, None, :]
        y = jax.lax.conv_general_dilated(
            rd(x), rd(w_eff), window_strides=(1, 1), padding=((1, 1), (1, 1)),
            dimension_numbers=("NCHW", "HWIO", "NCHW"))
        y = jnp.maximum(y + layer["bias"][None, :, None, None], 0.0)
        if layer["pool"]:
            y = jnp.maximum(jnp.maximum(y[:, :, 0::2, 0::2], y[:, :, 0::2, 1::2]),
                            jnp.maximum(y[:, :, 1::2, 0::2], y[:, :, 1::2, 1::2]))
        x = y
    feat = x.reshape(x.shape[0], -1)                  # nn.Flatten (NCHW order)
    for fcl in logical["fcs"]:
        feat = jnp.maximum(rd(feat) @ rd(fcl["w"]).T + fcl["b"], 0.0)
    mol = logical["mol"]
    fr = rd(feat)
    pi = jax.nn.softmax(fr @ rd(mol["w_pi"]).T + mol["b_pi"], axis=1)
    mu = (fr @ rd(mol["w_mu"]).T + mol["b_mu"]).reshape(-1, cfg["k"], cfg["y_dim"])
    s = fr @ rd(mol["w_sig"]).T + mol["b_sig"]
    if cfg["sig_max"] is None:
        sigma = cfg["sig_min"] + jnp.exp(s)
    else:
        sigma = cfg["sig_min"] + (cfg["sig_max"] - cfg["sig_min"]) * jax.nn.sigmoid(s)
    sigma = jnp.broadcast_to(sigma[:, :, None], mu.shape)
    return {"pi": pi, "mu": mu, "sigma": sigma}


if __name__ == "__main__":
    key = jax.random.PRNGKey(0)
    k_param, k_x = jax.random.split(key)
    logical = init_logical_params(k_param)
    kops = pack_kernel_params(logical)

    batch = 2
    x = jax.random.normal(
        k_x, (batch, CFG["x_dim"][0], CFG["x_dim"][1], CFG["x_dim"][2]), dtype=jnp.float32)

    fwd = jax.jit(mln_forward)
    out = jax.block_until_ready(fwd(kops, x))

    assert out["pi"].shape == (batch, CFG["k"])
    assert out["mu"].shape == (batch, CFG["k"], CFG["y_dim"])
    assert out["sigma"].shape == (batch, CFG["k"], CFG["y_dim"])
    assert bool(jnp.all(jnp.isfinite(out["pi"])))
    assert bool(jnp.allclose(jnp.sum(out["pi"], axis=1), 1.0, atol=1e-4))
    assert bool(jnp.all(out["sigma"] > 0.0))

    ref = reference_forward(logical, x)
    for name in ("pi", "mu", "sigma"):
        assert bool(jnp.allclose(out[name], ref[name], rtol=2e-2, atol=2e-2)), name

    print("KERNEL_OK")
</pallas_src>

<mosaic_0001>
module attributes {stable_mosaic.version = 11 : i64} {
  func.func @_mln_fused_kernel(%arg0: i32, %arg1: memref<16x16x16xbf16, #tpu.memory_space<vmem>>, %arg2: memref<48x128xbf16, #tpu.memory_space<vmem>>, %arg3: memref<1x128xf32, #tpu.memory_space<vmem>>, %arg4: memref<384x256xbf16, #tpu.memory_space<vmem>>, %arg5: memref<1x256xf32, #tpu.memory_space<vmem>>, %arg6: memref<384x128xbf16, #tpu.memory_space<vmem>>, %arg7: memref<1x128xf32, #tpu.memory_space<vmem>>, %arg8: memref<384x256xbf16, #tpu.memory_space<vmem>>, %arg9: memref<1x256xf32, #tpu.memory_space<vmem>>, %arg10: memref<512x128xbf16, #tpu.memory_space<vmem>>, %arg11: memref<1x128xf32, #tpu.memory_space<vmem>>, %arg12: memref<128x128xbf16, #tpu.memory_space<vmem>>, %arg13: memref<1x128xf32, #tpu.memory_space<vmem>>, %arg14: memref<16x128xf32, #tpu.memory_space<vmem>>, %arg15: memref<18x16x16xbf16, #tpu.memory_space<vmem>>, %arg16: memref<18x16x128xbf16, #tpu.memory_space<vmem>>, %arg17: memref<10x16x128xbf16, #tpu.memory_space<vmem>>, %arg18: memref<10x16x128xbf16, #tpu.memory_space<vmem>>) attributes {dimension_semantics = [#tpu.dimension_semantics<parallel>], iteration_bounds = array<i64: 1>, scalar_prefetch = 0 : i64, scratch_operands = 4 : i64, tpu.core_type = #tpu.core_type<tc>, window_params = [{transform_indices = @transform_0, window_bounds = array<i64: 16, 16, 16>}, {pipeline_mode = #tpu.pipeline_mode<synchronous>, transform_indices = @transform_1, window_bounds = array<i64: 48, 128>}, {pipeline_mode = #tpu.pipeline_mode<synchronous>, transform_indices = @transform_2, window_bounds = array<i64: 1, 128>}, {pipeline_mode = #tpu.pipeline_mode<synchronous>, transform_indices = @transform_3, window_bounds = array<i64: 384, 256>}, {pipeline_mode = #tpu.pipeline_mode<synchronous>, transform_indices = @transform_4, window_bounds = array<i64: 1, 256>}, {pipeline_mode = #tpu.pipeline_mode<synchronous>, transform_indices = @transform_5, window_bounds = array<i64: 384, 128>}, {pipeline_mode = #tpu.pipeline_mode<synchronous>, transform_indices = @transform_6, window_bounds = array<i64: 1, 128>}, {pipeline_mode = #tpu.pipeline_mode<synchronous>, transform_indices = @transform_7, window_bounds = array<i64: 384, 256>}, {pipeline_mode = #tpu.pipeline_mode<synchronous>, transform_indices = @transform_8, window_bounds = array<i64: 1, 256>}, {pipeline_mode = #tpu.pipeline_mode<synchronous>, transform_indices = @transform_9, window_bounds = array<i64: 512, 128>}, {pipeline_mode = #tpu.pipeline_mode<synchronous>, transform_indices = @transform_10, window_bounds = array<i64: 1, 128>}, {pipeline_mode = #tpu.pipeline_mode<synchronous>, transform_indices = @transform_11, window_bounds = array<i64: 128, 128>}, {pipeline_mode = #tpu.pipeline_mode<synchronous>, transform_indices = @transform_12, window_bounds = array<i64: 1, 128>}, {transform_indices = @transform_13, window_bounds = array<i64: 16, 128>}]} {
    %cst = arith.constant 0.000000e+00 : bf16
    %0 = vector.broadcast %cst : bf16 to vector<16x16xbf16>
    %c0 = arith.constant 0 : index
    %c0_0 = arith.constant 0 : index
    %c0_1 = arith.constant 0 : index
    %1 = vector.load %arg15[%c0, %c0_0, %c0_1] : memref<18x16x16xbf16, #tpu.memory_space<vmem>>, vector<1x16x16xbf16>
    %2 = vector.shape_cast %1 : vector<1x16x16xbf16> to vector<16x16xbf16>
    %3 = vector.shape_cast %0 : vector<16x16xbf16> to vector<1x16x16xbf16>
    tpu.vector_store %arg15[%c0, %c0_0, %c0_1], %3 {strides = array<i32>} : memref<18x16x16xbf16, #tpu.memory_space<vmem>>, vector<1x16x16xbf16>,
    %c17 = arith.constant 17 : index
    %c0_2 = arith.constant 0 : index
    %c0_3 = arith.constant 0 : index
    %4 = vector.load %arg15[%c17, %c0_2, %c0_3] : memref<18x16x16xbf16, #tpu.memory_space<vmem>>, vector<1x16x16xbf16>
    %5 = vector.shape_cast %4 : vector<1x16x16xbf16> to vector<16x16xbf16>
    %6 = vector.shape_cast %0 : vector<16x16xbf16> to vector<1x16x16xbf16>
    tpu.vector_store %arg15[%c17, %c0_2, %c0_3], %6 {strides = array<i32>} : memref<18x16x16xbf16, #tpu.memory_space<vmem>>, vector<1x16x16xbf16>,
    %cst_4 = arith.constant 0.000000e+00 : bf16
    %7 = vector.broadcast %cst_4 : bf16 to vector<16x128xbf16>
    %c0_5 = arith.constant 0 : index
    %c0_6 = arith.constant 0 : index
    %c0_7 = arith.constant 0 : index
    %8 = vector.load %arg16[%c0_5, %c0_6, %c0_7] : memref<18x16x128xbf16, #tpu.memory_space<vmem>>, vector<1x16x128xbf16>
    %9 = vector.shape_cast %8 : vector<1x16x128xbf16> to vector<16x128xbf16>
    %10 = vector.shape_cast %7 : vector<16x128xbf16> to vector<1x16x128xbf16>
    tpu.vector_store %arg16[%c0_5, %c0_6, %c0_7], %10 {strides = array<i32>} : memref<18x16x128xbf16, #tpu.memory_space<vmem>>, vector<1x16x128xbf16>,
    %c17_8 = arith.constant 17 : index
    %c0_9 = arith.constant 0 : index
    %c0_10 = arith.constant 0 : index
    %11 = vector.load %arg16[%c17_8, %c0_9, %c0_10] : memref<18x16x128xbf16, #tpu.memory_space<vmem>>, vector<1x16x128xbf16>
    %12 = vector.shape_cast %11 : vector<1x16x128xbf16> to vector<16x128xbf16>
    %13 = vector.shape_cast %7 : vector<16x128xbf16> to vector<1x16x128xbf16>
    tpu.vector_store %arg16[%c17_8, %c0_9, %c0_10], %13 {strides = array<i32>} : memref<18x16x128xbf16, #tpu.memory_space<vmem>>, vector<1x16x128xbf16>,
    %cst_11 = arith.constant 0.000000e+00 : bf16
    %14 = vector.broadcast %cst_11 : bf16 to vector<16x128xbf16>
    %c0_12 = arith.constant 0 : index
    %c0_13 = arith.constant 0 : index
    %c0_14 = arith.constant 0 : index
    %15 = vector.load %arg17[%c0_12, %c0_13, %c0_14] : memref<10x16x128xbf16, #tpu.memory_space<vmem>>, vector<1x16x128xbf16>
    %16 = vector.shape_cast %15 : vector<1x16x128xbf16> to vector<16x128xbf16>
    %17 = vector.shape_cast %14 : vector<16x128xbf16> to vector<1x16x128xbf16>
    tpu.vector_store %arg17[%c0_12, %c0_13, %c0_14], %17 {strides = array<i32>} : memref<10x16x128xbf16, #tpu.memory_space<vmem>>, vector<1x16x128xbf16>,
    %c9 = arith.constant 9 : index
    %c0_15 = arith.constant 0 : index
    %c0_16 = arith.constant 0 : index
    %18 = vector.load %arg17[%c9, %c0_15, %c0_16] : memref<10x16x128xbf16, #tpu.memory_space<vmem>>, vector<1x16x128xbf16>
    %19 = vector.shape_cast %18 : vector<1x16x128xbf16> to vector<16x128xbf16>
    %20 = vector.shape_cast %14 : vector<16x128xbf16> to vector<1x16x128xbf16>
    tpu.vector_store %arg17[%c9, %c0_15, %c0_16], %20 {strides = array<i32>} : memref<10x16x128xbf16, #tpu.memory_space<vmem>>, vector<1x16x128xbf16>,
    %cst_17 = arith.constant 0.000000e+00 : bf16
    %21 = vector.broadcast %cst_17 : bf16 to vector<16x128xbf16>
    %c0_18 = arith.constant 0 : index
    %c0_19 = arith.constant 0 : index
    %c0_20 = arith.constant 0 : index
    %22 = vector.load %arg18[%c0_18, %c0_19, %c0_20] : memref<10x16x128xbf16, #tpu.memory_space<vmem>>, vector<1x16x128xbf16>
    %23 = vector.shape_cast %22 : vector<1x16x128xbf16> to vector<16x128xbf16>
    %24 = vector.shape_cast %21 : vector<16x128xbf16> to vector<1x16x128xbf16>
    tpu.vector_store %arg18[%c0_18, %c0_19, %c0_20], %24 {strides = array<i32>} : memref<10x16x128xbf16, #tpu.memory_space<vmem>>, vector<1x16x128xbf16>,
    %c9_21 = arith.constant 9 : index
    %c0_22 = arith.constant 0 : index
    %c0_23 = arith.constant 0 : index
    %25 = vector.load %arg18[%c9_21, %c0_22, %c0_23] : memref<10x16x128xbf16, #tpu.memory_space<vmem>>, vector<1x16x128xbf16>
    %26 = vector.shape_cast %25 : vector<1x16x128xbf16> to vector<16x128xbf16>
    %27 = vector.shape_cast %21 : vector<16x128xbf16> to vector<1x16x128xbf16>
    tpu.vector_store %arg18[%c9_21, %c0_22, %c0_23], %27 {strides = array<i32>} : memref<10x16x128xbf16, #tpu.memory_space<vmem>>, vector<1x16x128xbf16>,
    %c0_24 = arith.constant 0 : index
    %c0_25 = arith.constant 0 : index
    %c0_26 = arith.constant 0 : index
    %28 = vector.load %arg1[%c0_24, %c0_25, %c0_26] : memref<16x16x16xbf16, #tpu.memory_space<vmem>>, vector<16x16x16xbf16>
    %c1 = arith.constant 1 : index
    %c0_27 = arith.constant 0 : index
    %c0_28 = arith.constant 0 : index
    %29 = vector.load %arg15[%c1, %c0_27, %c0_28] : memref<18x16x16xbf16, #tpu.memory_space<vmem>>, vector<16x16x16xbf16>
    tpu.vector_store %arg15[%c1, %c0_27, %c0_28], %28 {strides = array<i32>} : memref<18x16x16xbf16, #tpu.memory_space<vmem>>, vector<16x16x16xbf16>,
    %c0_29 = arith.constant 0 : index
    %c0_30 = arith.constant 0 : index
    %c0_31 = arith.constant 0 : index
    %30 = vector.load %arg15[%c0_29, %c0_30, %c0_31] : memref<18x16x16xbf16, #tpu.memory_space<vmem>>, vector<16x16x16xbf16>
    %31 = vector.shape_cast %30 : vector<16x16x16xbf16> to vector<256x16xbf16>
    %c1_32 = arith.constant 1 : index
    %c0_33 = arith.constant 0 : index
    %c0_34 = arith.constant 0 : index
    %32 = vector.load %arg15[%c1_32, %c0_33, %c0_34] : memref<18x16x16xbf16, #tpu.memory_space<vmem>>, vector<16x16x16xbf16>
    %33 = vector.shape_cast %32 : vector<16x16x16xbf16> to vector<256x16xbf16>
    %c2 = arith.constant 2 : index
    %c0_35 = arith.constant 0 : index
    %c0_36 = arith.constant 0 : index
    %34 = vector.load %arg15[%c2, %c0_35, %c0_36] : memref<18x16x16xbf16, #tpu.memory_space<vmem>>, vector<16x16x16xbf16>
    %35 = vector.shape_cast %34 : vector<16x16x16xbf16> to vector<256x16xbf16>
    %36 = tpu.concatenate %31, %33, %35 in 1 : vector<256x16xbf16>, vector<256x16xbf16>, vector<256x16xbf16> -> vector<256x48xbf16>
    %c0_37 = arith.constant 0 : index
    %c0_38 = arith.constant 0 : index
    %37 = vector.load %arg2[%c0_37, %c0_38] : memref<48x128xbf16, #tpu.memory_space<vmem>>, vector<48x128xbf16>
    %cst_39 = arith.constant dense<0.000000e+00> : vector<256x128xf32>
    %38 = tpu.matmul %36, %37, %cst_39 {dimension_numbers = #tpu.dot_dimension_numbers<[1], [0], [0], [1], [0, 0, 1, 1], [], []>} : vector<256x48xbf16>, vector<48x128xbf16>, vector<256x128xf32> -> vector<256x128xf32>
    %c0_40 = arith.constant 0 : index
    %c0_41 = arith.constant 0 : index
    %39 = vector.load %arg3[%c0_40, %c0_41] : memref<1x128xf32, #tpu.memory_space<vmem>>, vector<1x128xf32>
    %40 = vector.broadcast %39 : vector<1x128xf32> to vector<256x128xf32>
    %41 = arith.addf %38, %40 : vector<256x128xf32>
    %cst_42 = arith.constant 0.000000e+00 : f32
    %42 = vector.broadcast %cst_42 : f32 to vector<256x128xf32>
    %43 = arith.maximumf %41, %42 : vector<256x128xf32>
    %44 = vector.shape_cast %43 : vector<256x128xf32> to vector<16x16x128xf32>
    %45 = arith.truncf %44 : vector<16x16x128xf32> to vector<16x16x128xbf16>
    %c1_43 = arith.constant 1 : index
    %c0_44 = arith.constant 0 : index
    %c0_45 = arith.constant 0 : index
    %46 = vector.load %arg16[%c1_43, %c0_44, %c0_45] : memref<18x16x128xbf16, #tpu.memory_space<vmem>>, vector<16x16x128xbf16>
    tpu.vector_store %arg16[%c1_43, %c0_44, %c0_45], %45 {strides = array<i32>} : memref<18x16x128xbf16, #tpu.memory_space<vmem>>, vector<16x16x128xbf16>,
    %c0_46 = arith.constant 0 : index
    %c0_47 = arith.constant 0 : index
    %c0_48 = arith.constant 0 : index
    %47 = vector.load %arg16[%c0_46, %c0_47, %c0_48] : memref<18x16x128xbf16, #tpu.memory_space<vmem>>, vector<16x16x128xbf16>
    %48 = vector.shape_cast %47 : vector<16x16x128xbf16> to vector<256x128xbf16>
    %c1_49 = arith.constant 1 : index
    %c0_50 = arith.constant 0 : index
    %c0_51 = arith.constant 0 : index
    %49 = vector.load %arg16[%c1_49, %c0_50, %c0_51] : memref<18x16x128xbf16, #tpu.memory_space<vmem>>, vector<16x16x128xbf16>
    %50 = vector.shape_cast %49 : vector<16x16x128xbf16> to vector<256x128xbf16>
    %c2_52 = arith.constant 2 : index
    %c0_53 = arith.constant 0 : index
    %c0_54 = arith.constant 0 : index
    %51 = vector.load %arg16[%c2_52, %c0_53, %c0_54] : memref<18x16x128xbf16, #tpu.memory_space<vmem>>, vector<16x16x128xbf16>
    %52 = vector.shape_cast %51 : vector<16x16x128xbf16> to vector<256x128xbf16>
    %53 = tpu.concatenate %48, %50, %52 in 1 : vector<256x128xbf16>, vector<256x128xbf16>, vector<256x128xbf16> -> vector<256x384xbf16>
    %c0_55 = arith.constant 0 : index
    %c0_56 = arith.constant 0 : index
    %54 = vector.load %arg4[%c0_55, %c0_56] : memref<384x256xbf16, #tpu.memory_space<vmem>>, vector<384x256xbf16>
    %cst_57 = arith.constant dense<0.000000e+00> : vector<256x256xf32>
    %55 = tpu.matmul %53, %54, %cst_57 {dimension_numbers = #tpu.dot_dimension_numbers<[1], [0], [0], [1], [0, 0, 1, 1], [], []>} : vector<256x384xbf16>, vector<384x256xbf16>, vector<256x256xf32> -> vector<256x256xf32>
    %c0_58 = arith.constant 0 : index
    %c0_59 = arith.constant 0 : index
    %56 = vector.load %arg5[%c0_58, %c0_59] : memref<1x256xf32, #tpu.memory_space<vmem>>, vector<1x256xf32>
    %57 = vector.broadcast %56 : vector<1x256xf32> to vector<256x256xf32>
    %58 = arith.addf %55, %57 : vector<256x256xf32>
    %cst_60 = arith.constant 0.000000e+00 : f32
    %59 = vector.broadcast %cst_60 : f32 to vector<256x256xf32>
    %60 = arith.maximumf %58, %59 : vector<256x256xf32>
    %61 = vector.shape_cast %60 : vector<256x256xf32> to vector<16x16x256xf32>
    %62 = vector.shape_cast %61 : vector<16x16x256xf32> to vector<8x2x16x256xf32>
    %63 = vector.extract_strided_slice %62 {offsets = [0, 0, 0, 0], sizes = [8, 1, 16, 256], strides = [1, 1, 1, 1]} : vector<8x2x16x256xf32> to vector<8x1x16x256xf32>
    %64 = vector.shape_cast %63 : vector<8x1x16x256xf32> to vector<8x16x256xf32>
    %65 = vector.extract_strided_slice %62 {offsets = [0, 1, 0, 0], sizes = [8, 1, 16, 256], strides = [1, 1, 1, 1]} : vector<8x2x16x256xf32> to vector<8x1x16x256xf32>
    %66 = vector.shape_cast %65 : vector<8x1x16x256xf32> to vector<8x16x256xf32>
    %67 = arith.maximumf %64, %66 : vector<8x16x256xf32>
    %68 = vector.extract_strided_slice %67 {offsets = [0, 0, 0], sizes = [8, 16, 128], strides = [1, 1, 1]} : vector<8x16x256xf32> to vector<8x16x128xf32>
    %69 = vector.extract_strided_slice %67 {offsets = [0, 0, 128], sizes = [8, 16, 128], strides = [1, 1, 1]} : vector<8x16x256xf32> to vector<8x16x128xf32>
    %70 = arith.maximumf %68, %69 : vector<8x16x128xf32>
    %71 = arith.truncf %70 : vector<8x16x128xf32> to vector<8x16x128xbf16>
    %c1_61 = arith.constant 1 : index
    %c0_62 = arith.constant 0 : index
    %c0_63 = arith.constant 0 : index
    %72 = vector.load %arg17[%c1_61, %c0_62, %c0_63] : memref<10x16x128xbf16, #tpu.memory_space<vmem>>, vector<8x16x128xbf16>
    tpu.vector_store %arg17[%c1_61, %c0_62, %c0_63], %71 {strides = array<i32>} : memref<10x16x128xbf16, #tpu.memory_space<vmem>>, vector<8x16x128xbf16>,
    %c0_64 = arith.constant 0 : index
    %c0_65 = arith.constant 0 : index
    %c0_66 = arith.constant 0 : index
    %73 = vector.load %arg17[%c0_64, %c0_65, %c0_66] : memref<10x16x128xbf16, #tpu.memory_space<vmem>>, vector<8x16x128xbf16>
    %74 = vector.shape_cast %73 : vector<8x16x128xbf16> to vector<128x128xbf16>
    %c1_67 = arith.constant 1 : index
    %c0_68 = arith.constant 0 : index
    %c0_69 = arith.constant 0 : index
    %75 = vector.load %arg17[%c1_67, %c0_68, %c0_69] : memref<10x16x128xbf16, #tpu.memory_space<vmem>>, vector<8x16x128xbf16>
    %76 = vector.shape_cast %75 : vector<8x16x128xbf16> to vector<128x128xbf16>
    %c2_70 = arith.constant 2 : index
    %c0_71 = arith.constant 0 : index
    %c0_72 = arith.constant 0 : index
    %77 = vector.load %arg17[%c2_70, %c0_71, %c0_72] : memref<10x16x128xbf16, #tpu.memory_space<vmem>>, vector<8x16x128xbf16>
    %78 = vector.shape_cast %77 : vector<8x16x128xbf16> to vector<128x128xbf16>
    %79 = tpu.concatenate %74, %76, %78 in 1 : vector<128x128xbf16>, vector<128x128xbf16>, vector<128x128xbf16> -> vector<128x384xbf16>
    %c0_73 = arith.constant 0 : index
    %c0_74 = arith.constant 0 : index
    %80 = vector.load %arg6[%c0_73, %c0_74] : memref<384x128xbf16, #tpu.memory_space<vmem>>, vector<384x128xbf16>
    %cst_75 = arith.constant dense<0.000000e+00> : vector<128x128xf32>
    %81 = tpu.matmul %79, %80, %cst_75 {dimension_numbers = #tpu.dot_dimension_numbers<[1], [0], [0], [1], [0, 0, 1, 1], [], []>} : vector<128x384xbf16>, vector<384x128xbf16>, vector<128x128xf32> -> vector<128x128xf32>
    %c0_76 = arith.constant 0 : index
    %c0_77 = arith.constant 0 : index
    %82 = vector.load %arg7[%c0_76, %c0_77] : memref<1x128xf32, #tpu.memory_space<vmem>>, vector<1x128xf32>
    %83 = vector.broadcast %82 : vector<1x128xf32> to vector<128x128xf32>
    %84 = arith.addf %81, %83 : vector<128x128xf32>
    %cst_78 = arith.constant 0.000000e+00 : f32
    %85 = vector.broadcast %cst_78 : f32 to vector<128x128xf32>
    %86 = arith.maximumf %84, %85 : vector<128x128xf32>
    %87 = vector.shape_cast %86 : vector<128x128xf32> to vector<8x16x128xf32>
    %88 = arith.truncf %87 : vector<8x16x128xf32> to vector<8x16x128xbf16>
    %c1_79 = arith.constant 1 : index
    %c0_80 = arith.constant 0 : index
    %c0_81 = arith.constant 0 : index
    %89 = vector.load %arg18[%c1_79, %c0_80, %c0_81] : memref<10x16x128xbf16, #tpu.memory_space<vmem>>, vector<8x16x128xbf16>
    tpu.vector_store %arg18[%c1_79, %c0_80, %c0_81], %88 {strides = array<i32>} : memref<10x16x128xbf16, #tpu.memory_space<vmem>>, vector<8x16x128xbf16>,
    %c0_82 = arith.constant 0 : index
    %c0_83 = arith.constant 0 : index
    %c0_84 = arith.constant 0 : index
    %90 = vector.load %arg18[%c0_82, %c0_83, %c0_84] : memref<10x16x128xbf16, #tpu.memory_space<vmem>>, vector<8x16x128xbf16>
    %91 = vector.shape_cast %90 : vector<8x16x128xbf16> to vector<128x128xbf16>
    %c1_85 = arith.constant 1 : index
    %c0_86 = arith.constant 0 : index
    %c0_87 = arith.constant 0 : index
    %92 = vector.load %arg18[%c1_85, %c0_86, %c0_87] : memref<10x16x128xbf16, #tpu.memory_space<vmem>>, vector<8x16x128xbf16>
    %93 = vector.shape_cast %92 : vector<8x16x128xbf16> to vector<128x128xbf16>
    %c2_88 = arith.constant 2 : index
    %c0_89 = arith.constant 0 : index
    %c0_90 = arith.constant 0 : index
    %94 = vector.load %arg18[%c2_88, %c0_89, %c0_90] : memref<10x16x128xbf16, #tpu.memory_space<vmem>>, vector<8x16x128xbf16>
    %95 = vector.shape_cast %94 : vector<8x16x128xbf16> to vector<128x128xbf16>
    %96 = tpu.concatenate %91, %93, %95 in 1 : vector<128x128xbf16>, vector<128x128xbf16>, vector<128x128xbf16> -> vector<128x384xbf16>
    %c0_91 = arith.constant 0 : index
    %c0_92 = arith.constant 0 : index
    %97 = vector.load %arg8[%c0_91, %c0_92] : memref<384x256xbf16, #tpu.memory_space<vmem>>, vector<384x256xbf16>
    %cst_93 = arith.constant dense<0.000000e+00> : vector<128x256xf32>
    %98 = tpu.matmul %96, %97, %cst_93 {dimension_numbers = #tpu.dot_dimension_numbers<[1], [0], [0], [1], [0, 0, 1, 1], [], []>} : vector<128x384xbf16>, vector<384x256xbf16>, vector<128x256xf32> -> vector<128x256xf32>
    %c0_94 = arith.constant 0 : index
    %c0_95 = arith.constant 0 : index
    %99 = vector.load %arg9[%c0_94, %c0_95] : memref<1x256xf32, #tpu.memory_space<vmem>>, vector<1x256xf32>
    %100 = vector.broadcast %99 : vector<1x256xf32> to vector<128x256xf32>
    %101 = arith.addf %98, %100 : vector<128x256xf32>
    %cst_96 = arith.constant 0.000000e+00 : f32
    %102 = vector.broadcast %cst_96 : f32 to vector<128x256xf32>
    %103 = arith.maximumf %101, %102 : vector<128x256xf32>
    %104 = vector.shape_cast %103 : vector<128x256xf32> to vector<8x16x256xf32>
    %105 = vector.shape_cast %104 : vector<8x16x256xf32> to vector<4x2x16x256xf32>
    %106 = vector.extract_strided_slice %105 {offsets = [0, 0, 0, 0], sizes = [4, 1, 16, 256], strides = [1, 1, 1, 1]} : vector<4x2x16x256xf32> to vector<4x1x16x256xf32>
    %107 = vector.shape_cast %106 : vector<4x1x16x256xf32> to vector<4x16x256xf32>
    %108 = vector.extract_strided_slice %105 {offsets = [0, 1, 0, 0], sizes = [4, 1, 16, 256], strides = [1, 1, 1, 1]} : vector<4x2x16x256xf32> to vector<4x1x16x256xf32>
    %109 = vector.shape_cast %108 : vector<4x1x16x256xf32> to vector<4x16x256xf32>
    %110 = arith.maximumf %107, %109 : vector<4x16x256xf32>
    %111 = vector.extract_strided_slice %110 {offsets = [0, 0, 0], sizes = [4, 16, 128], strides = [1, 1, 1]} : vector<4x16x256xf32> to vector<4x16x128xf32>
    %112 = vector.extract_strided_slice %110 {offsets = [0, 0, 128], sizes = [4, 16, 128], strides = [1, 1, 1]} : vector<4x16x256xf32> to vector<4x16x128xf32>
    %113 = arith.maximumf %111, %112 : vector<4x16x128xf32>
    %114 = arith.truncf %113 : vector<4x16x128xf32> to vector<4x16x128xbf16>
    %115 = vector.extract_strided_slice %114 {offsets = [0, 0, 0], sizes = [1, 16, 128], strides = [1, 1, 1]} : vector<4x16x128xbf16> to vector<1x16x128xbf16>
    %116 = vector.shape_cast %115 : vector<1x16x128xbf16> to vector<16x128xbf16>
    %117 = vector.extract_strided_slice %114 {offsets = [1, 0, 0], sizes = [1, 16, 128], strides = [1, 1, 1]} : vector<4x16x128xbf16> to vector<1x16x128xbf16>
    %118 = vector.shape_cast %117 : vector<1x16x128xbf16> to vector<16x128xbf16>
    %119 = vector.extract_strided_slice %114 {offsets = [2, 0, 0], sizes = [1, 16, 128], strides = [1, 1, 1]} : vector<4x16x128xbf16> to vector<1x16x128xbf16>
    %120 = vector.shape_cast %119 : vector<1x16x128xbf16> to vector<16x128xbf16>
    %121 = vector.extract_strided_slice %114 {offsets = [3, 0, 0], sizes = [1, 16, 128], strides = [1, 1, 1]} : vector<4x16x128xbf16> to vector<1x16x128xbf16>
    %122 = vector.shape_cast %121 : vector<1x16x128xbf16> to vector<16x128xbf16>
    %123 = tpu.concatenate %116, %118, %120, %122 in 1 : vector<16x128xbf16>, vector<16x128xbf16>, vector<16x128xbf16>, vector<16x128xbf16> -> vector<16x512xbf16>
    %c0_97 = arith.constant 0 : index
    %c0_98 = arith.constant 0 : index
    %124 = vector.load %arg10[%c0_97, %c0_98] : memref<512x128xbf16, #tpu.memory_space<vmem>>, vector<512x128xbf16>
    %cst_99 = arith.constant dense<0.000000e+00> : vector<16x128xf32>
    %125 = tpu.matmul %123, %124, %cst_99 {dimension_numbers = #tpu.dot_dimension_numbers<[1], [0], [0], [1], [0, 0, 1, 1], [], []>} : vector<16x512xbf16>, vector<512x128xbf16>, vector<16x128xf32> -> vector<16x128xf32>
    %c0_100 = arith.constant 0 : index
    %c0_101 = arith.constant 0 : index
    %126 = vector.load %arg11[%c0_100, %c0_101] : memref<1x128xf32, #tpu.memory_space<vmem>>, vector<1x128xf32>
    %127 = vector.broadcast %126 : vector<1x128xf32> to vector<16x128xf32>
    %128 = arith.addf %125, %127 : vector<16x128xf32>
    %cst_102 = arith.constant 0.000000e+00 : f32
    %129 = vector.broadcast %cst_102 : f32 to vector<16x128xf32>
    %130 = arith.maximumf %128, %129 : vector<16x128xf32>
    %131 = arith.truncf %130 : vector<16x128xf32> to vector<16x128xbf16>
    %c0_103 = arith.constant 0 : index
    %c0_104 = arith.constant 0 : index
    %132 = vector.load %arg12[%c0_103, %c0_104] : memref<128x128xbf16, #tpu.memory_space<vmem>>, vector<128x128xbf16>
    %cst_105 = arith.constant dense<0.000000e+00> : vector<16x128xf32>
    %133 = tpu.matmul %131, %132, %cst_105 {dimension_numbers = #tpu.dot_dimension_numbers<[1], [0], [0], [1], [0, 0, 1, 1], [], []>} : vector<16x128xbf16>, vector<128x128xbf16>, vector<16x128xf32> -> vector<16x128xf32>
    %c0_106 = arith.constant 0 : index
    %c0_107 = arith.constant 0 : index
    %134 = vector.load %arg13[%c0_106, %c0_107] : memref<1x128xf32, #tpu.memory_space<vmem>>, vector<1x128xf32>
    %135 = vector.broadcast %134 : vector<1x128xf32> to vector<16x128xf32>
    %136 = arith.addf %133, %135 : vector<16x128xf32>
    %137 = tpu.iota {dimensions = array<i32: 1>} : vector<16x128xi32>
    %c5_i32 = arith.constant 5 : i32
    %138 = vector.broadcast %c5_i32 : i32 to vector<16x128xi32>
    %139 = arith.cmpi slt, %137, %138 : vector<16x128xi32>
    %c5_i32_108 = arith.constant 5 : i32
    %140 = vector.broadcast %c5_i32_108 : i32 to vector<16x128xi32>
    %141 = arith.cmpi sge, %137, %140 : vector<16x128xi32>
    %c55_i32 = arith.constant 55 : i32
    %142 = vector.broadcast %c55_i32 : i32 to vector<16x128xi32>
    %143 = arith.cmpi slt, %137, %142 : vector<16x128xi32>
    %144 = arith.andi %141, %143 : vector<16x128xi1>
    %c55_i32_109 = arith.constant 55 : i32
    %145 = vector.broadcast %c55_i32_109 : i32 to vector<16x128xi32>
    %146 = arith.cmpi sge, %137, %145 : vector<16x128xi32>
    %c60_i32 = arith.constant 60 : i32
    %147 = vector.broadcast %c60_i32 : i32 to vector<16x128xi32>
    %148 = arith.cmpi slt, %137, %147 : vector<16x128xi32>
    %149 = arith.andi %146, %148 : vector<16x128xi1>
    %cst_110 = arith.constant -1.000000e+30 : f32
    %150 = vector.broadcast %cst_110 : f32 to vector<16x128xf32>
    %151 = arith.select %139, %136, %150 : vector<16x128xi1>, vector<16x128xf32>
    %cst_111 = arith.constant dense<0xFF800000> : vector<16xf32>
    %152 = vector.multi_reduction <maximumf>, %151, %cst_111 [1] : vector<16x128xf32> to vector<16xf32>
    %153 = vector.shape_cast %152 : vector<16xf32> to vector<16x1xf32>
    %154 = vector.broadcast %153 : vector<16x1xf32> to vector<16x128xf32>
    %155 = arith.subf %151, %154 : vector<16x128xf32>
    %156 = math.exp %155 : vector<16x128xf32>
    %cst_112 = arith.constant dense<0.000000e+00> : vector<16xf32>
    %157 = vector.multi_reduction <add>, %156, %cst_112 [1] : vector<16x128xf32> to vector<16xf32>
    %158 = vector.shape_cast %157 : vector<16xf32> to vector<16x1xf32>
    %159 = tpu.reciprocal %158 {approx = true} : vector<16x1xf32> -> vector<16x1xf32>
    %160 = arith.mulf %158, %159 : vector<16x1xf32>
    %cst_113 = arith.constant 2.000000e+00 : f32
    %161 = vector.broadcast %cst_113 : f32 to vector<16x1xf32>
    %162 = arith.subf %161, %160 : vector<16x1xf32>
    %163 = arith.mulf %159, %162 : vector<16x1xf32>
    %164 = vector.broadcast %163 : vector<16x1xf32> to vector<16x128xf32>
    %165 = arith.mulf %156, %164 : vector<16x128xf32>
    %cst_114 = arith.constant 5.000000e-01 : f32
    %166 = vector.broadcast %cst_114 : f32 to vector<16x128xf32>
    %167 = arith.mulf %166, %136 : vector<16x128xf32>
    %168 = math.tanh %167 : vector<16x128xf32>
    %cst_115 = arith.constant 1.000000e+00 : f32
    %169 = vector.broadcast %cst_115 : f32 to vector<16x128xf32>
    %170 = arith.addf %168, %169 : vector<16x128xf32>
    %cst_116 = arith.constant 5.000000e-01 : f32
    %171 = vector.broadcast %cst_116 : f32 to vector<16x128xf32>
    %172 = arith.mulf %171, %170 : vector<16x128xf32>
    %cst_117 = arith.constant 9.99989986 : f32
    %173 = vector.broadcast %cst_117 : f32 to vector<16x128xf32>
    %174 = arith.mulf %173, %172 : vector<16x128xf32>
    %cst_118 = arith.constant 9.99999974E-5 : f32
    %175 = vector.broadcast %cst_118 : f32 to vector<16x128xf32>
    %176 = arith.addf %175, %174 : vector<16x128xf32>
    %cst_119 = arith.constant 0.000000e+00 : f32
    %177 = vector.broadcast %cst_119 : f32 to vector<16x128xf32>
    %178 = arith.select %144, %136, %177 : vector<16x128xi1>, vector<16x128xf32>
    %179 = arith.select %149, %176, %178 : vector<16x128xi1>, vector<16x128xf32>
    %180 = arith.select %139, %165, %179 : vector<16x128xi1>, vector<16x128xf32>
    %c0_120 = arith.constant 0 : index
    %c0_121 = arith.constant 0 : index
    %181 = vector.load %arg14[%c0_120, %c0_121] : memref<16x128xf32, #tpu.memory_space<vmem>>, vector<16x128xf32>
    tpu.vector_store %arg14[%c0_120, %c0_121], %180 {strides = array<i32>} : memref<16x128xf32, #tpu.memory_space<vmem>>, vector<16x128xf32>,
    return
  }
  func.func @transform_0(%arg0: i32) -> (i32, i32, i32) {
    %c0_i32 = arith.constant 0 : i32
    %c0_i32_0 = arith.constant 0 : i32
    %c0_i32_1 = arith.constant 0 : i32
    return %c0_i32, %arg0, %c0_i32_0 : i32, i32, i32
  }
  func.func @transform_1(%arg0: i32) -> (i32, i32) {
    %c0_i32 = arith.constant 0 : i32
    %c0_i32_0 = arith.constant 0 : i32
    %c0_i32_1 = arith.constant 0 : i32
    return %c0_i32, %c0_i32_0 : i32, i32
  }
  func.func @transform_2(%arg0: i32) -> (i32, i32) {
    %c0_i32 = arith.constant 0 : i32
    %c0_i32_0 = arith.constant 0 : i32
    %c0_i32_1 = arith.constant 0 : i32
    return %c0_i32, %c0_i32_0 : i32, i32
  }
  func.func @transform_3(%arg0: i32) -> (i32, i32) {
    %c0_i32 = arith.constant 0 : i32
    %c0_i32_0 = arith.constant 0 : i32
    %c0_i32_1 = arith.constant 0 : i32
    return %c0_i32, %c0_i32_0 : i32, i32
  }
  func.func @transform_4(%arg0: i32) -> (i32, i32) {
    %c0_i32 = arith.constant 0 : i32
    %c0_i32_0 = arith.constant 0 : i32
    %c0_i32_1 = arith.constant 0 : i32
    return %c0_i32, %c0_i32_0 : i32, i32
  }
  func.func @transform_5(%arg0: i32) -> (i32, i32) {
    %c0_i32 = arith.constant 0 : i32
    %c0_i32_0 = arith.constant 0 : i32
    %c0_i32_1 = arith.constant 0 : i32
    return %c0_i32, %c0_i32_0 : i32, i32
  }
  func.func @transform_6(%arg0: i32) -> (i32, i32) {
    %c0_i32 = arith.constant 0 : i32
    %c0_i32_0 = arith.constant 0 : i32
    %c0_i32_1 = arith.constant 0 : i32
    return %c0_i32, %c0_i32_0 : i32, i32
  }
  func.func @transform_7(%arg0: i32) -> (i32, i32) {
    %c0_i32 = arith.constant 0 : i32
    %c0_i32_0 = arith.constant 0 : i32
    %c0_i32_1 = arith.constant 0 : i32
    return %c0_i32, %c0_i32_0 : i32, i32
  }
  func.func @transform_8(%arg0: i32) -> (i32, i32) {
    %c0_i32 = arith.constant 0 : i32
    %c0_i32_0 = arith.constant 0 : i32
    %c0_i32_1 = arith.constant 0 : i32
    return %c0_i32, %c0_i32_0 : i32, i32
  }
  func.func @transform_9(%arg0: i32) -> (i32, i32) {
    %c0_i32 = arith.constant 0 : i32
    %c0_i32_0 = arith.constant 0 : i32
    %c0_i32_1 = arith.constant 0 : i32
    return %c0_i32, %c0_i32_0 : i32, i32
  }
  func.func @transform_10(%arg0: i32) -> (i32, i32) {
    %c0_i32 = arith.constant 0 : i32
    %c0_i32_0 = arith.constant 0 : i32
    %c0_i32_1 = arith.constant 0 : i32
    return %c0_i32, %c0_i32_0 : i32, i32
  }
  func.func @transform_11(%arg0: i32) -> (i32, i32) {
    %c0_i32 = arith.constant 0 : i32
    %c0_i32_0 = arith.constant 0 : i32
    %c0_i32_1 = arith.constant 0 : i32
    return %c0_i32, %c0_i32_0 : i32, i32
  }
  func.func @transform_12(%arg0: i32) -> (i32, i32) {
    %c0_i32 = arith.constant 0 : i32
    %c0_i32_0 = arith.constant 0 : i32
    %c0_i32_1 = arith.constant 0 : i32
    return %c0_i32, %c0_i32_0 : i32, i32
  }
  func.func @transform_13(%arg0: i32) -> (i32, i32) {
    %c0_i32 = arith.constant 0 : i32
    %c0_i32_0 = arith.constant 0 : i32
    return %arg0, %c0_i32 : i32, i32
  }
}

</mosaic_0001>

<bundles_post_ra>
// kernel: mln_forward.1
= control target key start
LH: loop header
LB: loop body
LE: loop exit
PB: predicated region body
PF: predicated region fallthrough
CT: control target
= control target key end

     0   :  { %18 = vsyncpa [#allocation7], 0  ;;  %s5081_s0 = inlined_call_operand.vmem [shape: bf16[16,16,16], index: 0, kind: input, shape index: {}]   ;;  %s5082_s1 = inlined_call_operand.hbm [shape: bf16[48,128], index: 1, kind: input, shape index: {}]   ;;  %s5083_s2 = inlined_call_operand.vmem [shape: f32[1,128], index: 2, kind: input, shape index: {}]   ;;  %s5084_s3 = inlined_call_operand.hbm [shape: bf16[384,256], index: 3, kind: input, shape index: {}]   ;;  %s5085_s4 = inlined_call_operand.vmem [shape: f32[1,256], index: 4, kind: input, shape index: {}]   ;;  %s5086_s5 = inlined_call_operand.vmem [shape: bf16[384,128], index: 5, kind: input, shape index: {}]   ;;  %s5087_s6 = inlined_call_operand.vmem [shape: f32[1,128], index: 6, kind: input, shape index: {}]   ;;  %s5088_s7 = inlined_call_operand.hbm [shape: bf16[384,256], index: 7, kind: input, shape index: {}]   ;;  %s5089_s8 = inlined_call_operand.vmem [shape: f32[1,256], index: 8, kind: input, shape index: {}]   ;;  %s5090_s9 = inlined_call_operand.hbm [shape: bf16[512,128], index: 9, kind: input, shape index: {}]   ;;  %s5091_s10 = inlined_call_operand.vmem [shape: f32[1,128], index: 10, kind: input, shape index: {}]   ;;  %s5092_s11 = inlined_call_operand.hbm [shape: bf16[128,128], index: 11, kind: input, shape index: {}]   ;;  %s5093_s12 = inlined_call_operand.vmem [shape: f32[1,128], index: 12, kind: input, shape index: {}]   ;;  %s5094_s13 = inlined_call_operand.vmem [shape: f32[16,128], index: 13, kind: output, shape index: {}]  }
   0x1   :  { %19 = vsyncpa [#allocation9], 0 }
   0x2   :  { %20 = vsyncpa [#allocation12], 0  ;;  %s4237_s25 = smov [#allocation8]   ;;  %s4121_s29 = scalar_lea.hbm %s5084_s3, 6144 }
   0x3   :  { %s42_s26 = sshll.u32 %s4237_s25, 4  ;;  %p4122_p0 = scmp.ne.s32.totalorder %s5084_s3, %s4121_s29  ;;  %s43_s26 = int_to_ptr.vmem [resolvable:$true] %s42_s26 }
   0x4   :  { %p4125_p1 = scmp.lt.u32.totalorder %s4121_s29, %s5084_s3 }
   0x6   :  { %p4127_p2 = pnand %p4125_p1, %p4122_p0 }
   0x8   :  { %4130 = shalt.err (!%p4127_p2)
}
   0x9   :  { %s4131_s17 = scalar_lea.vmem %s43_s26, 6144  ;;  %p4136_p4 = scmp.lt.s32.totalorder %s43_s26, %s43_s26 }
   0xa   :  { %p4132_p3 = scmp.ne.s32.totalorder %s43_s26, %s4131_s17  ;;  %p4137_p5 = scmp.lt.s32.totalorder %s4131_s17, %s4131_s17 }
   0xc   :  { %p4138_p6 = por %p4137_p5, %p4136_p4 }
   0xe   :  { %p4139_p7 = pnand %p4138_p6, %p4132_p3 }
  0x10   :  { %4142 = shalt.err (!%p4139_p7)
}
  0x11   :  { %s4238_s18 = smov 128   ;;  %s4239_s19 = smov 8  }
  0x12   :  { %48 = dma.hbm_to_vmem [thread:$0]  %s5084_s3, 6144, %s43_s26, [#allocation9], %s4238_s18, %s4238_s18, %s4239_s19  }
  0x13   :  { %s4240_s22 = smov [#allocation11]   ;;  %s4241_s24 = smov [#allocation6]  }
  0x14   :  { %s74_s23 = sshll.u32 %s4240_s22, 4  ;;  %s28_s25 = sshll.u32 %s4241_s24, 4  ;;  %s75_s23 = int_to_ptr.vmem [resolvable:$true] %s74_s23  ;;  %s29_s25 = int_to_ptr.vmem [resolvable:$true] %s28_s25 }
  0x15   :  { %s4143_s29 = scalar_lea.hbm %s5090_s9, 4096 }
  0x16   :  { %p4144_p8 = scmp.ne.s32.totalorder %s5090_s9, %s4143_s29  ;;  %p4147_p9 = scmp.lt.u32.totalorder %s4143_s29, %s5090_s9 }
  0x18   :  { %p4149_p10 = pnand %p4147_p9, %p4144_p8 }
  0x1a   :  { %4152 = shalt.err (!%p4149_p10)
}
  0x1b   :  { %s4153_s3 = scalar_lea.vmem %s75_s23, 4096  ;;  %p4158_p12 = scmp.lt.s32.totalorder %s75_s23, %s75_s23 }
  0x1c   :  { %p4154_p11 = scmp.ne.s32.totalorder %s75_s23, %s4153_s3  ;;  %p4159_p13 = scmp.lt.s32.totalorder %s4153_s3, %s4153_s3 }
  0x1e   :  { %p4160_p0 = por %p4159_p13, %p4158_p12 }
  0x20   :  { %p4161_p1 = pnand %p4160_p0, %p4154_p11 }
  0x22   :  { %4164 = shalt.err (!%p4161_p1)
}
  0x23   :  { %s4242_s26 = smov 64   ;;  %s4243_s17 = smov 4  }
  0x24   :  { %80 = dma.hbm_to_vmem [thread:$0]  %s5090_s9, 4096, %s75_s23, [#allocation12], %s4242_s26, %s4242_s26, %s4243_s17  }
  0x25   :  { %s4165_s27 = scalar_lea.hbm %s5082_s1, 384 }
  0x26   :  { %p4166_p2 = scmp.ne.s32.totalorder %s5082_s1, %s4165_s27  ;;  %p4169_p3 = scmp.lt.u32.totalorder %s4165_s27, %s5082_s1 }
  0x28   :  { %p4171_p4 = pnand %p4169_p3, %p4166_p2 }
  0x2a   :  { %4174 = shalt.err (!%p4171_p4)
}
  0x2b   :  { %s4175_s15 = scalar_lea.vmem %s29_s25, 384  ;;  %p4180_p6 = scmp.lt.s32.totalorder %s29_s25, %s29_s25 }
  0x2c   :  { %p4176_p5 = scmp.ne.s32.totalorder %s29_s25, %s4175_s15  ;;  %p4181_p7 = scmp.lt.s32.totalorder %s4175_s15, %s4175_s15 }
  0x2e   :  { %p4182_p8 = por %p4181_p7, %p4180_p6 }
  0x30   :  { %p4183_p9 = pnand %p4182_p8, %p4176_p5 }
  0x32   :  { %4186 = shalt.err (!%p4183_p9)
}
  0x33   :  { %34 = dma.hbm_to_vmem [thread:$0]  %s5082_s1, 384, %s29_s25, [#allocation7], %s4242_s26, %s4242_s26, %s4243_s17  }
  0x34   :  { %s4244_s16 = smov [#allocation10]   ;;  %s4245_s20 = smov [#allocation13]  }
  0x35   :  { %s60_s3 = sshll.u32 %s4244_s16, 4  ;;  %s88_s21 = sshll.u32 %s4245_s20, 4  ;;  %s61_s3 = int_to_ptr.vmem [resolvable:$true] %s60_s3  ;;  %s89_s21 = int_to_ptr.vmem [resolvable:$true] %s88_s21 }
  0x36   :  { %s4187_s27 = scalar_lea.hbm %s5088_s7, 6144 }
  0x37   :  { %p4188_p10 = scmp.ne.s32.totalorder %s5088_s7, %s4187_s27  ;;  %p4191_p11 = scmp.lt.u32.totalorder %s4187_s27, %s5088_s7 }
  0x39   :  { %p4193_p12 = pnand %p4191_p11, %p4188_p10 }
  0x3b   :  { %4196 = shalt.err (!%p4193_p12)
}
  0x3c   :  { %s4197_s1 = scalar_lea.vmem %s61_s3, 6144  ;;  %p4202_p0 = scmp.lt.s32.totalorder %s61_s3, %s61_s3 }
  0x3d   :  { %p4198_p13 = scmp.ne.s32.totalorder %s61_s3, %s4197_s1  ;;  %p4203_p1 = scmp.lt.s32.totalorder %s4197_s1, %s4197_s1 }
  0x3f   :  { %p4204_p2 = por %p4203_p1, %p4202_p0 }
  0x41   :  { %p4205_p3 = pnand %p4204_p2, %p4198_p13 }
  0x43   :  { %4208 = shalt.err (!%p4205_p3)
}
  0x44   :  { %66 = dma.hbm_to_vmem [thread:$0]  %s5088_s7, 6144, %s61_s3, [#allocation9], %s4238_s18, %s4238_s18, %s4239_s19  }
  0x45   :  { %s4209_s16 = scalar_lea.hbm %s5092_s11, 1024 }
  0x46   :  { %p4210_p4 = scmp.ne.s32.totalorder %s5092_s11, %s4209_s16  ;;  %p4213_p5 = scmp.lt.u32.totalorder %s4209_s16, %s5092_s11 }
  0x48   :  { %p4215_p6 = pnand %p4213_p5, %p4210_p4 }
  0x4a   :  { %4218 = shalt.err (!%p4215_p6)
}
  0x4b   :  { %s4219_s28 = scalar_lea.vmem %s89_s21, 1024  ;;  %p4224_p8 = scmp.lt.s32.totalorder %s89_s21, %s89_s21 }
  0x4c   :  { %p4220_p7 = scmp.ne.s32.totalorder %s89_s21, %s4219_s28  ;;  %p4225_p9 = scmp.lt.s32.totalorder %s4219_s28, %s4219_s28 }
  0x4e   :  { %p4226_p10 = por %p4225_p9, %p4224_p8 }
  0x50   :  { %p4227_p11 = pnand %p4226_p10, %p4220_p7 }
  0x52   :  { %4230 = shalt.err (!%p4227_p11)
}
  0x53   :  { %94 = dma.hbm_to_vmem [thread:$0]  %s5092_s11, 1024, %s89_s21, [#allocation12], %s4242_s26, %s4242_s26, %s4243_s17  }
  0x54   :  { %4231 = dma.done.wait [#allocation7], 384  }
  0x55   :  { %4232 = vsyncadd [#allocation7], 4294966912 }
  0x56   :  { %4233 = dma.done.wait [#allocation9], 12288  }
  0x57   :  { %4234 = vsyncadd [#allocation9], 4294955008 }
  0x58   :  { %4235 = dma.done.wait [#allocation12], 5120  }
  0x59   :  { %4236 = vsyncadd [#allocation12], 4294962176  ;;  %vm113_vm0 = vcmask 130048   ;;  %v4246_v0 = vmov 0   ;;  %v3882_v1 = vld [vmem:[%s5081_s0] sm:$0xff]   ;;  %v3883_v2 = vld [vmem:[%s5081_s0 + $0x8] sm:$0xff]  }
  0x5a   :  { %116 = vst.msk [vmem:[#allocation2 + $0x88] sm:$0xff] %vm113_vm0, %v4246_v0  ;;  %114 = vst.msk [vmem:[#allocation2] sm:$0xff] %vm113_vm0, %v4246_v0  ;;  %v3884_v3 = vld [vmem:[%s5081_s0 + $0x10] sm:$0xff]   ;;  %v3885_v4 = vld [vmem:[%s5081_s0 + $0x18] sm:$0xff]   ;;  %s4247_s27 = smov 16   ;;  %s4248_s18 = smov 32  }
  0x5b   :  { %255 = vst.msk [vmem:[#allocation2 + $0x8] sm:$0xff] %vm113_vm0, %v3882_v1  ;;  %256 = vst.msk [vmem:[#allocation2 + $0x10] sm:$0xff] %vm113_vm0, %v3883_v2  ;;  %v3886_v5 = vld [vmem:[%s5081_s0 + $0x20] sm:$0xff]   ;;  %v3887_v6 = vld [vmem:[%s5081_s0 + $0x28] sm:$0xff]   ;;  %vm464_vm1 = vcmask 261120   ;;  %vm528_vm2 = vcmask 392192  }
  0x5c   :  { %257 = vst.msk [vmem:[#allocation2 + $0x18] sm:$0xff] %vm113_vm0, %v3884_v3  ;;  %258 = vst.msk [vmem:[#allocation2 + $0x20] sm:$0xff] %vm113_vm0, %v3885_v4  ;;  %v3888_v7 = vld [vmem:[%s5081_s0 + $0x30] sm:$0xff]   ;;  %v3889_v8 = vld [vmem:[%s5081_s0 + $0x38] sm:$0xff]   ;;  %vm4250_vm3 = vmmov 0  }
  0x5d   :  { %259 = vst.msk [vmem:[#allocation2 + $0x28] sm:$0xff] %vm113_vm0, %v3886_v5  ;;  %260 = vst.msk [vmem:[#allocation2 + $0x30] sm:$0xff] %vm113_vm0, %v3887_v6  ;;  %v3890_v9 = vld [vmem:[%s5081_s0 + $0x40] sm:$0xff]   ;;  %v3891_v12 = vld [vmem:[%s5081_s0 + $0x48] sm:$0xff]  }
  0x5e   :  { %261 = vst.msk [vmem:[#allocation2 + $0x38] sm:$0xff] %vm113_vm0, %v3888_v7  ;;  %262 = vst.msk [vmem:[#allocation2 + $0x40] sm:$0xff] %vm113_vm0, %v3889_v8  ;;  %v3892_v13 = vld [vmem:[%s5081_s0 + $0x50] sm:$0xff]   ;;  %v3893_v15 = vld [vmem:[%s5081_s0 + $0x58] sm:$0xff]  }
  0x5f   :  { %263 = vst.msk [vmem:[#allocation2 + $0x48] sm:$0xff] %vm113_vm0, %v3890_v9  ;;  %264 = vst.msk [vmem:[#allocation2 + $0x50] sm:$0xff] %vm113_vm0, %v3891_v12  ;;  %v3894_v16 = vld [vmem:[%s5081_s0 + $0x60] sm:$0xff]   ;;  %v3895_v18 = vld [vmem:[%s5081_s0 + $0x68] sm:$0xff]  }
  0x60   :  { %265 = vst.msk [vmem:[#allocation2 + $0x58] sm:$0xff] %vm113_vm0, %v3892_v13  ;;  %266 = vst.msk [vmem:[#allocation2 + $0x60] sm:$0xff] %vm113_vm0, %v3893_v15  ;;  %v3896_v19 = vld [vmem:[%s5081_s0 + $0x70] sm:$0xff]   ;;  %v3897_v20 = vld [vmem:[%s5081_s0 + $0x78] sm:$0xff]  }
  0x61   :  { %267 = vst.msk [vmem:[#allocation2 + $0x68] sm:$0xff] %vm113_vm0, %v3894_v16  ;;  %268 = vst.msk [vmem:[#allocation2 + $0x70] sm:$0xff] %vm113_vm0, %v3895_v18  ;;  %v3898_v22 = vld [vmem:[#allocation6] sm:$0xff]   ;;  %v3899_v23 = vld [vmem:[#allocation6 + $0x8] sm:$0xff]  }
  0x62   :  { %v4434_v10 = vld [vmem:[#allocation2 + $0x8] sm:$0xff]  ;;  %v4439_v11 = vld [vmem:[#allocation2 + $0x10] sm:$0xff]  ;;  %269 = vst.msk [vmem:[#allocation2 + $0x78] sm:$0xff] %vm113_vm0, %v3896_v19  ;;  %270 = vst.msk [vmem:[#allocation2 + $0x80] sm:$0xff] %vm113_vm0, %v3897_v20  ;;  %3586 = vmatprep.subr.bf16.mxu0 %v3898_v22 }
  0x63   :  { %336 = vrot.lane.b32.xlu0 %v4434_v10, %s4247_s27  ;;  %384 = vrot.lane.b32.xlu1 %v4439_v11, %s4248_s18  ;;  %v4450_v14 = vld [vmem:[#allocation2 + $0x18] sm:$0xff]  ;;  %v4465_v17 = vld [vmem:[#allocation2 + $0x20] sm:$0xff]  ;;  %v3901_v34 = vld [vmem:[#allocation8 + $0x4] ss:$8 sps:$4 sm:$0xff]  }
  0x64   :  { %v4483_v21 = vld [vmem:[#allocation2 + $0x28] sm:$0xff]  ;;  %v4490_v24 = vld [vmem:[#allocation2 + $0x30] sm:$0xff]  ;;  %3587 = vmatpush3.bf16.msra.mxu0 %v3898_v22  ;;  %v3900_v25 = vld [vmem:[#allocation6 + $0x10] sm:$0xff]   ;;  %1136 = vmatprep.subr.bf16.mxu1 %v3901_v34 }
  0x65   :  { %3588 = vmatprep.subr.bf16.mxu0 %v3899_v23  ;;  %v4496_v26 = vld [vmem:[#allocation2 + $0x38] sm:$0xff]  ;;  %v4500_v27 = vld [vmem:[#allocation2 + $0x40] sm:$0xff]  ;;  %v3903_v35 = vld [vmem:[#allocation8] ss:$8 sps:$4 sm:$0xff]  }
  0x66   :  { %v4506_v28 = vld [vmem:[#allocation2 + $0x48] sm:$0xff]  ;;  %v4512_v29 = vld [vmem:[#allocation2 + $0x50] sm:$0xff]  ;;  %v3904_v36 = vld [vmem:[#allocation8 + $0x14] ss:$8 sps:$4 sm:$0xff]   ;;  %1137 = vmatpush1.bf16.msra.mxu1 %v3903_v35 }
  0x67   :  { %338 = vrot.lane.b32.xlu0 %v4439_v11, %s4247_s27  ;;  %386 = vrot.lane.b32.xlu1 %v4450_v14, %s4248_s18  ;;  %v4518_v30 = vld [vmem:[#allocation2 + $0x58] sm:$0xff]  ;;  %v4524_v31 = vld [vmem:[#allocation2 + $0x60] sm:$0xff]  ;;  %v3907_v39 = vld [vmem:[#allocation8 + $0x24] ss:$8 sps:$4 sm:$0xff]  }
  0x68   :  { %3589 = vmatpush3.bf16.msra.mxu0 %v3899_v23  ;;  %v4530_v32 = vld [vmem:[#allocation2 + $0x68] sm:$0xff]  ;;  %v4536_v33 = vld [vmem:[#allocation2 + $0x70] sm:$0xff]  ;;  %v3906_v38 = vld [vmem:[#allocation8 + $0x10] ss:$8 sps:$4 sm:$0xff]   ;;  %1138 = vmatprep.subr.bf16.mxu1 %v3904_v36 }
  0x69   :  { %3590 = vmatprep.subr.bf16.mxu0 %v3900_v25  ;;  %v4544_v37 = vld [vmem:[#allocation2 + $0x78] sm:$0xff]  ;;  %v302_v40 = vld [vmem:[#allocation2 + $0x80] sm:$0xff]  ;;  %v3909_v41 = vld [vmem:[#allocation8 + $0x20] ss:$8 sps:$4 sm:$0xff]  }
  0x6a   :  { %1139 = vmatpush1.bf16.msra.mxu1 %v3906_v38  ;;  %v319_v42 = vld [vmem:[#allocation2 + $0x88] sm:$0xff]  ;;  %v3910_v43 = vld [vmem:[#allocation8 + $0x34] ss:$8 sps:$4 sm:$0xff]   ;;  %v3912_v44 = vld [vmem:[#allocation8 + $0x30] ss:$8 sps:$4 sm:$0xff]  }
  0x6b   :  { %340 = vrot.lane.b32.xlu0 %v4450_v14, %s4247_s27  ;;  %342 = vrot.lane.b32.xlu1 %v4465_v17, %s4247_s27  ;;  %v3913_v45 = vld [vmem:[#allocation8 + $0x44] ss:$8 sps:$4 sm:$0xff]   ;;  %v3915_v46 = vld [vmem:[#allocation8 + $0x40] ss:$8 sps:$4 sm:$0xff]   ;;  %v3916_v47 = vld [vmem:[#allocation8 + $0x54] ss:$8 sps:$4 sm:$0xff]  }
  0x6c   :  { %3591 = vmatpush3.bf16.msra.mxu0 %v3900_v25  ;;  %1140 = vmatprep.subr.bf16.mxu1 %v3907_v39  ;;  %v3918_v48 = vld [vmem:[#allocation8 + $0x50] ss:$8 sps:$4 sm:$0xff]   ;;  %v3919_v49 = vld [vmem:[#allocation8 + $0x64] ss:$8 sps:$4 sm:$0xff]   ;;  %v3921_v50 = vld [vmem:[#allocation8 + $0x60] ss:$8 sps:$4 sm:$0xff]  }
  0x6d   :  { %v3922_v51 = vld [vmem:[#allocation8 + $0x74] ss:$8 sps:$4 sm:$0xff]   ;;  %v3924_v52 = vld [vmem:[#allocation8 + $0x70] ss:$8 sps:$4 sm:$0xff]   ;;  %v3925_v53 = vld [vmem:[#allocation8 + $0x84] ss:$8 sps:$4 sm:$0xff]  }
  0x6e   :  { %1141 = vmatpush1.bf16.msra.mxu1 %v3909_v41  ;;  %v3927_v54 = vld [vmem:[#allocation8 + $0x80] ss:$8 sps:$4 sm:$0xff]   ;;  %v3928_v55 = vld [vmem:[#allocation8 + $0x94] ss:$8 sps:$4 sm:$0xff]   ;;  %v3930_v56 = vld [vmem:[#allocation8 + $0x90] ss:$8 sps:$4 sm:$0xff]  }
  0x6f   :  { %388 = vrot.lane.b32.xlu0 %v4465_v17, %s4248_s18  ;;  %390 = vrot.lane.b32.xlu1 %v4483_v21, %s4248_s18  ;;  %v3931_v57 = vld [vmem:[#allocation8 + $0xa4] ss:$8 sps:$4 sm:$0xff]   ;;  %v3933_v58 = vld [vmem:[#allocation8 + $0xa0] ss:$8 sps:$4 sm:$0xff]   ;;  %v3934_v59 = vld [vmem:[#allocation8 + $0xb4] ss:$8 sps:$4 sm:$0xff]  }
  0x70   :  { %1142 = vmatprep.subr.bf16.mxu1 %v3910_v43  ;;  %v3936_v60 = vld [vmem:[#allocation8 + $0xb0] ss:$8 sps:$4 sm:$0xff]   ;;  %v3937_v61 = vld [vmem:[#allocation8 + $0xc4] ss:$8 sps:$4 sm:$0xff]   ;;  %v3939_v62 = vld [vmem:[#allocation8 + $0xc0] ss:$8 sps:$4 sm:$0xff]  }
  0x71   :  { %v3940_v63 = vld [vmem:[#allocation8 + $0xd4] ss:$8 sps:$4 sm:$0xff]   ;;  %v3942_v1 = vld [vmem:[#allocation8 + $0xd0] ss:$8 sps:$4 sm:$0xff]  }
  0x72   :  { %1143 = vmatpush1.bf16.msra.mxu1 %v3912_v44  ;;  %v271_v2 = vld [vmem:[#allocation2] sm:$0xff] }
  0x73   :  { %344 = vrot.lane.b32.xlu0 %v4483_v21, %s4247_s27  ;;  %346 = vrot.lane.b32.xlu1 %v4490_v24, %s4247_s27 }
  0x74   :  { %1144 = vmatprep.subr.bf16.mxu1 %v3913_v45 }
  0x76   :  { %1145 = vmatpush1.bf16.msra.mxu1 %v3915_v46 }
  0x77   :  { %392 = vrot.lane.b32.xlu0 %v4490_v24, %s4248_s18  ;;  %394 = vrot.lane.b32.xlu1 %v4496_v26, %s4248_s18 }
  0x78   :  { %1146 = vmatprep.subr.bf16.mxu1 %v3916_v47 }
  0x7a   :  { %1147 = vmatpush1.bf16.msra.mxu1 %v3918_v48 }
  0x7b   :  { %348 = vrot.lane.b32.xlu0 %v4496_v26, %s4247_s27  ;;  %350 = vrot.lane.b32.xlu1 %v4500_v27, %s4247_s27 }
  0x7c   :  { %1148 = vmatprep.subr.bf16.mxu1 %v3919_v49 }
  0x7e   :  { %1149 = vmatpush1.bf16.msra.mxu1 %v3921_v50 }
  0x7f   :  { %396 = vrot.lane.b32.xlu0 %v4500_v27, %s4248_s18  ;;  %398 = vrot.lane.b32.xlu1 %v4506_v28, %s4248_s18 }
  0x80   :  { %1150 = vmatprep.subr.bf16.mxu1 %v3922_v51 }
  0x82   :  { %1151 = vmatpush1.bf16.msra.mxu1 %v3924_v52 }
  0x83   :  { %352 = vrot.lane.b32.xlu0 %v4506_v28, %s4247_s27  ;;  %354 = vrot.lane.b32.xlu1 %v4512_v29, %s4247_s27 }
  0x84   :  { %1152 = vmatprep.subr.bf16.mxu1 %v3925_v53 }
  0x86   :  { %1153 = vmatpush1.bf16.msra.mxu1 %v3927_v54 }
  0x87   :  { %400 = vrot.lane.b32.xlu0 %v4512_v29, %s4248_s18  ;;  %402 = vrot.lane.b32.xlu1 %v4518_v30, %s4248_s18 }
  0x88   :  { %1154 = vmatprep.subr.bf16.mxu1 %v3928_v55 }
  0x8a   :  { %1155 = vmatpush1.bf16.msra.mxu1 %v3930_v56 }
  0x8b   :  { %356 = vrot.lane.b32.xlu0 %v4518_v30, %s4247_s27  ;;  %358 = vrot.lane.b32.xlu1 %v4524_v31, %s4247_s27 }
  0x8c   :  { %1156 = vmatprep.subr.bf16.mxu1 %v3931_v57 }
  0x8e   :  { %1157 = vmatpush1.bf16.msra.mxu1 %v3933_v58 }
  0x8f   :  { %404 = vrot.lane.b32.xlu0 %v4524_v31, %s4248_s18  ;;  %406 = vrot.lane.b32.xlu1 %v4530_v32, %s4248_s18 }
  0x90   :  { %1158 = vmatprep.subr.bf16.mxu1 %v3934_v59 }
  0x92   :  { %1159 = vmatpush1.bf16.msra.mxu1 %v3936_v60 }
  0x93   :  { %360 = vrot.lane.b32.xlu0 %v4530_v32, %s4247_s27  ;;  %362 = vrot.lane.b32.xlu1 %v4536_v33, %s4247_s27 }
  0x94   :  { %1160 = vmatprep.subr.bf16.mxu1 %v3937_v61 }
  0x96   :  { %1161 = vmatpush1.bf16.msra.mxu1 %v3939_v62 }
  0x97   :  { %408 = vrot.lane.b32.xlu0 %v4536_v33, %s4248_s18  ;;  %410 = vrot.lane.b32.xlu1 %v4544_v37, %s4248_s18 }
  0x98   :  { %1162 = vmatprep.subr.bf16.mxu1 %v3940_v63 }
  0x9a   :  { %1163 = vmatpush1.bf16.msra.mxu1 %v3942_v1 }
  0x9b   :  { %364 = vrot.lane.b32.xlu0 %v4544_v37, %s4247_s27  ;;  %366 = vrot.lane.b32.xlu1 %v302_v40, %s4247_s27 }
  0x9f   :  { %412 = vrot.lane.b32.xlu0 %v302_v40, %s4248_s18  ;;  %414 = vrot.lane.b32.xlu1 %v319_v42, %s4248_s18 }
  0xd5   :  { %v337_v3 = vpop.permute.xlu0 %336  ;;  %v385_v5 = vpop.permute.xlu1 %384 }
  0xd6   :  { %v418_v4 = vsel %vm113_vm0, %v271_v2, %v337_v3 }
  0xd7   :  { %v466_v6 = vsel %vm464_vm1, %v418_v4, %v385_v5 }
  0xd8   :  { %3592 = vmatprep.mubr.msk.bf16.mxu0 %vm528_vm2, %v466_v6  ;;  %v3943_v6 = vld [vmem:[#allocation8 + $0xe4] ss:$8 sps:$4 sm:$0xff]  }
  0xd9   :  { %v339_v7 = vpop.permute.xlu0 %338  ;;  %v387_v9 = vpop.permute.xlu1 %386  ;;  %1164 = vmatprep.subr.bf16.mxu1 %v3943_v6 }
  0xda   :  { %v421_v8 = vsel %vm113_vm0, %v4434_v10, %v339_v7  ;;  %v3945_v7 = vld [vmem:[#allocation8 + $0xe0] ss:$8 sps:$4 sm:$0xff]  }
  0xdb   :  { %v468_v12 = vsel %vm464_vm1, %v421_v8, %v387_v9  ;;  %1165 = vmatpush1.bf16.msra.mxu1 %v3945_v7  ;;  %v3946_v8 = vld [vmem:[#allocation8 + $0xf4] ss:$8 sps:$4 sm:$0xff]   ;;  %v3948_v9 = vld [vmem:[#allocation8 + $0xf0] ss:$8 sps:$4 sm:$0xff]  }
  0xdc   :  { %3593 = vmatmul.mubr.msk.bf16.vlgmr.msra.gmra.mrb[0].mxu0 %vm528_vm2, %v468_v12  ;;  %1166 = vmatprep.subr.bf16.mxu1 %v3946_v8 }
  0xdd   :  { %v341_v13 = vpop.permute.xlu0 %340  ;;  %v343_v15 = vpop.permute.xlu1 %342 }
  0xde   :  { %v424_v16 = vsel %vm113_vm0, %v4439_v11, %v341_v13  ;;  %v427_v18 = vsel %vm113_vm0, %v4450_v14, %v343_v15 }
  0xdf   :  { %1167 = vmatpush1.bf16.msra.mxu1 %v3948_v9 }
  0xe1   :  { %v389_v19 = vpop.permute.xlu0 %388  ;;  %v391_v22 = vpop.permute.xlu1 %390 }
  0xe2   :  { %v470_v20 = vsel %vm464_vm1, %v424_v16, %v389_v19  ;;  %v472_v23 = vsel %vm464_vm1, %v427_v18, %v391_v22 }
  0xe3   :  { %3596 = vmatprep.mubr.msk.bf16.mxu0 %vm528_vm2, %v470_v20 }
  0xe4   :  { %3597 = vmatmul.mubr.msk.bf16.gmra.mrb[4].mxu0 %vm528_vm2, %v472_v23 }
  0xe5   :  { %v345_v10 = vpop.permute.xlu0 %344  ;;  %v347_v25 = vpop.permute.xlu1 %346 }
  0xe6   :  { %v430_v34 = vsel %vm113_vm0, %v4465_v17, %v345_v10  ;;  %v433_v11 = vsel %vm113_vm0, %v4483_v21, %v347_v25 }
  0xe9   :  { %v393_v35 = vpop.permute.xlu0 %392  ;;  %v395_v36 = vpop.permute.xlu1 %394 }
  0xea   :  { %v474_v14 = vsel %vm464_vm1, %v430_v34, %v393_v35  ;;  %v476_v38 = vsel %vm464_vm1, %v433_v11, %v395_v36  ;;  %v3949_v36 = vld [vmem:[#allocation8 + $0x100] ss:$8 sps:$4 sm:$0xff]  }
  0xeb   :  { %3600 = vmatprep.mubr.msk.bf16.mxu0 %vm528_vm2, %v474_v14 }
  0xec   :  { %3601 = vmatmul.mubr.msk.bf16.gmra.mrb[8].mxu0 %vm528_vm2, %v476_v38 }
  0xed   :  { %v349_v39 = vpop.permute.xlu0 %348  ;;  %v351_v40 = vpop.permute.xlu1 %350 }
  0xee   :  { %v436_v41 = vsel %vm113_vm0, %v4490_v24, %v349_v39  ;;  %v439_v17 = vsel %vm113_vm0, %v4496_v26, %v351_v40  ;;  %v3954_v40 = vld [vmem:[#allocation8 + $0x114] ss:$8 sps:$4 sm:$0xff]  }
  0xf1   :  { %v397_v42 = vpop.permute.xlu0 %396  ;;  %v399_v43 = vpop.permute.xlu1 %398 }
  0xf2   :  { %v478_v21 = vsel %vm464_vm1, %v436_v41, %v397_v42  ;;  %v480_v44 = vsel %vm464_vm1, %v439_v17, %v399_v43 }
  0xf3   :  { %3604 = vmatprep.mubr.msk.bf16.mxu0 %vm528_vm2, %v478_v21 }
  0xf4   :  { %3605 = vmatmul.mubr.msk.bf16.gmra.mrb[12].mxu0 %vm528_vm2, %v480_v44 }
  0xf5   :  { %v353_v45 = vpop.permute.xlu0 %352  ;;  %v355_v46 = vpop.permute.xlu1 %354 }
  0xf6   :  { %v442_v47 = vsel %vm113_vm0, %v4500_v27, %v353_v45  ;;  %v445_v24 = vsel %vm113_vm0, %v4506_v28, %v355_v46  ;;  %v3952_v46 = vld [vmem:[#allocation8 + $0x110] ss:$8 sps:$4 sm:$0xff]  }
  0xf9   :  { %v401_v48 = vpop.permute.xlu0 %400  ;;  %v403_v49 = vpop.permute.xlu1 %402 }
  0xfa   :  { %v482_v26 = vsel %vm464_vm1, %v442_v47, %v401_v48  ;;  %v484_v50 = vsel %vm464_vm1, %v445_v24, %v403_v49  ;;  %v3957_v24 = vld [vmem:[#allocation8 + $0x124] ss:$8 sps:$4 sm:$0xff]  }
  0xfb   :  { %3608 = vmatprep.mubr.msk.bf16.mxu0 %vm528_vm2, %v482_v26 }
  0xfc   :  { %3609 = vmatmul.mubr.msk.bf16.gmra.mrb[16].mxu0 %vm528_vm2, %v484_v50 }
  0xfd   :  { %v357_v51 = vpop.permute.xlu0 %356  ;;  %v359_v52 = vpop.permute.xlu1 %358 }
  0xfe   :  { %v448_v53 = vsel %vm113_vm0, %v4512_v29, %v357_v51  ;;  %v451_v27 = vsel %vm113_vm0, %v4518_v30, %v359_v52  ;;  %v3955_v51 = vld [vmem:[#allocation8 + $0x120] ss:$8 sps:$4 sm:$0xff]  }
 0x101   :  { %v405_v54 = vpop.permute.xlu0 %404  ;;  %v407_v55 = vpop.permute.xlu1 %406 }
 0x102   :  { %v486_v28 = vsel %vm464_vm1, %v448_v53, %v405_v54  ;;  %v488_v56 = vsel %vm464_vm1, %v451_v27, %v407_v55  ;;  %v3960_v27 = vld [vmem:[#allocation8 + $0x134] ss:$8 sps:$4 sm:$0xff]  }
 0x103   :  { %3612 = vmatprep.mubr.msk.bf16.mxu0 %vm528_vm2, %v486_v28 }
 0x104   :  { %3613 = vmatmul.mubr.msk.bf16.gmra.mrb[20].mxu0 %vm528_vm2, %v488_v56 }
 0x105   :  { %v361_v57 = vpop.permute.xlu0 %360  ;;  %v363_v58 = vpop.permute.xlu1 %362 }
 0x106   :  { %v454_v59 = vsel %vm113_vm0, %v4524_v31, %v361_v57  ;;  %v457_v29 = vsel %vm113_vm0, %v4530_v32, %v363_v58 }
 0x109   :  { %v409_v60 = vpop.permute.xlu0 %408  ;;  %v411_v61 = vpop.permute.xlu1 %410 }
 0x10a   :  { %v490_v30 = vsel %vm464_vm1, %v454_v59, %v409_v60  ;;  %v492_v62 = vsel %vm464_vm1, %v457_v29, %v411_v61  ;;  %v3958_v29 = vld [vmem:[#allocation8 + $0x130] ss:$8 sps:$4 sm:$0xff]  }
 0x10b   :  { %3616 = vmatprep.mubr.msk.bf16.mxu0 %vm528_vm2, %v490_v30  ;;  %v3963_v30 = vld [vmem:[#allocation8 + $0x144] ss:$8 sps:$4 sm:$0xff]  }
 0x10c   :  { %3617 = vmatmul.mubr.msk.bf16.gmra.mrb[24].mxu0 %vm528_vm2, %v492_v62 }
 0x10d   :  { %v365_v63 = vpop.permute.xlu0 %364  ;;  %v367_v1 = vpop.permute.xlu1 %366 }
 0x10e   :  { %v460_v2 = vsel %vm113_vm0, %v4536_v33, %v365_v63  ;;  %v463_v31 = vsel %vm113_vm0, %v4544_v37, %v367_v1  ;;  %v3951_v33 = vld [vmem:[#allocation8 + $0x104] ss:$8 sps:$4 sm:$0xff]   ;;  %v4621_v37 = vld [vmem:[%s5083_s2] ss:$0 sm:$0xff] }
 0x10f   :  { %1329 = vmatprep.subr.bf16.mxu1 %v3951_v33 }
 0x111   :  { %v413_v3 = vpop.permute.xlu0 %412  ;;  %v415_v4 = vpop.permute.xlu1 %414 }
 0x112   :  { %v494_v32 = vsel %vm464_vm1, %v460_v2, %v413_v3  ;;  %v496_v5 = vsel %vm464_vm1, %v463_v31, %v415_v4  ;;  %v3961_v2 = vld [vmem:[#allocation8 + $0x140] ss:$8 sps:$4 sm:$0xff]  }
 0x113   :  { %3620 = vmatprep.mubr.msk.bf16.mxu0 %vm528_vm2, %v494_v32  ;;  %v3966_v32 = vld [vmem:[#allocation8 + $0x154] ss:$8 sps:$4 sm:$0xff]  }
 0x114   :  { %3621 = vmatmul.mubr.msk.bf16.gmra.mrb[28].mxu0 %vm528_vm2, %v496_v5 }
 0x1af   :  { %v3594_v12 = vpop.f32.mrb[0].mxu0 }
 0x1b0   :  { %v604_v13 = vadd.f32 %v3594_v12, %v4621_v37  ;;  %v595_v15 = vpop.f32.mrb[1].mxu0  ;;  %v3964_v12 = vld [vmem:[#allocation8 + $0x150] ss:$8 sps:$4 sm:$0xff]  }
 0x1b1   :  { %v596_v16 = vadd.f32 %v4621_v37, %v595_v15  ;;  %v3595_v18 = vpop.f32.mrb[2].mxu0  ;;  %v3969_v15 = vld [vmem:[#allocation8 + $0x164] ss:$8 sps:$4 sm:$0xff]  }
 0x1b2   :  { %v607_v19 = vadd.f32 %v3595_v18, %v4621_v37  ;;  %v598_v20 = vpop.f32.mrb[3].mxu0  ;;  %v724_v23 = vmax.f32 %v604_v13, 0.0 }
 0x1b3   :  { %v599_v22 = vadd.f32 %v4621_v37, %v598_v20  ;;  %v722_v25 = vmax.f32 %v596_v16, 0.0 }
 0x1b4   :  { %v725_v10 = vmax.f32 %v607_v19, 0.0 }
 0x1b5   :  { %v723_v34 = vmax.f32 %v599_v22, 0.0  ;;  %v3967_v22 = vld [vmem:[#allocation8 + $0x160] ss:$8 sps:$4 sm:$0xff]  }
 0x1b6   :  { %v4627_v11 = vpack.c.bf16 %v725_v10, %v724_v23 }
 0x1b7   :  { %v3598_v35 = vpop.f32.mrb[4].mxu0  ;;  %v754_v14 = vpack.c.bf16 %v723_v34, %v722_v25  ;;  %v3972_v25 = vld [vmem:[#allocation8 + $0x174] ss:$8 sps:$4 sm:$0xff]  }
 0x1b8   :  { %v620_v38 = vadd.f32 %v3598_v35, %v4621_v37  ;;  %v611_v39 = vpop.f32.mrb[5].mxu0 }
 0x1b9   :  { %1168 = vmatprep.mubr.bf16.mxu1 %v754_v14  ;;  %v612_v41 = vadd.f32 %v4621_v37, %v611_v39  ;;  %v3599_v17 = vpop.f32.mrb[6].mxu0 }
 0x1ba   :  { %v728_v42 = vmax.f32 %v620_v38, 0.0  ;;  %1169 = vmatmul.mubr.bf16.vlgmr.msra.gmra.mrb[0].mxu1 %v4246_v0  ;;  %v623_v21 = vadd.f32 %v3599_v17, %v4621_v37  ;;  %v614_v43 = vpop.f32.mrb[7].mxu0 }
 0x1bb   :  { %v726_v44 = vmax.f32 %v612_v41, 0.0  ;;  %1330 = vmatpush1.bf16.msra.mxu1 %v3949_v36  ;;  %1178 = vmatprep.mubr.bf16.mxu1 %v4627_v11  ;;  %v615_v45 = vadd.f32 %v4621_v37, %v614_v43  ;;  %v3970_v41 = vld [vmem:[#allocation8 + $0x170] ss:$8 sps:$4 sm:$0xff]  }
 0x1bc   :  { %v729_v47 = vmax.f32 %v623_v21, 0.0  ;;  %1331 = vmatprep.subr.bf16.mxu1 %v3954_v40 }
 0x1bd   :  { %v727_v48 = vmax.f32 %v615_v45, 0.0 }
 0x1be   :  { %v4635_v26 = vpack.c.bf16 %v729_v47, %v728_v42 }
 0x1bf   :  { %v4637_v49 = vpack.c.bf16 %v727_v48, %v726_v44  ;;  %v3602_v50 = vpop.f32.mrb[8].mxu0  ;;  %1332 = vmatpush1.bf16.msra.mxu1 %v3952_v46 }
 0x1c0   :  { %v636_v52 = vadd.f32 %v3602_v50, %v4621_v37  ;;  %v627_v53 = vpop.f32.mrb[9].mxu0  ;;  %1333 = vmatprep.subr.bf16.mxu1 %v3957_v24 }
 0x1c1   :  { %v628_v54 = vadd.f32 %v4621_v37, %v627_v53  ;;  %v3603_v28 = vpop.f32.mrb[10].mxu0 }
 0x1c2   :  { %1179 = vmatmul.mubr.bf16.gmra.mrb[4].mxu1 %v754_v14  ;;  %v732_v55 = vmax.f32 %v636_v52, 0.0  ;;  %v639_v56 = vadd.f32 %v3603_v28, %v4621_v37  ;;  %v630_v57 = vpop.f32.mrb[11].mxu0 }
 0x1c3   :  { %1188 = vmatprep.mubr.bf16.mxu1 %v4637_v49  ;;  %v730_v58 = vmax.f32 %v628_v54, 0.0  ;;  %v631_v59 = vadd.f32 %v4621_v37, %v630_v57  ;;  %1334 = vmatpush1.bf16.msra.mxu1 %v3955_v51 }
 0x1c4   :  { %v733_v60 = vmax.f32 %v639_v56, 0.0  ;;  %1335 = vmatprep.subr.bf16.mxu1 %v3960_v27 }
 0x1c5   :  { %v731_v61 = vmax.f32 %v631_v59, 0.0 }
 0x1c6   :  { %v4644_v62 = vpack.c.bf16 %v733_v60, %v732_v55 }
 0x1c7   :  { %v4646_v63 = vpack.c.bf16 %v731_v61, %v730_v58  ;;  %v3606_v1 = vpop.f32.mrb[12].mxu0  ;;  %1336 = vmatpush1.bf16.msra.mxu1 %v3958_v29 }
 0x1c8   :  { %v652_v31 = vadd.f32 %v3606_v1, %v4621_v37  ;;  %v643_v3 = vpop.f32.mrb[13].mxu0  ;;  %1337 = vmatprep.subr.bf16.mxu1 %v3963_v30 }
 0x1c9   :  { %v644_v4 = vadd.f32 %v4621_v37, %v643_v3  ;;  %v3607_v5 = vpop.f32.mrb[14].mxu0 }
 0x1ca   :  { %1189 = vmatmul.mubr.bf16.gmra.mrb[8].mxu1 %v4627_v11  ;;  %v736_v6 = vmax.f32 %v652_v31, 0.0  ;;  %v655_v7 = vadd.f32 %v3607_v5, %v4621_v37  ;;  %v646_v8 = vpop.f32.mrb[15].mxu0 }
 0x1cb   :  { %1198 = vmatprep.mubr.bf16.mxu1 %v4635_v26  ;;  %v734_v9 = vmax.f32 %v644_v4, 0.0  ;;  %v647_v33 = vadd.f32 %v4621_v37, %v646_v8  ;;  %1338 = vmatpush1.bf16.msra.mxu1 %v3961_v2 }
 0x1cc   :  { %v737_v13 = vmax.f32 %v655_v7, 0.0  ;;  %1339 = vmatprep.subr.bf16.mxu1 %v3966_v32 }
 0x1cd   :  { %v735_v16 = vmax.f32 %v647_v33, 0.0 }
 0x1ce   :  { %v4654_v18 = vpack.c.bf16 %v737_v13, %v736_v6 }
 0x1cf   :  { %v4656_v19 = vpack.c.bf16 %v735_v16, %v734_v9  ;;  %v3610_v20 = vpop.f32.mrb[16].mxu0  ;;  %1340 = vmatpush1.bf16.msra.mxu1 %v3964_v12 }
 0x1d0   :  { %v668_v23 = vadd.f32 %v3610_v20, %v4621_v37  ;;  %v659_v10 = vpop.f32.mrb[17].mxu0  ;;  %1341 = vmatprep.subr.bf16.mxu1 %v3969_v15 }
 0x1d1   :  { %v660_v34 = vadd.f32 %v4621_v37, %v659_v10  ;;  %v3611_v35 = vpop.f32.mrb[18].mxu0 }
 0x1d2   :  { %1199 = vmatmul.mubr.bf16.gmra.mrb[12].mxu1 %v4637_v49  ;;  %v740_v14 = vmax.f32 %v668_v23, 0.0  ;;  %v671_v36 = vadd.f32 %v3611_v35, %v4621_v37  ;;  %v662_v38 = vpop.f32.mrb[19].mxu0  ;;  %v3983_v35 = vld [vmem:[%s5086_s5 + $0x68] sm:$0xff]  }
 0x1d3   :  { %1208 = vmatprep.mubr.bf16.mxu1 %v4646_v63  ;;  %v738_v39 = vmax.f32 %v660_v34, 0.0  ;;  %v663_v40 = vadd.f32 %v4621_v37, %v662_v38  ;;  %1342 = vmatpush1.bf16.msra.mxu1 %v3967_v22  ;;  %v3982_v34 = vld [vmem:[%s5086_s5 + $0x20] sm:$0xff]   ;;  %v3986_v38 = vld [vmem:[%s5086_s5 + $0x30] sm:$0xff]  }
 0x1d4   :  { %v741_v17 = vmax.f32 %v671_v36, 0.0  ;;  %1343 = vmatprep.subr.bf16.mxu1 %v3972_v25  ;;  %v3981_v25 = vld [vmem:[%s5086_s5 + $0x60] sm:$0xff]   ;;  %v3985_v36 = vld [vmem:[%s5086_s5 + $0x70] sm:$0xff]  }
 0x1d5   :  { %v739_v42 = vmax.f32 %v663_v40, 0.0  ;;  %v3988_v40 = vld [vmem:[%s5086_s5 + $0x38] sm:$0xff]  }
 0x1d6   :  { %v4664_v21 = vpack.c.bf16 %v741_v17, %v740_v14  ;;  %v3984_v14 = vld [vmem:[%s5086_s5 + $0x28] sm:$0xff]   ;;  %v886_v17 = vlaneseq }
 0x1d7   :  { %v4666_v43 = vpack.c.bf16 %v739_v42, %v738_v39  ;;  %v3614_v44 = vpop.f32.mrb[20].mxu0  ;;  %1344 = vmatpush1.bf16.msra.mxu1 %v3970_v41  ;;  %v3987_v39 = vld [vmem:[%s5086_s5 + $0x78] sm:$0xff]   ;;  %v3989_v41 = vld [vmem:[%s5086_s5 + $0x80] sm:$0xff]  }
 0x1d8   :  { %v684_v45 = vadd.f32 %v3614_v44, %v4621_v37  ;;  %v675_v46 = vpop.f32.mrb[21].mxu0  ;;  %v4799_v42 = vshrl.u32 %v886_v17, 7 }
 0x1d9   :  { %v676_v47 = vadd.f32 %v4621_v37, %v675_v46  ;;  %v3615_v24 = vpop.f32.mrb[22].mxu0 }
 0x1da   :  { %1209 = vmatmul.mubr.bf16.gmra.mrb[16].mxu1 %v4635_v26  ;;  %v744_v48 = vmax.f32 %v684_v45, 0.0  ;;  %v687_v50 = vadd.f32 %v3615_v24, %v4621_v37  ;;  %v678_v51 = vpop.f32.mrb[23].mxu0  ;;  %v892_v45 = vsub.s32 1, %v4799_v42 }
 0x1db   :  { %1218 = vmatprep.mubr.bf16.mxu1 %v4644_v62  ;;  %v742_v52 = vmax.f32 %v676_v47, 0.0  ;;  %v679_v53 = vadd.f32 %v4621_v37, %v678_v51 }
 0x1dc   :  { %v745_v27 = vmax.f32 %v687_v50, 0.0 }
 0x1dd   :  { %v743_v54 = vmax.f32 %v679_v53, 0.0 }
 0x1de   :  { %v4674_v28 = vpack.c.bf16 %v745_v27, %v744_v48 }
 0x1df   :  { %v4676_v55 = vpack.c.bf16 %v743_v54, %v742_v52  ;;  %v3618_v56 = vpop.f32.mrb[24].mxu0 }
 0x1e0   :  { %v700_v57 = vadd.f32 %v3618_v56, %v4621_v37  ;;  %v691_v58 = vpop.f32.mrb[25].mxu0 }
 0x1e1   :  { %v692_v59 = vadd.f32 %v4621_v37, %v691_v58  ;;  %v3619_v29 = vpop.f32.mrb[26].mxu0 }
 0x1e2   :  { %1219 = vmatmul.mubr.bf16.gmra.mrb[20].mxu1 %v4646_v63  ;;  %v748_v60 = vmax.f32 %v700_v57, 0.0  ;;  %v703_v30 = vadd.f32 %v3619_v29, %v4621_v37  ;;  %v694_v61 = vpop.f32.mrb[27].mxu0 }
 0x1e3   :  { %1228 = vmatprep.mubr.bf16.mxu1 %v4656_v19  ;;  %v746_v1 = vmax.f32 %v692_v59, 0.0  ;;  %v695_v2 = vadd.f32 %v4621_v37, %v694_v61 }
 0x1e4   :  { %v749_v31 = vmax.f32 %v703_v30, 0.0 }
 0x1e5   :  { %v747_v3 = vmax.f32 %v695_v2, 0.0 }
 0x1e6   :  { %v4684_v32 = vpack.c.bf16 %v749_v31, %v748_v60 }
 0x1e7   :  { %v4686_v4 = vpack.c.bf16 %v747_v3, %v746_v1  ;;  %v3622_v5 = vpop.f32.mrb[28].mxu0 }
 0x1e8   :  { %v716_v6 = vadd.f32 %v3622_v5, %v4621_v37  ;;  %v707_v7 = vpop.f32.mrb[29].mxu0 }
 0x1e9   :  { %v708_v8 = vadd.f32 %v4621_v37, %v707_v7  ;;  %v3623_v9 = vpop.f32.mrb[30].mxu0 }
 0x1ea   :  { %1229 = vmatmul.mubr.bf16.gmra.mrb[24].mxu1 %v4644_v62  ;;  %v752_v33 = vmax.f32 %v716_v6, 0.0  ;;  %v719_v12 = vadd.f32 %v3623_v9, %v4621_v37  ;;  %v710_v13 = vpop.f32.mrb[31].mxu0 }
 0x1eb   :  { %1238 = vmatprep.mubr.bf16.mxu1 %v4654_v18  ;;  %v750_v15 = vmax.f32 %v708_v8, 0.0  ;;  %v711_v16 = vadd.f32 %v4621_v37, %v710_v13  ;;  %v3973_v37 = vld [vmem:[%s5086_s5 + $0x40] sm:$0xff]  }
 0x1ec   :  { %v753_v20 = vmax.f32 %v719_v12, 0.0  ;;  %3453 = vmatprep.subr.bf16.mxu0 %v3973_v37 }
 0x1ed   :  { %v751_v22 = vmax.f32 %v711_v16, 0.0 }
 0x1ee   :  { %v4694_v23 = vpack.c.bf16 %v753_v20, %v752_v33  ;;  %v3990_v20 = vld [vmem:[%s5086_s5 + $0x88] sm:$0xff]  }
 0x1ef   :  { %v4696_v10 = vpack.c.bf16 %v751_v22, %v750_v15 }
 0x1f2   :  { %1239 = vmatmul.mubr.bf16.gmra.mrb[28].mxu1 %v4656_v19 }
 0x1f3   :  { %1248 = vmatprep.mubr.bf16.mxu1 %v4666_v43 }
 0x1fa   :  { %1249 = vmatmul.mubr.bf16.gmra.mrb[32].mxu1 %v4654_v18 }
 0x1fb   :  { %1258 = vmatprep.mubr.bf16.mxu1 %v4664_v21 }
 0x202   :  { %1259 = vmatmul.mubr.bf16.gmra.mrb[36].mxu1 %v4666_v43 }
 0x203   :  { %1268 = vmatprep.mubr.bf16.mxu1 %v4676_v55 }
 0x20a   :  { %1269 = vmatmul.mubr.bf16.gmra.mrb[40].mxu1 %v4664_v21 }
 0x20b   :  { %1278 = vmatprep.mubr.bf16.mxu1 %v4674_v28 }
 0x212   :  { %1279 = vmatmul.mubr.bf16.gmra.mrb[44].mxu1 %v4676_v55 }
 0x213   :  { %1288 = vmatprep.mubr.bf16.mxu1 %v4686_v4 }
 0x21a   :  { %1289 = vmatmul.mubr.bf16.gmra.mrb[48].mxu1 %v4674_v28 }
 0x21b   :  { %1298 = vmatprep.mubr.bf16.mxu1 %v4684_v32 }
 0x222   :  { %1299 = vmatmul.mubr.bf16.gmra.mrb[52].mxu1 %v4686_v4 }
 0x223   :  { %1308 = vmatprep.mubr.bf16.mxu1 %v4696_v10 }
 0x22a   :  { %1309 = vmatmul.mubr.bf16.gmra.mrb[56].mxu1 %v4684_v32 }
 0x22b   :  { %1318 = vmatprep.mubr.bf16.mxu1 %v4694_v23 }
 0x232   :  { %1319 = vmatmul.mubr.bf16.gmra.mrb[60].mxu1 %v4696_v10 }
 0x233   :  { %1361 = vmatprep.mubr.bf16.mxu1 %v4246_v0 }
 0x23a   :  { %1362 = vmatmul.mubr.bf16.vlgmr.msra.gmra.mrb[0].mxu1 %v4627_v11  ;;  %v3974_v11 = vld [vmem:[%s5086_s5] sm:$0xff]  }
 0x23b   :  { %1371 = vmatprep.mubr.bf16.mxu1 %v4246_v0  ;;  %3454 = vmatpush3.bf16.msra.mxu0 %v3974_v11 }
 0x242   :  { %1372 = vmatmul.mubr.bf16.gmra.mrb[4].mxu1 %v4637_v49  ;;  %v3976_v49 = vld [vmem:[%s5086_s5 + $0x8] sm:$0xff]  }
 0x243   :  { %1381 = vmatprep.mubr.bf16.mxu1 %v4246_v0 }
 0x24a   :  { %1382 = vmatmul.mubr.bf16.gmra.mrb[8].mxu1 %v4635_v26  ;;  %v3975_v26 = vld [vmem:[%s5086_s5 + $0x48] sm:$0xff]  }
 0x24b   :  { %1391 = vmatprep.mubr.bf16.mxu1 %v4246_v0  ;;  %3455 = vmatprep.subr.bf16.mxu0 %v3975_v26 }
 0x24c   :  { %3456 = vmatpush3.bf16.msra.mxu0 %v3976_v49  ;;  %v3991_v49 = vld [vmem:[%s5086_s5 + $0x90] sm:$0xff]  }
 0x252   :  { %1392 = vmatmul.mubr.bf16.gmra.mrb[12].mxu1 %v4646_v63  ;;  %v3978_v63 = vld [vmem:[%s5086_s5 + $0x10] sm:$0xff]  }
 0x253   :  { %1401 = vmatprep.mubr.bf16.mxu1 %v4246_v0 }
 0x25a   :  { %1402 = vmatmul.mubr.bf16.gmra.mrb[16].mxu1 %v4644_v62  ;;  %v3977_v62 = vld [vmem:[%s5086_s5 + $0x50] sm:$0xff]  }
 0x25b   :  { %1411 = vmatprep.mubr.bf16.mxu1 %v4246_v0  ;;  %3457 = vmatprep.subr.bf16.mxu0 %v3977_v62 }
 0x25c   :  { %3458 = vmatpush3.bf16.msra.mxu0 %v3978_v63 }
 0x262   :  { %1412 = vmatmul.mubr.bf16.gmra.mrb[20].mxu1 %v4656_v19  ;;  %v3980_v19 = vld [vmem:[%s5086_s5 + $0x18] sm:$0xff]  }
 0x263   :  { %1421 = vmatprep.mubr.bf16.mxu1 %v4246_v0 }
 0x26a   :  { %1422 = vmatmul.mubr.bf16.gmra.mrb[24].mxu1 %v4654_v18  ;;  %v3979_v18 = vld [vmem:[%s5086_s5 + $0x58] sm:$0xff]  }
 0x26b   :  { %1431 = vmatprep.mubr.bf16.mxu1 %v4246_v0  ;;  %3459 = vmatprep.subr.bf16.mxu0 %v3979_v18 }
 0x26c   :  { %3460 = vmatpush3.bf16.msra.mxu0 %v3980_v19 }
 0x26d   :  { %3461 = vmatprep.subr.bf16.mxu0 %v3981_v25 }
 0x270   :  { %3462 = vmatpush3.bf16.msra.mxu0 %v3982_v34 }
 0x271   :  { %3463 = vmatprep.subr.bf16.mxu0 %v3983_v35 }
 0x272   :  { %1432 = vmatmul.mubr.bf16.gmra.mrb[28].mxu1 %v4666_v43  ;;  %v884_v43 = vld [vmem:[%s5085_s4] sm:$0x3] }
 0x273   :  { %1441 = vmatprep.mubr.bf16.mxu1 %v4246_v0  ;;  %v4812_v50 = vrot.slane %v884_v43, %v892_v45 }
 0x274   :  { %3464 = vmatpush3.bf16.msra.mxu0 %v3984_v14 }
 0x275   :  { %3465 = vmatprep.subr.bf16.mxu0 %v3985_v36 }
 0x278   :  { %3466 = vmatpush3.bf16.msra.mxu0 %v3986_v38 }
 0x279   :  { %3467 = vmatprep.subr.bf16.mxu0 %v3987_v39 }
 0x27a   :  { %1442 = vmatmul.mubr.bf16.gmra.mrb[32].mxu1 %v4664_v21  ;;  %v888_v21 = vsub.s32 0, %v4799_v42 }
 0x27b   :  { %1451 = vmatprep.mubr.bf16.mxu1 %v4246_v0 }
 0x27c   :  { %3468 = vmatpush3.bf16.msra.mxu0 %v3988_v40  ;;  %v4808_v24 = vrot.slane %v884_v43, %v888_v21  ;;  %v3992_v43 = vld [vmem:[%s5086_s5 + $0x98] sm:$0xff]  }
 0x27d   :  { %3624 = vmatprep.subr.bf16.mxu0 %v3989_v41 }
 0x282   :  { %1452 = vmatmul.mubr.bf16.gmra.mrb[36].mxu1 %v4676_v55 }
 0x283   :  { %1461 = vmatprep.mubr.bf16.mxu1 %v4246_v0 }
 0x28a   :  { %1462 = vmatmul.mubr.bf16.gmra.mrb[40].mxu1 %v4674_v28 }
 0x28b   :  { %1471 = vmatprep.mubr.bf16.mxu1 %v4246_v0 }
 0x292   :  { %1472 = vmatmul.mubr.bf16.gmra.mrb[44].mxu1 %v4686_v4 }
 0x293   :  { %1481 = vmatprep.mubr.bf16.mxu1 %v4246_v0 }
 0x29a   :  { %1482 = vmatmul.mubr.bf16.gmra.mrb[48].mxu1 %v4684_v32 }
 0x29b   :  { %1491 = vmatprep.mubr.bf16.mxu1 %v4246_v0 }
 0x2a2   :  { %1492 = vmatmul.mubr.bf16.gmra.mrb[52].mxu1 %v4696_v10 }
 0x2a3   :  { %1501 = vmatprep.mubr.bf16.mxu1 %v4246_v0 }
 0x2aa   :  { %1502 = vmatmul.mubr.bf16.gmra.mrb[56].mxu1 %v4694_v23 }
 0x2ab   :  { %1511 = vmatprep.mubr.bf16.mxu1 %v4246_v0 }
 0x2b2   :  { %1512 = vmatmul.mubr.bf16.gmra.mrb[60].mxu1 %v4246_v0 }
 0x30d   :  { %v1363_v44 = vpop.f32.mrb[0].mxu1 }
 0x30e   :  { %v1365_v46 = vpop.f32.mrb[1].mxu1  ;;  %v3676_v51 = vadd.f32 %v1363_v44, %v4808_v24 }
 0x30f   :  { %v1367_v47 = vpop.f32.mrb[2].mxu1  ;;  %v3677_v52 = vadd.f32 %v1365_v46, %v4812_v50 }
 0x310   :  { %v1369_v48 = vpop.f32.mrb[3].mxu1  ;;  %v3678_v27 = vadd.f32 %v1367_v47, %v4808_v24  ;;  %v1522_v58 = vmax.f32 %v3676_v51, 0.0 }
 0x311   :  { %v3679_v55 = vadd.f32 %v1369_v48, %v4812_v50  ;;  %v1523_v30 = vmax.f32 %v3677_v52, 0.0 }
 0x312   :  { %v1524_v2 = vmax.f32 %v3678_v27, 0.0 }
 0x313   :  { %v1525_v32 = vmax.f32 %v3679_v55, 0.0 }
 0x315   :  { %v1373_v53 = vpop.f32.mrb[4].mxu1 }
 0x316   :  { %v3680_v54 = vadd.f32 %v1373_v53, %v4808_v24  ;;  %v1375_v28 = vpop.f32.mrb[5].mxu1 }
 0x317   :  { %v3681_v56 = vadd.f32 %v1375_v28, %v4812_v50  ;;  %v1377_v57 = vpop.f32.mrb[6].mxu1 }
 0x318   :  { %v1526_v59 = vmax.f32 %v3680_v54, 0.0  ;;  %v3682_v29 = vadd.f32 %v1377_v57, %v4808_v24  ;;  %v1379_v60 = vpop.f32.mrb[7].mxu1  ;;  %v3993_v54 = vld [vmem:[%s5086_s5 + $0xa0] sm:$0xff]  }
 0x319   :  { %v1527_v61 = vmax.f32 %v3681_v56, 0.0  ;;  %v3683_v1 = vadd.f32 %v1379_v60, %v4812_v50 }
 0x31a   :  { %v1586_v31 = vmax.f32 %v1522_v58, %v1526_v59  ;;  %v1528_v3 = vmax.f32 %v3682_v29, 0.0  ;;  %v3994_v58 = vld [vmem:[%s5086_s5 + $0xa8] sm:$0xff]  }
 0x31b   :  { %v1587_v4 = vmax.f32 %v1523_v30, %v1527_v61  ;;  %v1529_v5 = vmax.f32 %v3683_v1, 0.0 }
 0x31c   :  { %v1588_v6 = vmax.f32 %v1524_v2, %v1528_v3  ;;  %v3995_v2 = vld [vmem:[%s5086_s5 + $0xb0] sm:$0xff]  }
 0x31d   :  { %v1618_v7 = vmax.f32 %v1586_v31, %v1587_v4  ;;  %v1589_v8 = vmax.f32 %v1525_v32, %v1529_v5  ;;  %v1383_v9 = vpop.f32.mrb[8].mxu1 }
 0x31e   :  { %v1385_v33 = vpop.f32.mrb[9].mxu1  ;;  %v3684_v22 = vadd.f32 %v1383_v9, %v4808_v24 }
 0x31f   :  { %v1619_v12 = vmax.f32 %v1588_v6, %v1589_v8  ;;  %v1387_v13 = vpop.f32.mrb[10].mxu1  ;;  %v3685_v23 = vadd.f32 %v1385_v33, %v4812_v50 }
 0x320   :  { %v1389_v15 = vpop.f32.mrb[11].mxu1  ;;  %v3686_v37 = vadd.f32 %v1387_v13, %v4808_v24  ;;  %v1530_v19 = vmax.f32 %v3684_v22, 0.0 }
 0x321   :  { %v1634_v16 = vpack.c.bf16 %v1619_v12, %v1618_v7  ;;  %v3687_v62 = vadd.f32 %v1389_v15, %v4812_v50  ;;  %v1531_v14 = vmax.f32 %v3685_v23, 0.0 }
 0x322   :  { %v1532_v39 = vmax.f32 %v3686_v37, 0.0 }
 0x323   :  { %1907 = vmatprep.mubr.bf16.mxu0 %v1634_v16  ;;  %v1533_v44 = vmax.f32 %v3687_v62, 0.0 }
 0x324   :  { %1908 = vmatmul.mubr.bf16.vlgmr.msra.gmra.mrb[32].mxu0 %v4246_v0 }
 0x325   :  { %v1393_v10 = vpop.f32.mrb[12].mxu1  ;;  %3625 = vmatpush3.bf16.msra.mxu0 %v3989_v41 }
 0x326   :  { %v3688_v11 = vadd.f32 %v1393_v10, %v4808_v24  ;;  %v1395_v26 = vpop.f32.mrb[13].mxu1  ;;  %3626 = vmatprep.subr.bf16.mxu0 %v3990_v20 }
 0x327   :  { %v3689_v63 = vadd.f32 %v1395_v26, %v4812_v50  ;;  %v1397_v18 = vpop.f32.mrb[14].mxu1 }
 0x328   :  { %v1534_v25 = vmax.f32 %v3688_v11, 0.0  ;;  %v3690_v34 = vadd.f32 %v1397_v18, %v4808_v24  ;;  %v1399_v35 = vpop.f32.mrb[15].mxu1 }
 0x329   :  { %v1535_v36 = vmax.f32 %v3689_v63, 0.0  ;;  %v3691_v38 = vadd.f32 %v1399_v35, %v4812_v50  ;;  %3627 = vmatpush3.bf16.msra.mxu0 %v3990_v20 }
 0x32a   :  { %v1590_v40 = vmax.f32 %v1530_v19, %v1534_v25  ;;  %v1536_v41 = vmax.f32 %v3690_v34, 0.0  ;;  %3628 = vmatprep.subr.bf16.mxu0 %v3991_v49 }
 0x32b   :  { %v1591_v46 = vmax.f32 %v1531_v14, %v1535_v36  ;;  %v1537_v47 = vmax.f32 %v3691_v38, 0.0 }
 0x32c   :  { %v1592_v48 = vmax.f32 %v1532_v39, %v1536_v41 }
 0x32d   :  { %v1620_v51 = vmax.f32 %v1590_v40, %v1591_v46  ;;  %v1593_v52 = vmax.f32 %v1533_v44, %v1537_v47  ;;  %v1403_v53 = vpop.f32.mrb[16].mxu1  ;;  %3629 = vmatpush3.bf16.msra.mxu0 %v3991_v49 }
 0x32e   :  { %v1405_v27 = vpop.f32.mrb[17].mxu1  ;;  %3630 = vmatprep.subr.bf16.mxu0 %v3992_v43  ;;  %v3692_v59 = vadd.f32 %v1403_v53, %v4808_v24 }
 0x32f   :  { %v1621_v28 = vmax.f32 %v1592_v48, %v1593_v52  ;;  %v1407_v55 = vpop.f32.mrb[18].mxu1  ;;  %v3693_v29 = vadd.f32 %v1405_v27, %v4812_v50 }
 0x330   :  { %v1409_v56 = vpop.f32.mrb[19].mxu1  ;;  %v3694_v30 = vadd.f32 %v1407_v55, %v4808_v24  ;;  %v1538_v4 = vmax.f32 %v3692_v59, 0.0 }
 0x331   :  { %v4843_v57 = vpack.c.bf16 %v1621_v28, %v1620_v51  ;;  %3631 = vmatpush3.bf16.msra.mxu0 %v3992_v43  ;;  %v3695_v31 = vadd.f32 %v1409_v56, %v4812_v50  ;;  %v1539_v8 = vmax.f32 %v3693_v29, 0.0 }
 0x332   :  { %3632 = vmatprep.subr.bf16.mxu0 %v3993_v54  ;;  %v1540_v12 = vmax.f32 %v3694_v30, 0.0 }
 0x333   :  { %1915 = vmatprep.mubr.bf16.mxu0 %v4843_v57  ;;  %v1541_v20 = vmax.f32 %v3695_v31, 0.0 }
 0x334   :  { %1916 = vmatmul.mubr.bf16.gmra.mrb[36].mxu0 %v1634_v16  ;;  %v3996_v16 = vld [vmem:[%s5086_s5 + $0xb8] sm:$0xff]  }
 0x335   :  { %v1413_v60 = vpop.f32.mrb[20].mxu1  ;;  %3633 = vmatpush3.bf16.msra.mxu0 %v3993_v54 }
 0x336   :  { %v3696_v61 = vadd.f32 %v1413_v60, %v4808_v24  ;;  %v1415_v1 = vpop.f32.mrb[21].mxu1  ;;  %3634 = vmatprep.subr.bf16.mxu0 %v3994_v58 }
 0x337   :  { %v3697_v3 = vadd.f32 %v1415_v1, %v4812_v50  ;;  %v1417_v32 = vpop.f32.mrb[22].mxu1 }
 0x338   :  { %v1542_v5 = vmax.f32 %v3696_v61, 0.0  ;;  %v3698_v6 = vadd.f32 %v1417_v32, %v4808_v24  ;;  %v1419_v7 = vpop.f32.mrb[23].mxu1 }
 0x339   :  { %v1543_v9 = vmax.f32 %v3697_v3, 0.0  ;;  %v3699_v33 = vadd.f32 %v1419_v7, %v4812_v50  ;;  %3635 = vmatpush3.bf16.msra.mxu0 %v3994_v58 }
 0x33a   :  { %v1594_v13 = vmax.f32 %v1538_v4, %v1542_v5  ;;  %v1544_v15 = vmax.f32 %v3698_v6, 0.0  ;;  %3636 = vmatprep.subr.bf16.mxu0 %v3995_v2 }
 0x33b   :  { %v1595_v22 = vmax.f32 %v1539_v8, %v1543_v9  ;;  %v1545_v23 = vmax.f32 %v3699_v33, 0.0 }
 0x33c   :  { %v1596_v10 = vmax.f32 %v1540_v12, %v1544_v15 }
 0x33d   :  { %v1622_v37 = vmax.f32 %v1594_v13, %v1595_v22  ;;  %v1597_v11 = vmax.f32 %v1541_v20, %v1545_v23  ;;  %v1423_v26 = vpop.f32.mrb[24].mxu1  ;;  %3637 = vmatpush3.bf16.msra.mxu0 %v3995_v2 }
 0x33e   :  { %v1425_v49 = vpop.f32.mrb[25].mxu1  ;;  %3638 = vmatprep.subr.bf16.mxu0 %v3996_v16  ;;  %v3700_v25 = vadd.f32 %v1423_v26, %v4808_v24 }
 0x33f   :  { %v1623_v62 = vmax.f32 %v1596_v10, %v1597_v11  ;;  %v1427_v63 = vpop.f32.mrb[26].mxu1  ;;  %v3701_v34 = vadd.f32 %v1425_v49, %v4812_v50 }
 0x340   :  { %v1429_v18 = vpop.f32.mrb[27].mxu1  ;;  %v3702_v14 = vadd.f32 %v1427_v63, %v4808_v24  ;;  %v1546_v43 = vmax.f32 %v3700_v25, 0.0 }
 0x341   :  { %v4863_v19 = vpack.c.bf16 %v1623_v62, %v1622_v37  ;;  %3639 = vmatpush3.bf16.msra.mxu0 %v3996_v16  ;;  %v3703_v39 = vadd.f32 %v1429_v18, %v4812_v50  ;;  %v1547_v48 = vmax.f32 %v3701_v34, 0.0 }
 0x342   :  { %v1548_v53 = vmax.f32 %v3702_v14, 0.0 }
 0x343   :  { %1923 = vmatprep.mubr.bf16.mxu0 %v4863_v19  ;;  %v1549_v28 = vmax.f32 %v3703_v39, 0.0 }
 0x344   :  { %1924 = vmatmul.mubr.bf16.gmra.mrb[40].mxu0 %v4843_v57 }
 0x345   :  { %v1433_v35 = vpop.f32.mrb[28].mxu1 }
 0x346   :  { %v3704_v36 = vadd.f32 %v1433_v35, %v4808_v24  ;;  %v1435_v38 = vpop.f32.mrb[29].mxu1 }
 0x347   :  { %v3705_v40 = vadd.f32 %v1435_v38, %v4812_v50  ;;  %v1437_v41 = vpop.f32.mrb[30].mxu1 }
 0x348   :  { %v1550_v44 = vmax.f32 %v3704_v36, 0.0  ;;  %v3706_v46 = vadd.f32 %v1437_v41, %v4808_v24  ;;  %v1439_v47 = vpop.f32.mrb[31].mxu1 }
 0x349   :  { %v1551_v51 = vmax.f32 %v3705_v40, 0.0  ;;  %v3707_v52 = vadd.f32 %v1439_v47, %v4812_v50 }
 0x34a   :  { %v1598_v27 = vmax.f32 %v1546_v43, %v1550_v44  ;;  %v1552_v54 = vmax.f32 %v3706_v46, 0.0 }
 0x34b   :  { %v1599_v55 = vmax.f32 %v1547_v48, %v1551_v51  ;;  %v1553_v56 = vmax.f32 %v3707_v52, 0.0 }
 0x34c   :  { %v1600_v58 = vmax.f32 %v1548_v53, %v1552_v54 }
 0x34d   :  { %v1624_v59 = vmax.f32 %v1598_v27, %v1599_v55  ;;  %v1601_v29 = vmax.f32 %v1549_v28, %v1553_v56  ;;  %v1443_v60 = vpop.f32.mrb[32].mxu1 }
 0x34e   :  { %v1445_v30 = vpop.f32.mrb[33].mxu1  ;;  %v3708_v3 = vadd.f32 %v1443_v60, %v4808_v24 }
 0x34f   :  { %v1625_v61 = vmax.f32 %v1600_v58, %v1601_v29  ;;  %v1447_v1 = vpop.f32.mrb[34].mxu1  ;;  %v3709_v32 = vadd.f32 %v1445_v30, %v4812_v50 }
 0x350   :  { %v1449_v2 = vpop.f32.mrb[35].mxu1  ;;  %v3710_v5 = vadd.f32 %v1447_v1, %v4808_v24  ;;  %v1554_v12 = vmax.f32 %v3708_v3, 0.0 }
 0x351   :  { %v4875_v31 = vpack.c.bf16 %v1625_v61, %v1624_v59  ;;  %v3711_v8 = vadd.f32 %v1449_v2, %v4812_v50  ;;  %v1555_v20 = vmax.f32 %v3709_v32, 0.0 }
 0x352   :  { %v1556_v10 = vmax.f32 %v3710_v5, 0.0 }
 0x353   :  { %1931 = vmatprep.mubr.bf16.mxu0 %v4875_v31  ;;  %v1557_v26 = vmax.f32 %v3711_v8, 0.0 }
 0x354   :  { %1932 = vmatmul.mubr.bf16.gmra.mrb[44].mxu0 %v4863_v19 }
 0x355   :  { %v1453_v4 = vpop.f32.mrb[36].mxu1 }
 0x356   :  { %v3712_v6 = vadd.f32 %v1453_v4, %v4808_v24  ;;  %v1455_v7 = vpop.f32.mrb[37].mxu1 }
 0x357   :  { %v3713_v9 = vadd.f32 %v1455_v7, %v4812_v50  ;;  %v1457_v33 = vpop.f32.mrb[38].mxu1 }
 0x358   :  { %v1558_v13 = vmax.f32 %v3712_v6, 0.0  ;;  %v3714_v15 = vadd.f32 %v1457_v33, %v4808_v24  ;;  %v1459_v16 = vpop.f32.mrb[39].mxu1 }
 0x359   :  { %v1559_v22 = vmax.f32 %v3713_v9, 0.0  ;;  %v3715_v23 = vadd.f32 %v1459_v16, %v4812_v50 }
 0x35a   :  { %v1602_v37 = vmax.f32 %v1554_v12, %v1558_v13  ;;  %v1560_v11 = vmax.f32 %v3714_v15, 0.0 }
 0x35b   :  { %v1603_v49 = vmax.f32 %v1555_v20, %v1559_v22  ;;  %v1561_v62 = vmax.f32 %v3715_v23, 0.0 }
 0x35c   :  { %v1604_v63 = vmax.f32 %v1556_v10, %v1560_v11 }
 0x35d   :  { %v1626_v18 = vmax.f32 %v1602_v37, %v1603_v49  ;;  %v1605_v25 = vmax.f32 %v1557_v26, %v1561_v62  ;;  %v1463_v34 = vpop.f32.mrb[40].mxu1 }
 0x35e   :  { %v1465_v35 = vpop.f32.mrb[41].mxu1  ;;  %v3716_v40 = vadd.f32 %v1463_v34, %v4808_v24 }
 0x35f   :  { %v1627_v14 = vmax.f32 %v1604_v63, %v1605_v25  ;;  %v1467_v36 = vpop.f32.mrb[42].mxu1  ;;  %v3717_v41 = vadd.f32 %v1465_v35, %v4812_v50 }
 0x360   :  { %v1469_v38 = vpop.f32.mrb[43].mxu1  ;;  %v3718_v44 = vadd.f32 %v1467_v36, %v4808_v24  ;;  %v1562_v53 = vmax.f32 %v3716_v40, 0.0 }
 0x361   :  { %v4887_v39 = vpack.c.bf16 %v1627_v14, %v1626_v18  ;;  %v3719_v48 = vadd.f32 %v1469_v38, %v4812_v50  ;;  %v1563_v55 = vmax.f32 %v3717_v41, 0.0 }
 0x362   :  { %v1564_v59 = vmax.f32 %v3718_v44, 0.0 }
 0x363   :  { %1939 = vmatprep.mubr.bf16.mxu0 %v4887_v39  ;;  %v1565_v30 = vmax.f32 %v3719_v48, 0.0 }
 0x364   :  { %1940 = vmatmul.mubr.bf16.gmra.mrb[48].mxu0 %v4875_v31 }
 0x365   :  { %v1473_v43 = vpop.f32.mrb[44].mxu1 }
 0x366   :  { %v3720_v46 = vadd.f32 %v1473_v43, %v4808_v24  ;;  %v1475_v47 = vpop.f32.mrb[45].mxu1 }
 0x367   :  { %v3721_v51 = vadd.f32 %v1475_v47, %v4812_v50  ;;  %v1477_v52 = vpop.f32.mrb[46].mxu1 }
 0x368   :  { %v1566_v27 = vmax.f32 %v3720_v46, 0.0  ;;  %v3722_v54 = vadd.f32 %v1477_v52, %v4808_v24  ;;  %v1479_v28 = vpop.f32.mrb[47].mxu1 }
 0x369   :  { %v1567_v56 = vmax.f32 %v3721_v51, 0.0  ;;  %v3723_v58 = vadd.f32 %v1479_v28, %v4812_v50 }
 0x36a   :  { %v1606_v29 = vmax.f32 %v1562_v53, %v1566_v27  ;;  %v1568_v60 = vmax.f32 %v3722_v54, 0.0 }
 0x36b   :  { %v1607_v61 = vmax.f32 %v1563_v55, %v1567_v56  ;;  %v1569_v1 = vmax.f32 %v3723_v58, 0.0 }
 0x36c   :  { %v1608_v2 = vmax.f32 %v1564_v59, %v1568_v60 }
 0x36d   :  { %v1628_v3 = vmax.f32 %v1606_v29, %v1607_v61  ;;  %v1609_v32 = vmax.f32 %v1565_v30, %v1569_v1  ;;  %v1483_v4 = vpop.f32.mrb[48].mxu1 }
 0x36e   :  { %v1485_v5 = vpop.f32.mrb[49].mxu1  ;;  %v3724_v33 = vadd.f32 %v1483_v4, %v4808_v24 }
 0x36f   :  { %v1629_v6 = vmax.f32 %v1608_v2, %v1609_v32  ;;  %v1487_v7 = vpop.f32.mrb[50].mxu1  ;;  %v3725_v12 = vadd.f32 %v1485_v5, %v4812_v50 }
 0x370   :  { %v1489_v8 = vpop.f32.mrb[51].mxu1  ;;  %v3726_v15 = vadd.f32 %v1487_v7, %v4808_v24  ;;  %v1570_v37 = vmax.f32 %v3724_v33, 0.0 }
 0x371   :  { %v4899_v9 = vpack.c.bf16 %v1629_v6, %v1628_v3  ;;  %v3727_v22 = vadd.f32 %v1489_v8, %v4812_v50  ;;  %v1571_v62 = vmax.f32 %v3725_v12, 0.0 }
 0x372   :  { %v1572_v25 = vmax.f32 %v3726_v15, 0.0 }
 0x373   :  { %1947 = vmatprep.mubr.bf16.mxu0 %v4899_v9  ;;  %v1573_v14 = vmax.f32 %v3727_v22, 0.0  ;;  %v4000_v22 = vld [vmem:[#allocation10 + $0x10] ss:$8 sps:$4 sm:$0xff]  }
 0x374   :  { %1948 = vmatmul.mubr.bf16.gmra.mrb[52].mxu0 %v4887_v39 }
 0x375   :  { %v1493_v13 = vpop.f32.mrb[52].mxu1 }
 0x376   :  { %v3728_v16 = vadd.f32 %v1493_v13, %v4808_v24  ;;  %v1495_v20 = vpop.f32.mrb[53].mxu1 }
 0x377   :  { %v3729_v23 = vadd.f32 %v1495_v20, %v4812_v50  ;;  %v1497_v10 = vpop.f32.mrb[54].mxu1 }
 0x378   :  { %v1574_v11 = vmax.f32 %v3728_v16, 0.0  ;;  %v3730_v26 = vadd.f32 %v1497_v10, %v4808_v24  ;;  %v1499_v49 = vpop.f32.mrb[55].mxu1  ;;  %v4005_v10 = vld [vmem:[#allocation10 + $0x24] ss:$8 sps:$4 sm:$0xff]  }
 0x379   :  { %v1575_v63 = vmax.f32 %v3729_v23, 0.0  ;;  %v3731_v18 = vadd.f32 %v1499_v49, %v4812_v50  ;;  %v4002_v23 = vld [vmem:[#allocation10 + $0x14] ss:$8 sps:$4 sm:$0xff]   ;;  %v4015_v49 = vld [vmem:[#allocation10 + $0x60] ss:$8 sps:$4 sm:$0xff]  }
 0x37a   :  { %v1610_v34 = vmax.f32 %v1570_v37, %v1574_v11  ;;  %v1576_v35 = vmax.f32 %v3730_v26, 0.0  ;;  %v4012_v37 = vld [vmem:[#allocation10 + $0x50] ss:$8 sps:$4 sm:$0xff]   ;;  %v4014_v11 = vld [vmem:[#allocation10 + $0x54] ss:$8 sps:$4 sm:$0xff]  }
 0x37b   :  { %v1611_v36 = vmax.f32 %v1571_v62, %v1575_v63  ;;  %v1577_v38 = vmax.f32 %v3731_v18, 0.0  ;;  %v4017_v26 = vld [vmem:[#allocation10 + $0x64] ss:$8 sps:$4 sm:$0xff]   ;;  %v4020_v62 = vld [vmem:[#allocation10 + $0x74] ss:$8 sps:$4 sm:$0xff]  }
 0x37c   :  { %v1612_v40 = vmax.f32 %v1572_v25, %v1576_v35  ;;  %v4018_v63 = vld [vmem:[#allocation10 + $0x70] ss:$8 sps:$4 sm:$0xff]   ;;  %v4023_v18 = vld [vmem:[#allocation10 + $0x84] ss:$8 sps:$4 sm:$0xff]   ;;  %v4021_v25 = vld [vmem:[#allocation10 + $0x80] ss:$8 sps:$4 sm:$0xff]  }
 0x37d   :  { %v1630_v41 = vmax.f32 %v1610_v34, %v1611_v36  ;;  %v1613_v43 = vmax.f32 %v1573_v14, %v1577_v38  ;;  %v1503_v44 = vpop.f32.mrb[56].mxu1  ;;  %v4024_v34 = vld [vmem:[#allocation10 + $0x90] ss:$8 sps:$4 sm:$0xff]   ;;  %v4026_v35 = vld [vmem:[#allocation10 + $0x94] ss:$8 sps:$4 sm:$0xff]  }
 0x37e   :  { %v1505_v46 = vpop.f32.mrb[57].mxu1  ;;  %v3732_v53 = vadd.f32 %v1503_v44, %v4808_v24  ;;  %v4029_v14 = vld [vmem:[#allocation10 + $0xa4] ss:$8 sps:$4 sm:$0xff]   ;;  %v4027_v36 = vld [vmem:[#allocation10 + $0xa0] ss:$8 sps:$4 sm:$0xff]  }
 0x37f   :  { %v1631_v47 = vmax.f32 %v1612_v40, %v1613_v43  ;;  %v1507_v48 = vpop.f32.mrb[58].mxu1  ;;  %v3733_v27 = vadd.f32 %v1505_v46, %v4812_v50  ;;  %v4032_v38 = vld [vmem:[#allocation10 + $0xb4] ss:$8 sps:$4 sm:$0xff]   ;;  %v4030_v40 = vld [vmem:[#allocation10 + $0xb0] ss:$8 sps:$4 sm:$0xff]  }
 0x380   :  { %v1509_v51 = vpop.f32.mrb[59].mxu1  ;;  %v3734_v28 = vadd.f32 %v1507_v48, %v4808_v24  ;;  %v1578_v60 = vmax.f32 %v3732_v53, 0.0  ;;  %v4033_v43 = vld [vmem:[#allocation10 + $0xc0] ss:$8 sps:$4 sm:$0xff]   ;;  %v4036_v44 = vld [vmem:[#allocation10 + $0xd0] ss:$8 sps:$4 sm:$0xff]  }
 0x381   :  { %v1640_v52 = vpack.c.bf16 %v1631_v47, %v1630_v41  ;;  %v3735_v58 = vadd.f32 %v1509_v51, %v4812_v50  ;;  %v1579_v2 = vmax.f32 %v3733_v27, 0.0  ;;  %v4035_v41 = vld [vmem:[#allocation10 + $0xc4] ss:$8 sps:$4 sm:$0xff]   ;;  %v4038_v46 = vld [vmem:[#allocation10 + $0xd4] ss:$8 sps:$4 sm:$0xff]  }
 0x382   :  { %v1580_v4 = vmax.f32 %v3734_v28, 0.0  ;;  %v4041_v47 = vld [vmem:[#allocation10 + $0xe4] ss:$8 sps:$4 sm:$0xff]   ;;  %v4039_v48 = vld [vmem:[#allocation10 + $0xe0] ss:$8 sps:$4 sm:$0xff]  }
 0x383   :  { %1955 = vmatprep.mubr.bf16.mxu0 %v1640_v52  ;;  %v1581_v7 = vmax.f32 %v3735_v58, 0.0  ;;  %v4044_v51 = vld [vmem:[#allocation10 + $0xf4] ss:$8 sps:$4 sm:$0xff]   ;;  %v4047_v58 = vld [vmem:[#allocation10 + $0x104] ss:$8 sps:$4 sm:$0xff]  }
 0x384   :  { %1956 = vmatmul.mubr.bf16.gmra.mrb[56].mxu0 %v4899_v9 }
 0x385   :  { %v1513_v54 = vpop.f32.mrb[60].mxu1 }
 0x386   :  { %v3736_v55 = vadd.f32 %v1513_v54, %v4808_v24  ;;  %v1515_v56 = vpop.f32.mrb[61].mxu1 }
 0x387   :  { %v3737_v59 = vadd.f32 %v1515_v56, %v4812_v50  ;;  %v1517_v29 = vpop.f32.mrb[62].mxu1 }
 0x388   :  { %v1582_v30 = vmax.f32 %v3736_v55, 0.0  ;;  %v3738_v61 = vadd.f32 %v1517_v29, %v4808_v24  ;;  %v1519_v1 = vpop.f32.mrb[63].mxu1  ;;  %v3999_v24 = vld [vmem:[#allocation10 + $0x4] ss:$8 sps:$4 sm:$0xff]  }
 0x389   :  { %v1583_v3 = vmax.f32 %v3737_v59, 0.0  ;;  %v3739_v32 = vadd.f32 %v1519_v1, %v4812_v50  ;;  %v3997_v50 = vld [vmem:[#allocation10] ss:$8 sps:$4 sm:$0xff]   ;;  %2427 = vmatprep.subr.bf16.mxu0 %v3999_v24 }
 0x38a   :  { %v1614_v5 = vmax.f32 %v1578_v60, %v1582_v30  ;;  %v1584_v6 = vmax.f32 %v3738_v61, 0.0 }
 0x38b   :  { %v1615_v8 = vmax.f32 %v1579_v2, %v1583_v3  ;;  %v1585_v33 = vmax.f32 %v3739_v32, 0.0 }
 0x38c   :  { %v1616_v12 = vmax.f32 %v1580_v4, %v1584_v6 }
 0x38d   :  { %v1632_v13 = vmax.f32 %v1614_v5, %v1615_v8  ;;  %v1617_v15 = vmax.f32 %v1581_v7, %v1585_v33 }
 0x38f   :  { %v1633_v16 = vmax.f32 %v1616_v12, %v1617_v15 }
 0x391   :  { %v1641_v20 = vpack.c.bf16 %v1633_v16, %v1632_v13 }
 0x393   :  { %1963 = vmatprep.mubr.bf16.mxu0 %v1641_v20 }
 0x394   :  { %1964 = vmatmul.mubr.bf16.gmra.mrb[60].mxu0 %v1640_v52 }
 0x395   :  { %3640 = vmatprep.mubr.bf16.mxu0 %v4843_v57  ;;  %v4003_v57 = vld [vmem:[#allocation10 + $0x20] ss:$8 sps:$4 sm:$0xff]  }
 0x39c   :  { %3641 = vmatmul.mubr.bf16.vlgmr.msra.gmra.mrb[64].mxu0 %v4863_v19  ;;  %v4008_v19 = vld [vmem:[#allocation10 + $0x34] ss:$8 sps:$4 sm:$0xff]  }
 0x39d   :  { %3644 = vmatprep.mubr.bf16.mxu0 %v4875_v31  ;;  %2428 = vmatpush1.bf16.msra.mxu0 %v3997_v50  ;;  %v4006_v31 = vld [vmem:[#allocation10 + $0x30] ss:$8 sps:$4 sm:$0xff]  }
 0x39e   :  { %2429 = vmatprep.subr.bf16.mxu0 %v4002_v23 }
 0x3a1   :  { %2430 = vmatpush1.bf16.msra.mxu0 %v4000_v22 }
 0x3a2   :  { %2431 = vmatprep.subr.bf16.mxu0 %v4005_v10 }
 0x3a4   :  { %3645 = vmatmul.mubr.bf16.gmra.mrb[68].mxu0 %v4887_v39  ;;  %v4011_v39 = vld [vmem:[#allocation10 + $0x44] ss:$8 sps:$4 sm:$0xff]  }
 0x3a5   :  { %3648 = vmatprep.mubr.bf16.mxu0 %v4899_v9  ;;  %2432 = vmatpush1.bf16.msra.mxu0 %v4003_v57  ;;  %v4009_v9 = vld [vmem:[#allocation10 + $0x40] ss:$8 sps:$4 sm:$0xff]  }
 0x3a6   :  { %2433 = vmatprep.subr.bf16.mxu0 %v4008_v19 }
 0x3a9   :  { %2434 = vmatpush1.bf16.msra.mxu0 %v4006_v31 }
 0x3aa   :  { %2435 = vmatprep.subr.bf16.mxu0 %v4011_v39 }
 0x3ac   :  { %3649 = vmatmul.mubr.bf16.gmra.mrb[72].mxu0 %v1640_v52  ;;  %v4042_v52 = vld [vmem:[#allocation10 + $0xf0] ss:$8 sps:$4 sm:$0xff]  }
 0x3ad   :  { %3652 = vmatprep.mubr.bf16.mxu0 %v1641_v20  ;;  %2436 = vmatpush1.bf16.msra.mxu0 %v4009_v9 }
 0x3ae   :  { %2437 = vmatprep.subr.bf16.mxu0 %v4014_v11 }
 0x3b1   :  { %2438 = vmatpush1.bf16.msra.mxu0 %v4012_v37 }
 0x3b2   :  { %2439 = vmatprep.subr.bf16.mxu0 %v4017_v26 }
 0x3b4   :  { %3653 = vmatmul.mubr.bf16.gmra.mrb[76].mxu0 %v4246_v0 }
 0x3b5   :  { %2440 = vmatpush1.bf16.msra.mxu0 %v4015_v49 }
 0x3b6   :  { %2441 = vmatprep.subr.bf16.mxu0 %v4020_v62 }
 0x3b9   :  { %2442 = vmatpush1.bf16.msra.mxu0 %v4018_v63 }
 0x3ba   :  { %2443 = vmatprep.subr.bf16.mxu0 %v4023_v18 }
 0x3bd   :  { %2444 = vmatpush1.bf16.msra.mxu0 %v4021_v25 }
 0x3be   :  { %2445 = vmatprep.subr.bf16.mxu0 %v4026_v35 }
 0x3c1   :  { %2446 = vmatpush1.bf16.msra.mxu0 %v4024_v34 }
 0x3c2   :  { %2447 = vmatprep.subr.bf16.mxu0 %v4029_v14 }
 0x3c5   :  { %2448 = vmatpush1.bf16.msra.mxu0 %v4027_v36 }
 0x3c6   :  { %2449 = vmatprep.subr.bf16.mxu0 %v4032_v38  ;;  %v4949_v38 = vld [vmem:[%s5087_s6] ss:$0 sm:$0xff] }
 0x3c9   :  { %2450 = vmatpush1.bf16.msra.mxu0 %v4030_v40 }
 0x3ca   :  { %2451 = vmatprep.subr.bf16.mxu0 %v4035_v41 }
 0x3cd   :  { %2452 = vmatpush1.bf16.msra.mxu0 %v4033_v43 }
 0x3ce   :  { %2453 = vmatprep.subr.bf16.mxu0 %v4038_v46 }
 0x3d1   :  { %2454 = vmatpush1.bf16.msra.mxu0 %v4036_v44 }
 0x3d2   :  { %2455 = vmatprep.subr.bf16.mxu0 %v4041_v47 }
 0x3d5   :  { %2456 = vmatpush1.bf16.msra.mxu0 %v4039_v48 }
 0x3d6   :  { %2457 = vmatprep.subr.bf16.mxu0 %v4044_v51 }
 0x3d9   :  { %2458 = vmatpush1.bf16.msra.mxu0 %v4042_v52 }
 0x3da   :  { %2540 = vmatprep.subr.bf16.mxu0 %v4047_v58  ;;  %v4071_v58 = vld [vmem:[#allocation11 + $0x48] sm:$0xff]  }
 0x3f7   :  { %v3469_v53 = vpop.f32.mrb[32].mxu0 }
 0x3f8   :  { %v3470_v27 = vpop.f32.mrb[33].mxu0 }
 0x3f9   :  { %v3471_v54 = vadd.f32 %v3470_v27, %v3469_v53  ;;  %v3472_v28 = vpop.f32.mrb[34].mxu0 }
 0x3fa   :  { %v3473_v55 = vpop.f32.mrb[35].mxu0 }
 0x3fb   :  { %v3474_v56 = vadd.f32 %v3473_v55, %v3472_v28  ;;  %v1910_v43 = vadd.f32 %v3471_v54, %v4949_v38  ;;  %v4069_v28 = vld [vmem:[#allocation11 + $0x40] sm:$0xff]   ;;  %v4072_v54 = vld [vmem:[#allocation11 + $0x8] sm:$0xff]  }
 0x3fc   :  { %v4070_v55 = vld [vmem:[#allocation11] sm:$0xff]   ;;  %3533 = vmatprep.subr.bf16.mxu1 %v4069_v28 }
 0x3fd   :  { %v1913_v52 = vadd.f32 %v3474_v56, %v4949_v38  ;;  %3534 = vmatpush3.bf16.msra.mxu1 %v4070_v55 }
 0x3fe   :  { %3535 = vmatprep.subr.bf16.mxu1 %v4071_v58 }
 0x401   :  { %3536 = vmatpush3.bf16.msra.mxu1 %v4072_v54  ;;  %v4057_v54 = vld [vmem:[#allocation10 + $0x140] ss:$8 sps:$4 sm:$0xff]  }
 0x407   :  { %v3475_v59 = vpop.f32.mrb[36].mxu0 }
 0x408   :  { %v3476_v29 = vpop.f32.mrb[37].mxu0 }
 0x409   :  { %v3477_v60 = vadd.f32 %v3476_v29, %v3475_v59  ;;  %v3478_v30 = vpop.f32.mrb[38].mxu0 }
 0x40a   :  { %v3479_v61 = vpop.f32.mrb[39].mxu0 }
 0x40b   :  { %v3480_v1 = vadd.f32 %v3479_v61, %v3478_v30  ;;  %v1918_v40 = vadd.f32 %v3477_v60, %v4949_v38 }
 0x40d   :  { %v1921_v47 = vadd.f32 %v3480_v1, %v4949_v38 }
 0x417   :  { %v3481_v2 = vpop.f32.mrb[40].mxu0 }
 0x418   :  { %v3482_v3 = vpop.f32.mrb[41].mxu0 }
 0x419   :  { %v4926_v32 = vadd.f32 %v3482_v3, %v3481_v2  ;;  %v3484_v4 = vpop.f32.mrb[42].mxu0  ;;  %v4073_v3 = vld [vmem:[#allocation11 + $0x50] sm:$0xff]  }
 0x41a   :  { %v3485_v5 = vpop.f32.mrb[43].mxu0  ;;  %3537 = vmatprep.subr.bf16.mxu1 %v4073_v3 }
 0x41b   :  { %v4928_v6 = vadd.f32 %v3485_v5, %v3484_v4  ;;  %v1926_v5 = vadd.f32 %v4926_v32, %v4949_v38  ;;  %v4075_v32 = vld [vmem:[#allocation11 + $0x58] sm:$0xff]  }
 0x427   :  { %v3487_v7 = vpop.f32.mrb[44].mxu0 }
 0x428   :  { %v3488_v8 = vpop.f32.mrb[45].mxu0 }
 0x429   :  { %v3489_v33 = vadd.f32 %v3488_v8, %v3487_v7  ;;  %v3490_v12 = vpop.f32.mrb[46].mxu0  ;;  %v4045_v7 = vld [vmem:[#allocation10 + $0x100] ss:$8 sps:$4 sm:$0xff]  }
 0x42a   :  { %v3491_v13 = vpop.f32.mrb[47].mxu0 }
 0x42b   :  { %v3492_v15 = vadd.f32 %v3491_v13, %v3490_v12  ;;  %v1934_v1 = vadd.f32 %v3489_v33, %v4949_v38  ;;  %v4074_v33 = vld [vmem:[#allocation11 + $0x10] sm:$0xff]  }
 0x42c   :  { %3538 = vmatpush3.bf16.msra.mxu1 %v4074_v33 }
 0x42d   :  { %v1937_v13 = vadd.f32 %v3492_v15, %v4949_v38  ;;  %v4048_v15 = vld [vmem:[#allocation10 + $0x110] ss:$8 sps:$4 sm:$0xff]   ;;  %3539 = vmatprep.subr.bf16.mxu1 %v4075_v32  ;;  %v4078_v32 = vld [vmem:[#allocation11 + $0x20] sm:$0xff]  }
 0x437   :  { %v3493_v16 = vpop.f32.mrb[48].mxu0 }
 0x438   :  { %v3494_v20 = vpop.f32.mrb[49].mxu0 }
 0x439   :  { %v4930_v24 = vadd.f32 %v3494_v20, %v3493_v16  ;;  %v3496_v50 = vpop.f32.mrb[50].mxu0  ;;  %v4050_v16 = vld [vmem:[#allocation10 + $0x114] ss:$8 sps:$4 sm:$0xff]  }
 0x43a   :  { %v3497_v22 = vpop.f32.mrb[51].mxu0 }
 0x43b   :  { %v4932_v23 = vadd.f32 %v3497_v22, %v3496_v50  ;;  %v1929_v22 = vadd.f32 %v4928_v6, %v4949_v38  ;;  %v4076_v6 = vld [vmem:[#allocation11 + $0x18] sm:$0xff]  }
 0x43c   :  { %3540 = vmatpush3.bf16.msra.mxu1 %v4076_v6  ;;  %v4086_v6 = vld [vmem:[#allocation11 + $0x90] sm:$0xff]  }
 0x447   :  { %v3499_v10 = vpop.f32.mrb[52].mxu0 }
 0x448   :  { %v3500_v57 = vpop.f32.mrb[53].mxu0 }
 0x449   :  { %v4934_v19 = vadd.f32 %v3500_v57, %v3499_v10  ;;  %v3502_v31 = vpop.f32.mrb[54].mxu0 }
 0x44a   :  { %v3503_v39 = vpop.f32.mrb[55].mxu0 }
 0x44b   :  { %v4936_v9 = vadd.f32 %v3503_v39, %v3502_v31 }
 0x457   :  { %v3505_v37 = vpop.f32.mrb[56].mxu0 }
 0x458   :  { %v3506_v11 = vpop.f32.mrb[57].mxu0 }
 0x459   :  { %v4938_v26 = vadd.f32 %v3506_v11, %v3505_v37  ;;  %v3508_v49 = vpop.f32.mrb[58].mxu0  ;;  %v4053_v11 = vld [vmem:[#allocation10 + $0x124] ss:$8 sps:$4 sm:$0xff]  }
 0x45a   :  { %v3509_v62 = vpop.f32.mrb[59].mxu0 }
 0x45b   :  { %v4940_v63 = vadd.f32 %v3509_v62, %v3508_v49 }
 0x467   :  { %v3511_v18 = vpop.f32.mrb[60].mxu0 }
 0x468   :  { %v3512_v25 = vpop.f32.mrb[61].mxu0 }
 0x469   :  { %v4942_v34 = vadd.f32 %v3512_v25, %v3511_v18  ;;  %v3514_v35 = vpop.f32.mrb[62].mxu0  ;;  %v1950_v25 = vadd.f32 %v4934_v19, %v4949_v38  ;;  %v1945_v19 = vadd.f32 %v4932_v23, %v4949_v38 }
 0x46a   :  { %v3515_v14 = vpop.f32.mrb[63].mxu0 }
 0x46b   :  { %v4944_v36 = vadd.f32 %v3515_v14, %v3514_v35 }
 0x46f   :  { %v3642_v41 = vpop.f32.mrb[64].mxu0 }
 0x470   :  { %v2015_v44 = vadd.f32 %v3642_v41, %v1918_v40  ;;  %v2006_v46 = vpop.f32.mrb[65].mxu0  ;;  %v1942_v40 = vadd.f32 %v4930_v24, %v4949_v38  ;;  %v4051_v41 = vld [vmem:[#allocation10 + $0x120] ss:$8 sps:$4 sm:$0xff]   ;;  %v4054_v24 = vld [vmem:[#allocation10 + $0x130] ss:$8 sps:$4 sm:$0xff]  }
 0x471   :  { %v2007_v48 = vadd.f32 %v2006_v46, %v1910_v43  ;;  %v3643_v51 = vpop.f32.mrb[66].mxu0  ;;  %v1953_v46 = vadd.f32 %v4936_v9, %v4949_v38  ;;  %v4059_v9 = vld [vmem:[#allocation10 + $0x144] ss:$8 sps:$4 sm:$0xff]  }
 0x472   :  { %v2018_v53 = vadd.f32 %v3643_v51, %v1921_v47  ;;  %v2009_v27 = vpop.f32.mrb[67].mxu0  ;;  %v2071_v29 = vmax.f32 %v2015_v44, 0.0  ;;  %v4056_v47 = vld [vmem:[#allocation10 + $0x134] ss:$8 sps:$4 sm:$0xff]  }
 0x473   :  { %v2010_v59 = vadd.f32 %v2009_v27, %v1913_v52  ;;  %v2069_v60 = vmax.f32 %v2007_v48, 0.0 }
 0x474   :  { %v2072_v30 = vmax.f32 %v2018_v53, 0.0 }
 0x475   :  { %v2070_v61 = vmax.f32 %v2010_v59, 0.0 }
 0x476   :  { %v4955_v2 = vpack.c.bf16 %v2072_v30, %v2071_v29  ;;  %v1966_v30 = vadd.f32 %v4942_v34, %v4949_v38 }
 0x477   :  { %v2085_v56 = vpack.c.bf16 %v2070_v61, %v2069_v60  ;;  %v3646_v4 = vpop.f32.mrb[68].mxu0  ;;  %v1958_v61 = vadd.f32 %v4938_v26, %v4949_v38  ;;  %v4060_v26 = vld [vmem:[#allocation10 + $0x150] ss:$8 sps:$4 sm:$0xff]  }
 0x478   :  { %v2031_v8 = vadd.f32 %v3646_v4, %v1934_v1  ;;  %v2022_v12 = vpop.f32.mrb[69].mxu0  ;;  %v4062_v4 = vld [vmem:[#allocation10 + $0x154] ss:$8 sps:$4 sm:$0xff]  }
 0x479   :  { %v2023_v20 = vadd.f32 %v2022_v12, %v1926_v5  ;;  %v3647_v50 = vpop.f32.mrb[70].mxu0  ;;  %2459 = vmatprep.mubr.bf16.mxu0 %v2085_v56 }
 0x47a   :  { %v2034_v10 = vadd.f32 %v3647_v50, %v1937_v13  ;;  %v2025_v57 = vpop.f32.mrb[71].mxu0  ;;  %2460 = vmatmul.mubr.bf16.vlgmr.msra.gmra.mrb[80].mxu0 %v4246_v0  ;;  %v2075_v39 = vmax.f32 %v2031_v8, 0.0  ;;  %v1961_v8 = vadd.f32 %v4940_v63, %v4949_v38  ;;  %v4068_v63 = vld [vmem:[#allocation10 + $0x174] ss:$8 sps:$4 sm:$0xff]  }
 0x47b   :  { %v2026_v31 = vadd.f32 %v2025_v57, %v1929_v22  ;;  %2541 = vmatpush1.bf16.msra.mxu0 %v4045_v7  ;;  %2469 = vmatprep.mubr.bf16.mxu0 %v4955_v2  ;;  %v2073_v49 = vmax.f32 %v2023_v20, 0.0  ;;  %v4063_v57 = vld [vmem:[#allocation10 + $0x160] ss:$8 sps:$4 sm:$0xff]  }
 0x47c   :  { %v2076_v37 = vmax.f32 %v2034_v10, 0.0  ;;  %2542 = vmatprep.subr.bf16.mxu0 %v4050_v16 }
 0x47d   :  { %v2074_v62 = vmax.f32 %v2026_v31, 0.0  ;;  %v4079_v31 = vld [vmem:[#allocation11 + $0xc0] sm:$0xff]  }
 0x47e   :  { %v4965_v18 = vpack.c.bf16 %v2076_v37, %v2075_v39  ;;  %v4081_v39 = vld [vmem:[#allocation11 + $0xc8] sm:$0xff]  }
 0x47f   :  { %v4969_v35 = vpack.c.bf16 %v2074_v62, %v2073_v49  ;;  %v3650_v14 = vpop.f32.mrb[72].mxu0  ;;  %2543 = vmatpush1.bf16.msra.mxu0 %v4048_v15  ;;  %v4080_v15 = vld [vmem:[#allocation11 + $0x80] sm:$0xff]   ;;  %v4082_v37 = vld [vmem:[#allocation11 + $0x88] sm:$0xff]   ;;  %v4085_v62 = vld [vmem:[#allocation11 + $0xd0] sm:$0xff]  }
 0x480   :  { %v2047_v43 = vadd.f32 %v3650_v14, %v1950_v25  ;;  %v2038_v44 = vpop.f32.mrb[73].mxu0  ;;  %2544 = vmatprep.subr.bf16.mxu0 %v4053_v11  ;;  %v4083_v11 = vld [vmem:[#allocation11 + $0x68] sm:$0xff]   ;;  %v4091_v25 = vld [vmem:[#allocation11 + $0x78] sm:$0xff]  }
 0x481   :  { %v2039_v48 = vadd.f32 %v2038_v44, %v1942_v40  ;;  %v3651_v51 = vpop.f32.mrb[74].mxu0  ;;  %v4084_v49 = vld [vmem:[#allocation11 + $0x28] sm:$0xff]   ;;  %v4089_v14 = vld [vmem:[#allocation11 + $0x98] sm:$0xff]  }
 0x482   :  { %v2050_v52 = vadd.f32 %v3651_v51, %v1953_v46  ;;  %v2041_v53 = vpop.f32.mrb[75].mxu0  ;;  %2470 = vmatmul.mubr.bf16.gmra.mrb[84].mxu0 %v2085_v56  ;;  %v2079_v28 = vmax.f32 %v2047_v43, 0.0  ;;  %v1969_v56 = vadd.f32 %v4944_v36, %v4949_v38  ;;  %v4065_v36 = vld [vmem:[#allocation10 + $0x164] ss:$8 sps:$4 sm:$0xff]   ;;  %v4066_v38 = vld [vmem:[#allocation10 + $0x170] ss:$8 sps:$4 sm:$0xff]  }
 0x483   :  { %v2042_v27 = vadd.f32 %v2041_v53, %v1945_v19  ;;  %2479 = vmatprep.mubr.bf16.mxu0 %v4969_v35  ;;  %2545 = vmatpush1.bf16.msra.mxu0 %v4051_v41  ;;  %v2077_v58 = vmax.f32 %v2039_v48, 0.0  ;;  %v4092_v40 = vld [vmem:[#allocation11 + $0x38] sm:$0xff]   ;;  %v4093_v41 = vld [vmem:[#allocation11 + $0xe0] sm:$0xff]   ;;  %v4095_v44 = vld [vmem:[#allocation11 + $0xe8] sm:$0xff]  }
 0x484   :  { %v2080_v55 = vmax.f32 %v2050_v52, 0.0  ;;  %2546 = vmatprep.subr.bf16.mxu0 %v4056_v47  ;;  %v4094_v43 = vld [vmem:[#allocation11 + $0xa0] sm:$0xff]   ;;  %v4096_v46 = vld [vmem:[#allocation11 + $0xa8] sm:$0xff]   ;;  %v4097_v47 = vld [vmem:[#allocation11 + $0xf0] sm:$0xff]  }
 0x485   :  { %v2078_v59 = vmax.f32 %v2042_v27, 0.0  ;;  %v4098_v48 = vld [vmem:[#allocation11 + $0xb0] sm:$0xff]   ;;  %v4099_v51 = vld [vmem:[#allocation11 + $0xf8] sm:$0xff]  }
 0x486   :  { %v2090_v29 = vpack.c.bf16 %v2080_v55, %v2079_v28  ;;  %v4100_v19 = vld [vmem:[#allocation11 + $0xb8] sm:$0xff]  }
 0x487   :  { %v2089_v23 = vpack.c.bf16 %v2078_v59, %v2077_v58  ;;  %v3654_v60 = vpop.f32.mrb[76].mxu0  ;;  %2547 = vmatpush1.bf16.msra.mxu0 %v4054_v24  ;;  %v2175_v52 = vld [vmem:[%s5089_s8] sm:$0x3] }
 0x488   :  { %v2063_v1 = vadd.f32 %v3654_v60, %v1966_v30  ;;  %v2054_v3 = vpop.f32.mrb[77].mxu0  ;;  %2548 = vmatprep.subr.bf16.mxu0 %v4059_v9  ;;  %v5007_v28 = vrot.slane %v2175_v52, %v888_v21  ;;  %v5011_v9 = vrot.slane %v2175_v52, %v892_v45 }
 0x489   :  { %v2055_v5 = vadd.f32 %v2054_v3, %v1958_v61  ;;  %v3655_v7 = vpop.f32.mrb[78].mxu0 }
 0x48a   :  { %v2066_v34 = vadd.f32 %v3655_v7, %v1969_v56  ;;  %v2057_v12 = vpop.f32.mrb[79].mxu0  ;;  %2480 = vmatmul.mubr.bf16.gmra.mrb[88].mxu0 %v4955_v2  ;;  %v2083_v16 = vmax.f32 %v2063_v1, 0.0 }
 0x48b   :  { %v2058_v13 = vadd.f32 %v2057_v12, %v1961_v8  ;;  %2489 = vmatprep.mubr.bf16.mxu0 %v4965_v18  ;;  %2549 = vmatpush1.bf16.msra.mxu0 %v4057_v54  ;;  %v2081_v50 = vmax.f32 %v2055_v5, 0.0 }
 0x48c   :  { %v2084_v20 = vmax.f32 %v2066_v34, 0.0  ;;  %2550 = vmatprep.subr.bf16.mxu0 %v4062_v4 }
 0x48d   :  { %v2082_v22 = vmax.f32 %v2058_v13, 0.0 }
 0x48e   :  { %v2092_v33 = vpack.c.bf16 %v2084_v20, %v2083_v16 }
 0x48f   :  { %v2091_v10 = vpack.c.bf16 %v2082_v22, %v2081_v50  ;;  %2551 = vmatpush1.bf16.msra.mxu0 %v4060_v26 }
 0x490   :  { %2552 = vmatprep.subr.bf16.mxu0 %v4065_v36 }
 0x492   :  { %2490 = vmatmul.mubr.bf16.gmra.mrb[92].mxu0 %v4969_v35 }
 0x493   :  { %2499 = vmatprep.mubr.bf16.mxu0 %v2089_v23  ;;  %2553 = vmatpush1.bf16.msra.mxu0 %v4063_v57 }
 0x494   :  { %2554 = vmatprep.subr.bf16.mxu0 %v4068_v63 }
 0x497   :  { %2555 = vmatpush1.bf16.msra.mxu0 %v4066_v38 }
 0x498   :  { %3555 = vmatprep.subr.bf16.mxu0 %v4079_v31 }
 0x49a   :  { %2500 = vmatmul.mubr.bf16.gmra.mrb[96].mxu0 %v4965_v18 }
 0x49b   :  { %2509 = vmatprep.mubr.bf16.mxu0 %v2090_v29 }
 0x4a2   :  { %2510 = vmatmul.mubr.bf16.gmra.mrb[100].mxu0 %v2089_v23 }
 0x4a3   :  { %2519 = vmatprep.mubr.bf16.mxu0 %v2091_v10 }
 0x4aa   :  { %2520 = vmatmul.mubr.bf16.gmra.mrb[104].mxu0 %v2090_v29 }
 0x4ab   :  { %2529 = vmatprep.mubr.bf16.mxu0 %v2092_v33 }
 0x4b2   :  { %2530 = vmatmul.mubr.bf16.gmra.mrb[108].mxu0 %v2091_v10 }
 0x4b3   :  { %2572 = vmatprep.mubr.bf16.mxu0 %v4246_v0 }
 0x4ba   :  { %2573 = vmatmul.mubr.bf16.vlgmr.msra.gmra.mrb[80].mxu0 %v4955_v2  ;;  %v4077_v2 = vld [vmem:[#allocation11 + $0x60] sm:$0xff]  }
 0x4bb   :  { %2582 = vmatprep.mubr.bf16.mxu0 %v4246_v0  ;;  %3541 = vmatprep.subr.bf16.mxu1 %v4077_v2 }
 0x4bc   :  { %3542 = vmatpush3.bf16.msra.mxu1 %v4078_v32  ;;  %3556 = vmatpush3.bf16.msra.mxu0 %v4080_v15 }
 0x4bd   :  { %3557 = vmatprep.subr.bf16.mxu0 %v4081_v39  ;;  %3543 = vmatprep.subr.bf16.mxu1 %v4083_v11 }
 0x4c0   :  { %3558 = vmatpush3.bf16.msra.mxu0 %v4082_v37  ;;  %3544 = vmatpush3.bf16.msra.mxu1 %v4084_v49 }
 0x4c1   :  { %3559 = vmatprep.subr.bf16.mxu0 %v4085_v62 }
 0x4c2   :  { %2583 = vmatmul.mubr.bf16.gmra.mrb[84].mxu0 %v4969_v35  ;;  %v4087_v35 = vld [vmem:[#allocation11 + $0xd8] sm:$0xff]  }
 0x4c3   :  { %2592 = vmatprep.mubr.bf16.mxu0 %v4246_v0 }
 0x4c4   :  { %3560 = vmatpush3.bf16.msra.mxu0 %v4086_v6 }
 0x4c5   :  { %3561 = vmatprep.subr.bf16.mxu0 %v4087_v35 }
 0x4c8   :  { %3562 = vmatpush3.bf16.msra.mxu0 %v4089_v14 }
 0x4c9   :  { %3563 = vmatprep.subr.bf16.mxu0 %v4093_v41 }
 0x4ca   :  { %2593 = vmatmul.mubr.bf16.gmra.mrb[88].mxu0 %v4965_v18  ;;  %v4090_v18 = vld [vmem:[#allocation11 + $0x30] sm:$0xff]  }
 0x4cb   :  { %2602 = vmatprep.mubr.bf16.mxu0 %v4246_v0 }
 0x4cc   :  { %3564 = vmatpush3.bf16.msra.mxu0 %v4094_v43 }
 0x4cd   :  { %3565 = vmatprep.subr.bf16.mxu0 %v4095_v44 }
 0x4d0   :  { %3566 = vmatpush3.bf16.msra.mxu0 %v4096_v46 }
 0x4d1   :  { %3567 = vmatprep.subr.bf16.mxu0 %v4097_v47 }
 0x4d2   :  { %2603 = vmatmul.mubr.bf16.gmra.mrb[92].mxu0 %v2089_v23 }
 0x4d3   :  { %2612 = vmatprep.mubr.bf16.mxu0 %v4246_v0 }
 0x4d4   :  { %3568 = vmatpush3.bf16.msra.mxu0 %v4098_v48 }
 0x4d5   :  { %3569 = vmatprep.subr.bf16.mxu0 %v4099_v51 }
 0x4d8   :  { %3570 = vmatpush3.bf16.msra.mxu0 %v4100_v19 }
 0x4da   :  { %2613 = vmatmul.mubr.bf16.gmra.mrb[96].mxu0 %v2090_v29 }
 0x4db   :  { %2622 = vmatprep.mubr.bf16.mxu0 %v4246_v0 }
 0x4e2   :  { %2623 = vmatmul.mubr.bf16.gmra.mrb[100].mxu0 %v2091_v10 }
 0x4e3   :  { %2632 = vmatprep.mubr.bf16.mxu0 %v4246_v0 }
 0x4ea   :  { %2633 = vmatmul.mubr.bf16.gmra.mrb[104].mxu0 %v2092_v33 }
 0x4eb   :  { %2642 = vmatprep.mubr.bf16.mxu0 %v4246_v0 }
 0x4f2   :  { %2643 = vmatmul.mubr.bf16.gmra.mrb[108].mxu0 %v4246_v0  ;;  %v4088_v0 = vld [vmem:[#allocation11 + $0x70] sm:$0xff]  }
 0x4f3   :  { %3545 = vmatprep.subr.bf16.mxu1 %v4088_v0 }
 0x4f4   :  { %3546 = vmatpush3.bf16.msra.mxu1 %v4090_v18 }
 0x4f5   :  { %3547 = vmatprep.subr.bf16.mxu1 %v4091_v25 }
 0x4f8   :  { %3548 = vmatpush3.bf16.msra.mxu1 %v4092_v40 }
 0x58d   :  { %v2574_v53 = vpop.f32.mrb[80].mxu0 }
 0x58e   :  { %v2576_v27 = vpop.f32.mrb[81].mxu0  ;;  %v3740_v58 = vadd.f32 %v2574_v53, %v5007_v28 }
 0x58f   :  { %v2578_v24 = vpop.f32.mrb[82].mxu0  ;;  %v3741_v59 = vadd.f32 %v2576_v27, %v5011_v9 }
 0x590   :  { %v2580_v55 = vpop.f32.mrb[83].mxu0  ;;  %v3742_v30 = vadd.f32 %v2578_v24, %v5007_v28  ;;  %v2653_v1 = vmax.f32 %v3740_v58, 0.0 }
 0x591   :  { %v3743_v61 = vadd.f32 %v2580_v55, %v5011_v9  ;;  %v2654_v56 = vmax.f32 %v3741_v59, 0.0 }
 0x592   :  { %v2655_v7 = vmax.f32 %v3742_v30, 0.0 }
 0x593   :  { %v2656_v12 = vmax.f32 %v3743_v61, 0.0 }
 0x595   :  { %v2584_v29 = vpop.f32.mrb[84].mxu0 }
 0x596   :  { %v3744_v23 = vadd.f32 %v2584_v29, %v5007_v28  ;;  %v2586_v60 = vpop.f32.mrb[85].mxu0 }
 0x597   :  { %v3745_v21 = vadd.f32 %v2586_v60, %v5011_v9  ;;  %v2588_v54 = vpop.f32.mrb[86].mxu0 }
 0x598   :  { %v2657_v3 = vmax.f32 %v3744_v23, 0.0  ;;  %v3746_v42 = vadd.f32 %v2588_v54, %v5007_v28  ;;  %v2590_v45 = vpop.f32.mrb[87].mxu0 }
 0x599   :  { %v2658_v4 = vmax.f32 %v3745_v21, 0.0  ;;  %v3747_v5 = vadd.f32 %v2590_v45, %v5011_v9 }
 0x59a   :  { %v2685_v8 = vmax.f32 %v2653_v1, %v2657_v3  ;;  %v2659_v34 = vmax.f32 %v3746_v42, 0.0 }
 0x59b   :  { %v2686_v13 = vmax.f32 %v2654_v56, %v2658_v4  ;;  %v2660_v26 = vmax.f32 %v3747_v5, 0.0 }
 0x59c   :  { %v2687_v16 = vmax.f32 %v2655_v7, %v2659_v34 }
 0x59d   :  { %v2701_v20 = vmax.f32 %v2685_v8, %v2686_v13  ;;  %v2688_v36 = vmax.f32 %v2656_v12, %v2660_v26  ;;  %v2594_v50 = vpop.f32.mrb[88].mxu0 }
 0x59e   :  { %v2596_v22 = vpop.f32.mrb[89].mxu0  ;;  %v3748_v38 = vadd.f32 %v2594_v50, %v5007_v28 }
 0x59f   :  { %v2702_v33 = vmax.f32 %v2687_v16, %v2688_v36  ;;  %v2598_v10 = vpop.f32.mrb[90].mxu0  ;;  %v3749_v2 = vadd.f32 %v2596_v22, %v5011_v9 }
 0x5a0   :  { %v2600_v57 = vpop.f32.mrb[91].mxu0  ;;  %v3750_v31 = vadd.f32 %v2598_v10, %v5007_v28  ;;  %v2661_v62 = vmax.f32 %v3748_v38, 0.0 }
 0x5a1   :  { %v2709_v63 = vpack.c.bf16 %v2702_v33, %v2701_v20  ;;  %v3751_v37 = vadd.f32 %v2600_v57, %v5011_v9  ;;  %v2662_v25 = vmax.f32 %v3749_v2, 0.0 }
 0x5a2   :  { %v2663_v40 = vmax.f32 %v3750_v31, 0.0 }
 0x5a3   :  { %v2664_v44 = vmax.f32 %v3751_v37, 0.0 }
 0x5a5   :  { %v2604_v32 = vpop.f32.mrb[92].mxu0 }
 0x5a6   :  { %v3752_v15 = vadd.f32 %v2604_v32, %v5007_v28  ;;  %v2606_v39 = vpop.f32.mrb[93].mxu0 }
 0x5a7   :  { %v3753_v11 = vadd.f32 %v2606_v39, %v5011_v9  ;;  %v2608_v49 = vpop.f32.mrb[94].mxu0 }
 0x5a8   :  { %v2665_v6 = vmax.f32 %v3752_v15, 0.0  ;;  %v3754_v0 = vadd.f32 %v2608_v49, %v5007_v28  ;;  %v2610_v18 = vpop.f32.mrb[95].mxu0 }
 0x5a9   :  { %v2666_v35 = vmax.f32 %v3753_v11, 0.0  ;;  %v3755_v14 = vadd.f32 %v2610_v18, %v5011_v9 }
 0x5aa   :  { %v2689_v41 = vmax.f32 %v2661_v62, %v2665_v6  ;;  %v2667_v43 = vmax.f32 %v3754_v0, 0.0 }
 0x5ab   :  { %v2690_v46 = vmax.f32 %v2662_v25, %v2666_v35  ;;  %v2668_v47 = vmax.f32 %v3755_v14, 0.0 }
 0x5ac   :  { %v2691_v48 = vmax.f32 %v2663_v40, %v2667_v43 }
 0x5ad   :  { %v2703_v51 = vmax.f32 %v2689_v41, %v2690_v46  ;;  %v2692_v19 = vmax.f32 %v2664_v44, %v2668_v47  ;;  %v2614_v52 = vpop.f32.mrb[96].mxu0 }
 0x5ae   :  { %v2616_v53 = vpop.f32.mrb[97].mxu0  ;;  %v3756_v59 = vadd.f32 %v2614_v52, %v5007_v28 }
 0x5af   :  { %v2704_v27 = vmax.f32 %v2691_v48, %v2692_v19  ;;  %v2618_v24 = vpop.f32.mrb[98].mxu0  ;;  %v3757_v29 = vadd.f32 %v2616_v53, %v5011_v9 }
 0x5b0   :  { %v2620_v55 = vpop.f32.mrb[99].mxu0  ;;  %v3758_v23 = vadd.f32 %v2618_v24, %v5007_v28  ;;  %v2669_v3 = vmax.f32 %v3756_v59, 0.0  ;;  %v4101_v24 = vld [vmem:[#allocation13] sm:$0xff]  }
 0x5b1   :  { %v2710_v58 = vpack.c.bf16 %v2704_v27, %v2703_v51  ;;  %v3759_v21 = vadd.f32 %v2620_v55, %v5011_v9  ;;  %v2670_v4 = vmax.f32 %v3757_v29, 0.0  ;;  %v4102_v55 = vld [vmem:[#allocation13 + $0x8] sm:$0xff]   ;;  %v4105_v59 = vld [vmem:[#allocation13 + $0x20] sm:$0xff]  }
 0x5b2   :  { %v2671_v8 = vmax.f32 %v3758_v23, 0.0  ;;  %v4106_v29 = vld [vmem:[#allocation13 + $0x28] sm:$0xff]   ;;  %v4108_v23 = vld [vmem:[#allocation13 + $0x38] sm:$0xff]  }
 0x5b3   :  { %3008 = vmatprep.mubr.bf16.mxu1 %v2710_v58  ;;  %v2672_v13 = vmax.f32 %v3759_v21, 0.0  ;;  %v4104_v58 = vld [vmem:[#allocation13 + $0x18] sm:$0xff]  }
 0x5b4   :  { %3009 = vmatmul.mubr.bf16.vlgmr.msra.gmra.mrb[64].mxu1 %v2709_v63 }
 0x5b5   :  { %v2624_v30 = vpop.f32.mrb[100].mxu0 }
 0x5b6   :  { %v3760_v60 = vadd.f32 %v2624_v30, %v5007_v28  ;;  %v2626_v61 = vpop.f32.mrb[101].mxu0  ;;  %v4107_v30 = vld [vmem:[#allocation13 + $0x30] sm:$0xff]  }
 0x5b7   :  { %v3761_v54 = vadd.f32 %v2626_v61, %v5011_v9  ;;  %v2628_v1 = vpop.f32.mrb[102].mxu0 }
 0x5b8   :  { %v2673_v42 = vmax.f32 %v3760_v60, 0.0  ;;  %v3762_v45 = vadd.f32 %v2628_v1, %v5007_v28  ;;  %v2630_v56 = vpop.f32.mrb[103].mxu0 }
 0x5b9   :  { %v2674_v5 = vmax.f32 %v3761_v54, 0.0  ;;  %v3763_v7 = vadd.f32 %v2630_v56, %v5011_v9 }
 0x5ba   :  { %v2693_v34 = vmax.f32 %v2669_v3, %v2673_v42  ;;  %v2675_v12 = vmax.f32 %v3762_v45, 0.0  ;;  %v3392_v42 = vld [vmem:[%s5091_s10] ss:$0 sm:$0xff] }
 0x5bb   :  { %v2694_v26 = vmax.f32 %v2670_v4, %v2674_v5  ;;  %v2676_v16 = vmax.f32 %v3763_v7, 0.0 }
 0x5bc   :  { %v2695_v20 = vmax.f32 %v2671_v8, %v2675_v12 }
 0x5bd   :  { %v2705_v36 = vmax.f32 %v2693_v34, %v2694_v26  ;;  %v2696_v50 = vmax.f32 %v2672_v13, %v2676_v16  ;;  %v2634_v22 = vpop.f32.mrb[104].mxu0 }
 0x5be   :  { %v2636_v33 = vpop.f32.mrb[105].mxu0  ;;  %v3764_v2 = vadd.f32 %v2634_v22, %v5007_v28  ;;  %v3425_v22 = vld [vmem:[%s5093_s12] ss:$0 sm:$0xff] }
 0x5bf   :  { %v2706_v10 = vmax.f32 %v2695_v20, %v2696_v50  ;;  %v2638_v57 = vpop.f32.mrb[106].mxu0  ;;  %v3765_v32 = vadd.f32 %v2636_v33, %v5011_v9  ;;  %v5049_v50 = vand.u32 127, %v886_v17 }
 0x5c0   :  { %v2640_v63 = vpop.f32.mrb[107].mxu0  ;;  %v3766_v15 = vadd.f32 %v2638_v57, %v5007_v28  ;;  %v2677_v6 = vmax.f32 %v3764_v2, 0.0 }
 0x5c1   :  { %v2711_v38 = vpack.c.bf16 %v2706_v10, %v2705_v36  ;;  %v3767_v11 = vadd.f32 %v2640_v63, %v5011_v9  ;;  %v2678_v35 = vmax.f32 %v3765_v32, 0.0  ;;  %vm3176_vm4 = vcmp.ge.s32.totalorder %v5049_v50, 5 }
 0x5c2   :  { %v2679_v41 = vmax.f32 %v3766_v15, 0.0  ;;  %vm3177_vm5 = vcmp.lt.s32.totalorder %v5049_v50, 55  ;;  %vm3175_vm7 = vcmp.lt.s32.totalorder %v5049_v50, 5  ;;  %vm3179_vm8 = vcmp.ge.s32.totalorder %v5049_v50, 55 }
 0x5c3   :  { %v2680_v46 = vmax.f32 %v3767_v11, 0.0  ;;  %vm5056_vm6 = vmand %vm3176_vm4, %vm3177_vm5  ;;  %vm3180_vm9 = vcmp.lt.s32.totalorder %v5049_v50, 60 }
 0x5c4   :  { %vm3181_vm10 = vmand %vm3179_vm8, %vm3180_vm9 }
 0x5c5   :  { %v2644_v31 = vpop.f32.mrb[108].mxu0 }
 0x5c6   :  { %v3768_v39 = vadd.f32 %v2644_v31, %v5007_v28  ;;  %v2646_v37 = vpop.f32.mrb[109].mxu0 }
 0x5c7   :  { %v3769_v49 = vadd.f32 %v2646_v37, %v5011_v9  ;;  %v2648_v62 = vpop.f32.mrb[110].mxu0 }
 0x5c8   :  { %v2681_v0 = vmax.f32 %v3768_v39, 0.0  ;;  %v3770_v18 = vadd.f32 %v2648_v62, %v5007_v28  ;;  %v2650_v25 = vpop.f32.mrb[111].mxu0  ;;  %v4249_v28 = vmov 0.0  }
 0x5c9   :  { %v2682_v14 = vmax.f32 %v3769_v49, 0.0  ;;  %v3771_v40 = vadd.f32 %v2650_v25, %v5011_v9  ;;  %3656 = vmatprep.subr.bf16.mxu1 %v4249_v28  ;;  %v4103_v9 = vld [vmem:[#allocation13 + $0x10] sm:$0xff]   ;;  %3672 = vmatprep.mubr.msk.bf16.mxu1 %vm4250_vm3, %v4249_v28 }
 0x5ca   :  { %v2697_v43 = vmax.f32 %v2677_v6, %v2681_v0  ;;  %v2683_v44 = vmax.f32 %v3770_v18, 0.0  ;;  %3657 = vmatpush3.bf16.msra.mxu1 %v4101_v24 }
 0x5cb   :  { %v2698_v47 = vmax.f32 %v2678_v35, %v2682_v14  ;;  %v2684_v48 = vmax.f32 %v3771_v40, 0.0  ;;  %3658 = vmatprep.subr.bf16.mxu1 %v4249_v28 }
 0x5cc   :  { %v2699_v51 = vmax.f32 %v2679_v41, %v2683_v44 }
 0x5cd   :  { %v2707_v19 = vmax.f32 %v2697_v43, %v2698_v47  ;;  %v2700_v52 = vmax.f32 %v2680_v46, %v2684_v48 }
 0x5ce   :  { %3659 = vmatpush3.bf16.msra.mxu1 %v4102_v55 }
 0x5cf   :  { %v2708_v53 = vmax.f32 %v2699_v51, %v2700_v52  ;;  %3660 = vmatprep.subr.bf16.mxu1 %v4249_v28 }
 0x5d1   :  { %v2712_v27 = vpack.c.bf16 %v2708_v53, %v2707_v19 }
 0x5d2   :  { %3661 = vmatpush3.bf16.msra.mxu1 %v4103_v9 }
 0x5d3   :  { %3049 = vmatprep.mubr.bf16.mxu0 %v2712_v27  ;;  %3662 = vmatprep.subr.bf16.mxu1 %v4249_v28 }
 0x5d4   :  { %3050 = vmatmul.mubr.bf16.vlgmr.msra.gmra.mrb[112].mxu0 %v2711_v38 }
 0x5d6   :  { %3663 = vmatpush3.bf16.msra.mxu1 %v4104_v58 }
 0x5d7   :  { %3664 = vmatprep.subr.bf16.mxu1 %v4249_v28 }
 0x5da   :  { %3665 = vmatpush3.bf16.msra.mxu1 %v4105_v59 }
 0x5db   :  { %3666 = vmatprep.subr.bf16.mxu1 %v4249_v28 }
 0x5de   :  { %3667 = vmatpush3.bf16.msra.mxu1 %v4106_v29 }
 0x5df   :  { %3668 = vmatprep.subr.bf16.mxu1 %v4249_v28 }
 0x5e2   :  { %3669 = vmatpush3.bf16.msra.mxu1 %v4107_v30 }
 0x5e3   :  { %3670 = vmatprep.subr.bf16.mxu1 %v4249_v28 }
 0x5e6   :  { %3671 = vmatpush3.bf16.msra.mxu1 %v4108_v23 }
 0x687   :  { %v3549_v60 = vpop.f32.mrb[64].mxu1 }
 0x688   :  { %v3550_v61 = vpop.f32.mrb[65].mxu1 }
 0x689   :  { %v3551_v21 = vadd.f32 %v3550_v61, %v3549_v60  ;;  %v3552_v54 = vpop.f32.mrb[66].mxu1 }
 0x68a   :  { %v3553_v1 = vpop.f32.mrb[67].mxu1 }
 0x68b   :  { %v3554_v3 = vadd.f32 %v3553_v1, %v3552_v54  ;;  %v3011_v4 = vadd.f32 %v3551_v21, %v3392_v42 }
 0x68d   :  { %v3014_v34 = vadd.f32 %v3554_v3, %v3392_v42 }
 0x6a7   :  { %v3571_v45 = vpop.f32.mrb[112].mxu0 }
 0x6a8   :  { %v3572_v56 = vpop.f32.mrb[113].mxu0 }
 0x6a9   :  { %v3573_v5 = vadd.f32 %v3572_v56, %v3571_v45  ;;  %v3574_v7 = vpop.f32.mrb[114].mxu0 }
 0x6aa   :  { %v3575_v8 = vpop.f32.mrb[115].mxu0 }
 0x6ab   :  { %v3052_v12 = vadd.f32 %v3573_v5, %v3011_v4  ;;  %v3576_v13 = vadd.f32 %v3575_v8, %v3574_v7 }
 0x6ad   :  { %v3055_v26 = vadd.f32 %v3576_v13, %v3014_v34  ;;  %v3058_v16 = vmax.f32 %v3052_v12, 0.0 }
 0x6af   :  { %v3059_v20 = vmax.f32 %v3055_v26, 0.0 }
 0x6b1   :  { %v3060_v36 = vpack.c.bf16 %v3059_v20, %v3058_v16 }
 0x6b3   :  { %3673 = vmatmul.mubr.bf16.vlgmr.msra.gmra.mrb[68].mxu1 %v3060_v36 }
 0x786   :  { %v3166_v33 = vpop.f32.mrb[68].mxu1 }
 0x787   :  { %v3167_v57 = vadd.f32 %v3425_v22, %v3166_v33  ;;  %v3674_v63 = vpop.f32.mrb[69].mxu1 }
 0x788   :  { %v3169_v38 = vpop.f32.mrb[70].mxu1 }
 0x789   :  { %v3208_v17 = vmul.f32 0.5, %v3167_v57  ;;  %v3220_v2 = vsel %vm5056_vm6, %v3167_v57, 0.0  ;;  %v3170_v32 = vadd.f32 %v3425_v22, %v3169_v38  ;;  %v3675_v31 = vpop.f32.mrb[71].mxu1  ;;  %v3182_v15 = vsel %vm3175_vm7, %v3167_v57, -1e+30 }
 0x78a   :  { %3184 = vmax.xlane.f32.xlu0 %v3182_v15 }
 0x78b   :  { %4109 = vtanh.f32 %v3208_v17  ;;  %v3209_v39 = vmul.f32 0.5, %v3170_v32  ;;  %v3221_v37 = vsel %vm5056_vm6, %v3170_v32, 0.0  ;;  %v3183_v11 = vsel %vm3175_vm7, %v3170_v32, -1e+30 }
 0x78c   :  { %3186 = vmax.xlane.f32.xlu1 %v3183_v11 }
 0x78d   :  { %4111 = vtanh.f32 %v3209_v39 }
 0x795   :  { %v4110_v49 = vpop.eup %4109 }
 0x796   :  { %v3212_v62 = vadd.f32 1.0, %v4110_v49 }
 0x797   :  { %v4112_v6 = vpop.eup %4111 }
 0x798   :  { %v3214_v0 = vmul.f32 0.5, %v3212_v62  ;;  %v3213_v18 = vadd.f32 1.0, %v4112_v6 }
 0x79a   :  { %v3216_v25 = vmul.f32 9.9999, %v3214_v0  ;;  %v3215_v35 = vmul.f32 0.5, %v3213_v18 }
 0x79c   :  { %v3218_v14 = vadd.f32 0.0001, %v3216_v25  ;;  %v3217_v40 = vmul.f32 9.9999, %v3215_v35 }
 0x79e   :  { %v3222_v41 = vsel %vm3181_vm10, %v3218_v14, %v3220_v2  ;;  %v3219_v43 = vadd.f32 0.0001, %v3217_v40 }
 0x7a0   :  { %v3223_v44 = vsel %vm3181_vm10, %v3219_v43, %v3221_v37 }
 0x817   :  { %v3185_v46 = vpop.xlane.xlu0 %3184 }
 0x818   :  { %v3188_v47 = vsub.f32 %v3182_v15, %v3185_v46 }
 0x819   :  { %v3187_v48 = vpop.xlane.xlu1 %3186 }
 0x81a   :  { %v3190_v51 = vmul.f32 1.442695, %v3188_v47  ;;  %v3189_v19 = vsub.f32 %v3183_v11, %v3187_v48 }
 0x81c   :  { %4113 = vpow2.f32 %v3190_v51  ;;  %v3192_v52 = vmul.f32 1.442695, %v3189_v19 }
 0x81e   :  { %4115 = vpow2.f32 %v3192_v52 }
 0x826   :  { %v4114_v53 = vpop.eup %4113 }
 0x827   :  { %3194 = vadd.xlane.f32.xlu0 %v4114_v53 }
 0x828   :  { %v4116_v27 = vpop.eup %4115 }
 0x82b   :  { %3196 = vadd.xlane.f32.xlu0 %v4116_v27 }
 0x8b4   :  { %v3195_v24 = vpop.xlane.xlu0 %3194 }
 0x8b5   :  { %4117 = vrcp.f32 %v3195_v24 }
 0x8b8   :  { %v3197_v28 = vpop.xlane.xlu0 %3196 }
 0x8b9   :  { %4119 = vrcp.f32 %v3197_v28 }
 0x8bf   :  { %v4118_v55 = vpop.eup %4117 }
 0x8c0   :  { %v3200_v9 = vmul.f32 %v4118_v55, %v3195_v24 }
 0x8c2   :  { %v3202_v58 = vsub.f32 2.0, %v3200_v9 }
 0x8c3   :  { %v4120_v59 = vpop.eup %4119 }
 0x8c4   :  { %v3204_v29 = vmul.f32 %v4118_v55, %v3202_v58  ;;  %v3201_v30 = vmul.f32 %v4120_v59, %v3197_v28 }
 0x8c6   :  { %v3206_v23 = vmul.f32 %v4114_v53, %v3204_v29  ;;  %v3203_v60 = vsub.f32 2.0, %v3201_v30 }
 0x8c8   :  { %v3224_v61 = vsel %vm3175_vm7, %v3206_v23, %v3222_v41  ;;  %v3205_v21 = vmul.f32 %v4120_v59, %v3203_v60 }
 0x8c9   :  { %3226 = vst [vmem:[%s5094_s13] sm:$0xff] %v3224_v61 }
 0x8ca   :  { %v3207_v54 = vmul.f32 %v4116_v27, %v3205_v21 }
 0x8cc   :  { %v3225_v1 = vsel %vm3175_vm7, %v3207_v54, %v3223_v44 }
 0x8cd   :  { %3227 = vst [vmem:[%s5094_s13 + $0x8] sm:$0xff] %v3225_v1 }
 0x8ce   :  { %3232 = vsyncpa [#allocation7], 1 }
 0x8cf   :  { %3233 = vsyncpa [#allocation9], 1 }
 0x8d0   :  { %3234 = vsyncpa [#allocation12], 1 }

</bundles_post_ra>
